<compile_context>
chip_gen: v5e
topology: v5e:2x2
jax: 0.10.0
libtpu: 0.0.40
codegen_flags: <defaults>
</compile_context>

<pallas_src>
import functools

import numpy as np
import jax
import jax.numpy as jnp
from jax.experimental import pallas as pl
from jax.experimental.pallas import tpu as pltpu

MXU_DTYPE = jnp.bfloat16   # MXU operand dtype (bf16-native matmul on v5e/v6e/v7x)
LANE = 128                 # lane width; all feature dims padded to a multiple of this


def _round_up(x, m):
    return (x + m - 1) // m * m


# -----------------------------------------------------------------------------
# Host-side weight folding: each causal dilated conv (channel mix + time shift)
# becomes one block-banded matrix so each conv is a single MXU matmul.
# -----------------------------------------------------------------------------
def _dilated_conv_matrix(w, dilation, length):
    """w: [K, Cin, Cout] -> [L*Cin, L*Cout] encoding causal shift + channel mix."""
    ksize, cin, cout = w.shape
    big = np.zeros((length * cin, length * cout), np.float32)
    for t_out in range(length):
        for k in range(ksize):
            t_in = t_out - dilation * (ksize - 1 - k)
            if t_in < 0:          # tap falls entirely in the causal zero padding
                continue
            big[t_in * cin:(t_in + 1) * cin, t_out * cout:(t_out + 1) * cout] = w[k]
    return big


def _pointwise_matrix(w, length):
    """w: [Cin, Cout] (1x1 conv) -> block-diagonal [L*Cin, L*Cout]."""
    cin, cout = w.shape
    big = np.zeros((length * cin, length * cout), np.float32)
    for t in range(length):
        big[t * cin:(t + 1) * cin, t * cout:(t + 1) * cout] = w
    return big


def _decoder_matrix(dec_w, dec_b, target_size):
    """dec_w: [n_in, n_out], dec_b: [n_out] -> [n_in*ts, n_out*ts], [n_out*ts]."""
    n_in, n_out = dec_w.shape
    big = np.zeros((n_in * target_size, n_out * target_size), np.float32)
    bias = np.zeros((n_out * target_size,), np.float32)
    for i in range(n_in):
        for o in range(n_out):
            for c in range(target_size):
                big[i * target_size + c, o * target_size + c] = dec_w[i, o]
    for o in range(n_out):
        bias[o * target_size:(o + 1) * target_size] = dec_b[o]
    return big, bias


def _embed(mat, rows, cols):
    out = np.zeros((rows, cols), np.float32)
    out[:mat.shape[0], :mat.shape[1]] = mat
    return out


def _embed_vec(vec, cols):
    out = np.zeros((cols,), np.float32)
    out[:vec.shape[0]] = vec
    return out


def pack_params(block_params, dec_params, *, length, dilation_base):
    """Fold every conv into a banded matrix, fuse conv1|conv3, and concatenate
    everything into ONE bf16 weight matrix [FEAT, C_total] plus ONE f32 bias row
    [1, C_total] sharing the same column offsets (single DMA each per call)."""
    num_layers = len(block_params)
    target_size = int(np.asarray(block_params[-1]["w2"]).shape[2])
    input_size = int(np.asarray(block_params[0]["w1"]).shape[1])
    num_filters = int(np.asarray(block_params[0]["w1"]).shape[2])
    n_out = int(np.asarray(dec_params["w"]).shape[1])
    feat = _round_up(max(length * input_size, length * num_filters,
                         length * target_size, n_out * target_size, LANE), LANE)

    mats, vecs, layer_cols = [], [], []
    col = 0
    for i, p in enumerate(block_params):
        d = dilation_base ** i
        m1 = _embed(_dilated_conv_matrix(np.asarray(p["w1"], np.float32), d, length),
                    feat, feat)
        v1 = _embed_vec(np.tile(np.asarray(p["b1"], np.float32), length), feat)
        if "w3" in p:   # fuse conv1 | conv3 (same LHS) into one wider matmul
            m3 = _embed(_pointwise_matrix(np.asarray(p["w3"], np.float32), length),
                        feat, feat)
            v3 = _embed_vec(np.tile(np.asarray(p["b3"], np.float32), length), feat)
            mat_a = np.concatenate([m1, m3], axis=1)
            vec_a = np.concatenate([v1, v3], axis=0)
        else:
            mat_a, vec_a = m1, v1
        m2 = _embed(_dilated_conv_matrix(np.asarray(p["w2"], np.float32), d, length),
                    feat, feat)
        v2 = _embed_vec(np.tile(np.asarray(p["b2"], np.float32), length), feat)
        c1 = col
        col += mat_a.shape[1]
        c2 = col
        col += feat
        layer_cols.append((int(c1), int(mat_a.shape[1]), int(c2)))
        mats += [mat_a, m2]
        vecs += [vec_a, v2]

    dmat, dvec = _decoder_matrix(np.asarray(dec_params["w"], np.float32),
                                 np.asarray(dec_params["b"], np.float32), target_size)
    dec_col = col
    mats.append(_embed(dmat, feat, feat))
    vecs.append(_embed_vec(dvec, feat))

    w_all = jnp.asarray(np.concatenate(mats, axis=1), MXU_DTYPE)       # [FEAT, C_total]
    b_all = jnp.asarray(np.concatenate(vecs, axis=0)[None, :], jnp.float32)  # [1, C_total]
    meta = dict(layer_cols=tuple(layer_cols), dec_col=int(dec_col), feat=int(feat),
                num_layers=num_layers, n_out=n_out, target_size=target_size)
    return w_all, b_all, meta


# -----------------------------------------------------------------------------
# Fused kernel: all residual blocks + decoder; activations never leave VMEM.
# -----------------------------------------------------------------------------
def _make_fused_kernel(layer_cols, dec_col, num_layers, feat):
    def kernel(x_ref, w_ref, b_ref, o_ref):
        x = x_ref[...]                                     # [TILE_B, FEAT] float32
        for i in range(num_layers):
            c1, wa, c2 = layer_cols[i]
            xm = x.astype(MXU_DTYPE)                       # MXU operand, f32 accumulate
            y = (jnp.dot(xm, w_ref[:, c1:c1 + wa], preferred_element_type=jnp.float32)
                 + b_ref[:, c1:c1 + wa])
            if wa == 2 * feat:                             # fused conv1 | conv3
                h, res = y[:, :feat], y[:, feat:]
            else:                                          # identity residual
                h, res = y, x
            h = jnp.maximum(h, 0.0)                        # ReLU (dropout p=0 -> identity)
            h = (jnp.dot(h.astype(MXU_DTYPE), w_ref[:, c2:c2 + feat],
                         preferred_element_type=jnp.float32)
                 + b_ref[:, c2:c2 + feat])
            if i < num_layers - 1:
                h = jnp.maximum(h, 0.0)
            x = h + res                                    # residual add (no ReLU on sum)
        o_ref[...] = (jnp.dot(x.astype(MXU_DTYPE), w_ref[:, dec_col:dec_col + feat],
                              preferred_element_type=jnp.float32)
                      + b_ref[:, dec_col:dec_col + feat])  # lane-dense [TILE_B, FEAT] store
    return kernel


@functools.partial(jax.jit,
                   static_argnames=("layer_cols", "dec_col", "num_layers", "feat", "tile_b"))
def _tcn_forward_impl(x_pad, w_all, b_all, *, layer_cols, dec_col, num_layers, feat, tile_b):
    b_pad = x_pad.shape[0]
    c_total = w_all.shape[1]
    return pl.pallas_call(
        _make_fused_kernel(layer_cols, dec_col, num_layers, feat),
        out_shape=jax.ShapeDtypeStruct((b_pad, feat), jnp.float32),
        grid=(b_pad // tile_b,),
        in_specs=[
            pl.BlockSpec((tile_b, feat), lambda i: (i, 0)),     # batch tile (pipelined)
            pl.BlockSpec((feat, c_total), lambda i: (0, 0)),    # packed weights, resident
            pl.BlockSpec((1, c_total), lambda i: (0, 0)),       # packed biases, resident
        ],
        out_specs=pl.BlockSpec((tile_b, feat), lambda i: (i, 0)),
        compiler_params=pltpu.CompilerParams(
            dimension_semantics=("parallel",),                  # shard batch tiles on v7x
            vmem_limit_bytes=32 * 1024 * 1024),                 # explicit, safe on v5e–v7x
    )(x_pad, w_all, b_all)


def tcn_forward(history_data, future_data, w_all, b_all, meta, *, tile_b=None):
    del future_data                                        # unused by the PyTorch forward
    x = history_data[..., 0].astype(jnp.float32)           # [B, n_in, input_size]
    batch, length, cin0 = x.shape
    feat = meta["feat"]
    if tile_b is None:
        # MXU-friendly M dimension, trivially within v7x's 64 MiB VMEM at this footprint.
        tile_b = min(256, _round_up(batch, 8))
    b_pad = _round_up(batch, tile_b)
    x_pad = jnp.zeros((b_pad, feat), jnp.float32)
    x_pad = x_pad.at[:batch, :length * cin0].set(x.reshape(batch, length * cin0))
    out = _tcn_forward_impl(x_pad, w_all, b_all,
                            layer_cols=meta["layer_cols"], dec_col=meta["dec_col"],
                            num_layers=meta["num_layers"], feat=feat, tile_b=tile_b)
    n_out, ts = meta["n_out"], meta["target_size"]
    return out[:batch, :n_out * ts].reshape(batch, n_out, ts, 1)


# -----------------------------------------------------------------------------
# Parameter construction (deterministic, mirrors the PyTorch module __init__)
# -----------------------------------------------------------------------------
def init_tcn_params(key, *, input_size, target_size, kernel_size, num_filters,
                    num_layers, n_in, n_out):
    blocks = []
    for i in range(num_layers):
        cin = input_size if i == 0 else num_filters
        cout = target_size if i == num_layers - 1 else num_filters
        key, k1, k2, k3, k4, k5, k6 = jax.random.split(key, 7)
        p = {
            # conv weights ~ N(0, 0.01) as in init_weights(); layout [K, Cin, Cout]
            "w1": 0.01 * jax.random.normal(k1, (kernel_size, cin, num_filters), jnp.float32),
            "b1": 0.1 * jax.random.normal(k2, (num_filters,), jnp.float32),
            "w2": 0.01 * jax.random.normal(k3, (kernel_size, num_filters, cout), jnp.float32),
            "b2": 0.1 * jax.random.normal(k4, (cout,), jnp.float32),
        }
        if cin != cout:  # 1x1 residual projection (conv3)
            p["w3"] = 0.01 * jax.random.normal(k5, (cin, cout), jnp.float32)
            p["b3"] = 0.1 * jax.random.normal(k6, (cout,), jnp.float32)
        blocks.append(p)
    key, kd1, kd2 = jax.random.split(key, 3)
    dec = {"w": 0.01 * jax.random.normal(kd1, (n_in, n_out), jnp.float32),
           "b": 0.1 * jax.random.normal(kd2, (n_out,), jnp.float32)}
    return blocks, dec


# -----------------------------------------------------------------------------
# Pure-JAX reference (same bf16 MXU-operand rounding as the kernel) for checking.
# -----------------------------------------------------------------------------
def _bf16(a):
    return a.astype(jnp.bfloat16).astype(jnp.float32)


def _ref_causal_conv(x, w, b, dilation):
    ksize = w.shape[0]
    length = x.shape[1]
    acc = jnp.zeros(x.shape[:2] + (w.shape[2],), jnp.float32)
    for k in range(ksize):
        s = dilation * (ksize - 1 - k)
        if s >= length:
            continue
        xs = jnp.pad(x[:, :length - s, :], ((0, 0), (s, 0), (0, 0)))
        acc = acc + jnp.einsum("blc,co->blo", xs, w[k])
    return acc + b[None, None, :]


def tcn_reference(history_data, blocks, dec, *, dilation_base, num_layers):
    x = history_data[..., 0].astype(jnp.float32)
    for i, p in enumerate(blocks):
        d = dilation_base ** i
        xq = _bf16(x)
        h = jax.nn.relu(_ref_causal_conv(xq, _bf16(p["w1"]), p["b1"], d))
        h = _ref_causal_conv(_bf16(h), _bf16(p["w2"]), p["b2"], d)
        if i < num_layers - 1:
            h = jax.nn.relu(h)
        if "w3" in p:
            res = jnp.einsum("blc,co->blo", xq, _bf16(p["w3"])) + p["b3"][None, None, :]
        else:
            res = x
        x = h + res
    out = jnp.einsum("bit,io->bot", _bf16(x), _bf16(dec["w"])) + dec["b"][None, :, None]
    return out[..., None]


if __name__ == "__main__":
    # Module hyper-parameters (defaults of the PyTorch TCN)
    N_IN, N_OUT = 8, 1
    INPUT_SIZE, TARGET_SIZE = 3, 3
    KERNEL_SIZE, NUM_FILTERS, NUM_LAYERS, DILATION_BASE = 7, 32, 5, 2
    B = 2

    key = jax.random.PRNGKey(0)
    key, kx, kf = jax.random.split(key, 3)
    history_data = jax.random.normal(kx, (B, N_IN, INPUT_SIZE, 1), jnp.float32)
    future_data = jax.random.normal(kf, (B, N_OUT, TARGET_SIZE, 1), jnp.float32)  # unused

    blocks, dec = init_tcn_params(
        key, input_size=INPUT_SIZE, target_size=TARGET_SIZE,
        kernel_size=KERNEL_SIZE, num_filters=NUM_FILTERS,
        num_layers=NUM_LAYERS, n_in=N_IN, n_out=N_OUT)

    w_all, b_all, meta = pack_params(blocks, dec, length=N_IN, dilation_base=DILATION_BASE)

    out = tcn_forward(history_data, future_data, w_all, b_all, meta)
    out = jax.block_until_ready(out)
    assert out.shape == (B, N_OUT, TARGET_SIZE, 1), out.shape
    assert out.dtype == jnp.float32

    ref = jax.block_until_ready(
        tcn_reference(history_data, blocks, dec,
                      dilation_base=DILATION_BASE, num_layers=NUM_LAYERS))
    np.testing.assert_allclose(np.asarray(out), np.asarray(ref), rtol=2e-2, atol=2e-3)

    # Exercise the batch grid (multiple tiles on the "parallel" axis).
    B2 = 20
    key, kx2 = jax.random.split(key)
    hist2 = jax.random.normal(kx2, (B2, N_IN, INPUT_SIZE, 1), jnp.float32)
    out2 = jax.block_until_ready(
        tcn_forward(hist2, None, w_all, b_all, meta, tile_b=8))
    ref2 = jax.block_until_ready(
        tcn_reference(hist2, blocks, dec,
                      dilation_base=DILATION_BASE, num_layers=NUM_LAYERS))
    assert out2.shape == (B2, N_OUT, TARGET_SIZE, 1), out2.shape
    np.testing.assert_allclose(np.asarray(out2), np.asarray(ref2), rtol=2e-2, atol=2e-3)

    print("KERNEL_OK")
</pallas_src>

<mosaic_0001>
module attributes {stable_mosaic.version = 11 : i64} {
  func.func @kernel(%arg0: i32, %arg1: memref<8x256xf32, #tpu.memory_space<vmem>>, %arg2: memref<256x3328xbf16, #tpu.memory_space<vmem>>, %arg3: memref<1x3328xf32, #tpu.memory_space<vmem>>, %arg4: memref<8x256xf32, #tpu.memory_space<vmem>>) attributes {dimension_semantics = [#tpu.dimension_semantics<parallel>], iteration_bounds = array<i64: 1>, scalar_prefetch = 0 : i64, scratch_operands = 0 : i64, tpu.core_type = #tpu.core_type<tc>, window_params = [{transform_indices = @transform_0, window_bounds = array<i64: 8, 256>}, {pipeline_mode = #tpu.pipeline_mode<synchronous>, transform_indices = @transform_1, window_bounds = array<i64: 256, 3328>}, {pipeline_mode = #tpu.pipeline_mode<synchronous>, transform_indices = @transform_2, window_bounds = array<i64: 1, 3328>}, {transform_indices = @transform_3, window_bounds = array<i64: 8, 256>}]} {
    %c0 = arith.constant 0 : index
    %c0_0 = arith.constant 0 : index
    %0 = vector.load %arg1[%c0, %c0_0] : memref<8x256xf32, #tpu.memory_space<vmem>>, vector<8x256xf32>
    %1 = arith.truncf %0 : vector<8x256xf32> to vector<8x256xbf16>
    %c0_1 = arith.constant 0 : index
    %c0_2 = arith.constant 0 : index
    %2 = vector.load %arg2[%c0_1, %c0_2] : memref<256x3328xbf16, #tpu.memory_space<vmem>>, vector<256x512xbf16>
    %cst = arith.constant dense<0.000000e+00> : vector<8x512xf32>
    %3 = tpu.matmul %1, %2, %cst {dimension_numbers = #tpu.dot_dimension_numbers<[1], [0], [0], [1], [0, 0, 1, 1], [], []>} : vector<8x256xbf16>, vector<256x512xbf16>, vector<8x512xf32> -> vector<8x512xf32>
    %c0_3 = arith.constant 0 : index
    %c0_4 = arith.constant 0 : index
    %4 = vector.load %arg3[%c0_3, %c0_4] : memref<1x3328xf32, #tpu.memory_space<vmem>>, vector<1x512xf32>
    %5 = vector.broadcast %4 : vector<1x512xf32> to vector<8x512xf32>
    %6 = arith.addf %3, %5 : vector<8x512xf32>
    %7 = vector.extract_strided_slice %6 {offsets = [0, 0], sizes = [8, 256], strides = [1, 1]} : vector<8x512xf32> to vector<8x256xf32>
    %8 = vector.extract_strided_slice %6 {offsets = [0, 256], sizes = [8, 256], strides = [1, 1]} : vector<8x512xf32> to vector<8x256xf32>
    %cst_5 = arith.constant 0.000000e+00 : f32
    %9 = vector.broadcast %cst_5 : f32 to vector<8x256xf32>
    %10 = arith.maximumf %7, %9 : vector<8x256xf32>
    %11 = arith.truncf %10 : vector<8x256xf32> to vector<8x256xbf16>
    %c0_6 = arith.constant 0 : index
    %c512 = arith.constant 512 : index
    %12 = vector.load %arg2[%c0_6, %c512] : memref<256x3328xbf16, #tpu.memory_space<vmem>>, vector<256x256xbf16>
    %cst_7 = arith.constant dense<0.000000e+00> : vector<8x256xf32>
    %13 = tpu.matmul %11, %12, %cst_7 {dimension_numbers = #tpu.dot_dimension_numbers<[1], [0], [0], [1], [0, 0, 1, 1], [], []>} : vector<8x256xbf16>, vector<256x256xbf16>, vector<8x256xf32> -> vector<8x256xf32>
    %c0_8 = arith.constant 0 : index
    %c512_9 = arith.constant 512 : index
    %14 = vector.load %arg3[%c0_8, %c512_9] : memref<1x3328xf32, #tpu.memory_space<vmem>>, vector<1x256xf32>
    %15 = vector.broadcast %14 : vector<1x256xf32> to vector<8x256xf32>
    %16 = arith.addf %13, %15 : vector<8x256xf32>
    %cst_10 = arith.constant 0.000000e+00 : f32
    %17 = vector.broadcast %cst_10 : f32 to vector<8x256xf32>
    %18 = arith.maximumf %16, %17 : vector<8x256xf32>
    %19 = arith.addf %18, %8 : vector<8x256xf32>
    %20 = arith.truncf %19 : vector<8x256xf32> to vector<8x256xbf16>
    %c0_11 = arith.constant 0 : index
    %c768 = arith.constant 768 : index
    %21 = vector.load %arg2[%c0_11, %c768] : memref<256x3328xbf16, #tpu.memory_space<vmem>>, vector<256x256xbf16>
    %cst_12 = arith.constant dense<0.000000e+00> : vector<8x256xf32>
    %22 = tpu.matmul %20, %21, %cst_12 {dimension_numbers = #tpu.dot_dimension_numbers<[1], [0], [0], [1], [0, 0, 1, 1], [], []>} : vector<8x256xbf16>, vector<256x256xbf16>, vector<8x256xf32> -> vector<8x256xf32>
    %c0_13 = arith.constant 0 : index
    %c768_14 = arith.constant 768 : index
    %23 = vector.load %arg3[%c0_13, %c768_14] : memref<1x3328xf32, #tpu.memory_space<vmem>>, vector<1x256xf32>
    %24 = vector.broadcast %23 : vector<1x256xf32> to vector<8x256xf32>
    %25 = arith.addf %22, %24 : vector<8x256xf32>
    %cst_15 = arith.constant 0.000000e+00 : f32
    %26 = vector.broadcast %cst_15 : f32 to vector<8x256xf32>
    %27 = arith.maximumf %25, %26 : vector<8x256xf32>
    %28 = arith.truncf %27 : vector<8x256xf32> to vector<8x256xbf16>
    %c0_16 = arith.constant 0 : index
    %c1024 = arith.constant 1024 : index
    %29 = vector.load %arg2[%c0_16, %c1024] : memref<256x3328xbf16, #tpu.memory_space<vmem>>, vector<256x256xbf16>
    %cst_17 = arith.constant dense<0.000000e+00> : vector<8x256xf32>
    %30 = tpu.matmul %28, %29, %cst_17 {dimension_numbers = #tpu.dot_dimension_numbers<[1], [0], [0], [1], [0, 0, 1, 1], [], []>} : vector<8x256xbf16>, vector<256x256xbf16>, vector<8x256xf32> -> vector<8x256xf32>
    %c0_18 = arith.constant 0 : index
    %c1024_19 = arith.constant 1024 : index
    %31 = vector.load %arg3[%c0_18, %c1024_19] : memref<1x3328xf32, #tpu.memory_space<vmem>>, vector<1x256xf32>
    %32 = vector.broadcast %31 : vector<1x256xf32> to vector<8x256xf32>
    %33 = arith.addf %30, %32 : vector<8x256xf32>
    %cst_20 = arith.constant 0.000000e+00 : f32
    %34 = vector.broadcast %cst_20 : f32 to vector<8x256xf32>
    %35 = arith.maximumf %33, %34 : vector<8x256xf32>
    %36 = arith.addf %35, %19 : vector<8x256xf32>
    %37 = arith.truncf %36 : vector<8x256xf32> to vector<8x256xbf16>
    %c0_21 = arith.constant 0 : index
    %c1280 = arith.constant 1280 : index
    %38 = vector.load %arg2[%c0_21, %c1280] : memref<256x3328xbf16, #tpu.memory_space<vmem>>, vector<256x256xbf16>
    %cst_22 = arith.constant dense<0.000000e+00> : vector<8x256xf32>
    %39 = tpu.matmul %37, %38, %cst_22 {dimension_numbers = #tpu.dot_dimension_numbers<[1], [0], [0], [1], [0, 0, 1, 1], [], []>} : vector<8x256xbf16>, vector<256x256xbf16>, vector<8x256xf32> -> vector<8x256xf32>
    %c0_23 = arith.constant 0 : index
    %c1280_24 = arith.constant 1280 : index
    %40 = vector.load %arg3[%c0_23, %c1280_24] : memref<1x3328xf32, #tpu.memory_space<vmem>>, vector<1x256xf32>
    %41 = vector.broadcast %40 : vector<1x256xf32> to vector<8x256xf32>
    %42 = arith.addf %39, %41 : vector<8x256xf32>
    %cst_25 = arith.constant 0.000000e+00 : f32
    %43 = vector.broadcast %cst_25 : f32 to vector<8x256xf32>
    %44 = arith.maximumf %42, %43 : vector<8x256xf32>
    %45 = arith.truncf %44 : vector<8x256xf32> to vector<8x256xbf16>
    %c0_26 = arith.constant 0 : index
    %c1536 = arith.constant 1536 : index
    %46 = vector.load %arg2[%c0_26, %c1536] : memref<256x3328xbf16, #tpu.memory_space<vmem>>, vector<256x256xbf16>
    %cst_27 = arith.constant dense<0.000000e+00> : vector<8x256xf32>
    %47 = tpu.matmul %45, %46, %cst_27 {dimension_numbers = #tpu.dot_dimension_numbers<[1], [0], [0], [1], [0, 0, 1, 1], [], []>} : vector<8x256xbf16>, vector<256x256xbf16>, vector<8x256xf32> -> vector<8x256xf32>
    %c0_28 = arith.constant 0 : index
    %c1536_29 = arith.constant 1536 : index
    %48 = vector.load %arg3[%c0_28, %c1536_29] : memref<1x3328xf32, #tpu.memory_space<vmem>>, vector<1x256xf32>
    %49 = vector.broadcast %48 : vector<1x256xf32> to vector<8x256xf32>
    %50 = arith.addf %47, %49 : vector<8x256xf32>
    %cst_30 = arith.constant 0.000000e+00 : f32
    %51 = vector.broadcast %cst_30 : f32 to vector<8x256xf32>
    %52 = arith.maximumf %50, %51 : vector<8x256xf32>
    %53 = arith.addf %52, %36 : vector<8x256xf32>
    %54 = arith.truncf %53 : vector<8x256xf32> to vector<8x256xbf16>
    %c0_31 = arith.constant 0 : index
    %c1792 = arith.constant 1792 : index
    %55 = vector.load %arg2[%c0_31, %c1792] : memref<256x3328xbf16, #tpu.memory_space<vmem>>, vector<256x256xbf16>
    %cst_32 = arith.constant dense<0.000000e+00> : vector<8x256xf32>
    %56 = tpu.matmul %54, %55, %cst_32 {dimension_numbers = #tpu.dot_dimension_numbers<[1], [0], [0], [1], [0, 0, 1, 1], [], []>} : vector<8x256xbf16>, vector<256x256xbf16>, vector<8x256xf32> -> vector<8x256xf32>
    %c0_33 = arith.constant 0 : index
    %c1792_34 = arith.constant 1792 : index
    %57 = vector.load %arg3[%c0_33, %c1792_34] : memref<1x3328xf32, #tpu.memory_space<vmem>>, vector<1x256xf32>
    %58 = vector.broadcast %57 : vector<1x256xf32> to vector<8x256xf32>
    %59 = arith.addf %56, %58 : vector<8x256xf32>
    %cst_35 = arith.constant 0.000000e+00 : f32
    %60 = vector.broadcast %cst_35 : f32 to vector<8x256xf32>
    %61 = arith.maximumf %59, %60 : vector<8x256xf32>
    %62 = arith.truncf %61 : vector<8x256xf32> to vector<8x256xbf16>
    %c0_36 = arith.constant 0 : index
    %c2048 = arith.constant 2048 : index
    %63 = vector.load %arg2[%c0_36, %c2048] : memref<256x3328xbf16, #tpu.memory_space<vmem>>, vector<256x256xbf16>
    %cst_37 = arith.constant dense<0.000000e+00> : vector<8x256xf32>
    %64 = tpu.matmul %62, %63, %cst_37 {dimension_numbers = #tpu.dot_dimension_numbers<[1], [0], [0], [1], [0, 0, 1, 1], [], []>} : vector<8x256xbf16>, vector<256x256xbf16>, vector<8x256xf32> -> vector<8x256xf32>
    %c0_38 = arith.constant 0 : index
    %c2048_39 = arith.constant 2048 : index
    %65 = vector.load %arg3[%c0_38, %c2048_39] : memref<1x3328xf32, #tpu.memory_space<vmem>>, vector<1x256xf32>
    %66 = vector.broadcast %65 : vector<1x256xf32> to vector<8x256xf32>
    %67 = arith.addf %64, %66 : vector<8x256xf32>
    %cst_40 = arith.constant 0.000000e+00 : f32
    %68 = vector.broadcast %cst_40 : f32 to vector<8x256xf32>
    %69 = arith.maximumf %67, %68 : vector<8x256xf32>
    %70 = arith.addf %69, %53 : vector<8x256xf32>
    %71 = arith.truncf %70 : vector<8x256xf32> to vector<8x256xbf16>
    %c0_41 = arith.constant 0 : index
    %c2304 = arith.constant 2304 : index
    %72 = vector.load %arg2[%c0_41, %c2304] : memref<256x3328xbf16, #tpu.memory_space<vmem>>, vector<256x512xbf16>
    %cst_42 = arith.constant dense<0.000000e+00> : vector<8x512xf32>
    %73 = tpu.matmul %71, %72, %cst_42 {dimension_numbers = #tpu.dot_dimension_numbers<[1], [0], [0], [1], [0, 0, 1, 1], [], []>} : vector<8x256xbf16>, vector<256x512xbf16>, vector<8x512xf32> -> vector<8x512xf32>
    %c0_43 = arith.constant 0 : index
    %c2304_44 = arith.constant 2304 : index
    %74 = vector.load %arg3[%c0_43, %c2304_44] : memref<1x3328xf32, #tpu.memory_space<vmem>>, vector<1x512xf32>
    %75 = vector.broadcast %74 : vector<1x512xf32> to vector<8x512xf32>
    %76 = arith.addf %73, %75 : vector<8x512xf32>
    %77 = vector.extract_strided_slice %76 {offsets = [0, 0], sizes = [8, 256], strides = [1, 1]} : vector<8x512xf32> to vector<8x256xf32>
    %78 = vector.extract_strided_slice %76 {offsets = [0, 256], sizes = [8, 256], strides = [1, 1]} : vector<8x512xf32> to vector<8x256xf32>
    %cst_45 = arith.constant 0.000000e+00 : f32
    %79 = vector.broadcast %cst_45 : f32 to vector<8x256xf32>
    %80 = arith.maximumf %77, %79 : vector<8x256xf32>
    %81 = arith.truncf %80 : vector<8x256xf32> to vector<8x256xbf16>
    %c0_46 = arith.constant 0 : index
    %c2816 = arith.constant 2816 : index
    %82 = vector.load %arg2[%c0_46, %c2816] : memref<256x3328xbf16, #tpu.memory_space<vmem>>, vector<256x256xbf16>
    %cst_47 = arith.constant dense<0.000000e+00> : vector<8x256xf32>
    %83 = tpu.matmul %81, %82, %cst_47 {dimension_numbers = #tpu.dot_dimension_numbers<[1], [0], [0], [1], [0, 0, 1, 1], [], []>} : vector<8x256xbf16>, vector<256x256xbf16>, vector<8x256xf32> -> vector<8x256xf32>
    %c0_48 = arith.constant 0 : index
    %c2816_49 = arith.constant 2816 : index
    %84 = vector.load %arg3[%c0_48, %c2816_49] : memref<1x3328xf32, #tpu.memory_space<vmem>>, vector<1x256xf32>
    %85 = vector.broadcast %84 : vector<1x256xf32> to vector<8x256xf32>
    %86 = arith.addf %83, %85 : vector<8x256xf32>
    %87 = arith.addf %86, %78 : vector<8x256xf32>
    %88 = arith.truncf %87 : vector<8x256xf32> to vector<8x256xbf16>
    %c0_50 = arith.constant 0 : index
    %c3072 = arith.constant 3072 : index
    %89 = vector.load %arg2[%c0_50, %c3072] : memref<256x3328xbf16, #tpu.memory_space<vmem>>, vector<256x256xbf16>
    %cst_51 = arith.constant dense<0.000000e+00> : vector<8x256xf32>
    %90 = tpu.matmul %88, %89, %cst_51 {dimension_numbers = #tpu.dot_dimension_numbers<[1], [0], [0], [1], [0, 0, 1, 1], [], []>} : vector<8x256xbf16>, vector<256x256xbf16>, vector<8x256xf32> -> vector<8x256xf32>
    %c0_52 = arith.constant 0 : index
    %c3072_53 = arith.constant 3072 : index
    %91 = vector.load %arg3[%c0_52, %c3072_53] : memref<1x3328xf32, #tpu.memory_space<vmem>>, vector<1x256xf32>
    %92 = vector.broadcast %91 : vector<1x256xf32> to vector<8x256xf32>
    %93 = arith.addf %90, %92 : vector<8x256xf32>
    %c0_54 = arith.constant 0 : index
    %c0_55 = arith.constant 0 : index
    %94 = vector.load %arg4[%c0_54, %c0_55] : memref<8x256xf32, #tpu.memory_space<vmem>>, vector<8x256xf32>
    tpu.vector_store %arg4[%c0_54, %c0_55], %93 {strides = array<i32>} : memref<8x256xf32, #tpu.memory_space<vmem>>, vector<8x256xf32>,
    return
  }
  func.func @transform_0(%arg0: i32) -> (i32, i32) {
    %c0_i32 = arith.constant 0 : i32
    %c0_i32_0 = arith.constant 0 : i32
    return %arg0, %c0_i32 : i32, i32
  }
  func.func @transform_1(%arg0: i32) -> (i32, i32) {
    %c0_i32 = arith.constant 0 : i32
    %c0_i32_0 = arith.constant 0 : i32
    %c0_i32_1 = arith.constant 0 : i32
    return %c0_i32, %c0_i32_0 : i32, i32
  }
  func.func @transform_2(%arg0: i32) -> (i32, i32) {
    %c0_i32 = arith.constant 0 : i32
    %c0_i32_0 = arith.constant 0 : i32
    %c0_i32_1 = arith.constant 0 : i32
    return %c0_i32, %c0_i32_0 : i32, i32
  }
  func.func @transform_3(%arg0: i32) -> (i32, i32) {
    %c0_i32 = arith.constant 0 : i32
    %c0_i32_0 = arith.constant 0 : i32
    return %arg0, %c0_i32 : i32, i32
  }
}

</mosaic_0001>

<bundles_post_ra>
// kernel: _tcn_forward_impl.1
= control target key start
LH: loop header
LB: loop body
LE: loop exit
PB: predicated region body
PF: predicated region fallthrough
CT: control target
= control target key end

     0   :  { %8 = vsyncpa [#allocation3], 0  ;;  %s5678_s0 = inlined_call_operand.hbm [shape: f32[8,256], index: 0, kind: input, shape index: {}]   ;;  %s5679_s1 = inlined_call_operand.hbm [shape: bf16[256,3328], index: 1, kind: input, shape index: {}]   ;;  %s5680_s2 = inlined_call_operand.hbm [shape: f32[1,3328], index: 2, kind: input, shape index: {}]   ;;  %s5681_s3 = inlined_call_operand.hbm [shape: f32[8,256], index: 3, kind: output, shape index: {}]  }
   0x1   :  { %9 = vsyncpa [#allocation6], 0  ;;  %s26_s14 = sshll.u32 %s5679_s1, 4  ;;  %s27_s14 = int_to_ptr.hbm [resolvable:$true] %s26_s14 }
   0x2   :  { %10 = vsyncpa [#allocation4], 0  ;;  %s5564_s15 = smov [#allocation5]   ;;  %s16_s19 = sshll.u32 %s5678_s0, 4  ;;  %s17_s19 = int_to_ptr.hbm [resolvable:$true] %s16_s19 }
   0x3   :  { %s28_s16 = sshll.u32 %s5564_s15, 4  ;;  %s5565_s20 = smov 1664   ;;  %s29_s16 = int_to_ptr.vmem [resolvable:$true] %s28_s16 }
   0x4   :  { %s5566_s21 = smov 104   ;;  %s5567_s22 = smov [#allocation2]  }
   0x5   :  { %34 = dma.hbm_to_vmem [thread:$0]  %s27_s14, 53248, %s29_s16, [#allocation6], %s5565_s20, %s5565_s20, %s5566_s21  }
   0x6   :  { %s18_s23 = sshll.u32 %s5567_s22, 4  ;;  %s40_s26 = sshll.u32 %s5680_s2, 4  ;;  %s19_s23 = int_to_ptr.vmem [resolvable:$true] %s18_s23  ;;  %s41_s26 = int_to_ptr.hbm [resolvable:$true] %s40_s26 }
   0x7   :  { %21 = dma.hbm_to_vmem [thread:$0]  %s17_s19, 256, %s19_s23, [#allocation3]  }
   0x8   :  { %s5568_s1 = smov [#allocation7]  }
   0x9   :  { %s42_s27 = sshll.u32 %s5568_s1, 4  ;;  %s43_s27 = int_to_ptr.vmem [resolvable:$true] %s42_s27 }
   0xa   :  { %45 = dma.hbm_to_vmem [thread:$0]  %s41_s26, 416, %s43_s27, [#allocation6]  }
   0xb   :  { %5558 = dma.done.wait [#allocation3], 256  }
   0xc   :  { %5559 = vsyncadd [#allocation3], 4294967040 }
   0xd   :  { %5560 = dma.done.wait [#allocation6], 53664  }
   0xe   :  { %5561 = vsyncadd [#allocation6], 4294913632  ;;  %v3490_v0 = vld [vmem:[#allocation5 + $0x5b0] sm:$0xf]  ;;  %v5070_v1 = vld [vmem:[#allocation5 + $0x614] sm:$0xf0] }
   0xf   :  { %v3618_v2 = vld [vmem:[#allocation5 + $0xc30] sm:$0xf]  ;;  %v3491_v3 = vor.u32 %v5070_v1, %v3490_v0  ;;  %v5102_v4 = vld [vmem:[#allocation5 + $0xc94] sm:$0xf0]  ;;  %v5068_v5 = vld [vmem:[#allocation5 + $0x5b4] sm:$0xf] }
  0x10   :  { %v3492_v6 = vld [vmem:[#allocation5 + $0x618] sm:$0xf0]  ;;  %v3619_v7 = vor.u32 %v5102_v4, %v3618_v2  ;;  %v5100_v9 = vld [vmem:[#allocation5 + $0xc34] sm:$0xf]  ;;  %v3474_v11 = vld [vmem:[#allocation5 + $0x4e0] sm:$0xf] }
  0x11   :  { %v3495_v8 = vor.u32 %v5068_v5, %v3492_v6  ;;  %v3620_v10 = vld [vmem:[#allocation5 + $0xc98] sm:$0xf0]  ;;  %456 = vmatpush.bf16.msra.mxu0 %v3491_v3  ;;  %v5066_v13 = vld [vmem:[#allocation5 + $0x544] sm:$0xf0]  ;;  %v3602_v14 = vld [vmem:[#allocation5 + $0xb60] sm:$0xf] }
  0x12   :  { %v3623_v12 = vor.u32 %v5100_v9, %v3620_v10  ;;  %v5098_v15 = vld [vmem:[#allocation5 + $0xbc4] sm:$0xf0]  ;;  %469 = vmatpush.bf16.msra.mxu1 %v3619_v7  ;;  %v3475_v16 = vor.u32 %v5066_v13, %v3474_v11  ;;  %v5064_v18 = vld [vmem:[#allocation5 + $0x4e4] sm:$0xf]  ;;  %v3476_v19 = vld [vmem:[#allocation5 + $0x548] sm:$0xf0] }
  0x13   :  { %482 = vmatpush.bf16.msra.mxu2 %v3495_v8  ;;  %v3603_v17 = vor.u32 %v5098_v15, %v3602_v14  ;;  %v5096_v20 = vld [vmem:[#allocation5 + $0xb64] sm:$0xf]  ;;  %v3479_v21 = vor.u32 %v5064_v18, %v3476_v19  ;;  %v3604_v22 = vld [vmem:[#allocation5 + $0xbc8] sm:$0xf0]  ;;  %v3458_v23 = vld [vmem:[#allocation5 + $0x410] sm:$0xf] }
  0x14   :  { %495 = vmatpush.bf16.msra.mxu3 %v3623_v12  ;;  %v5062_v24 = vld [vmem:[#allocation5 + $0x474] sm:$0xf0]  ;;  %v3607_v25 = vor.u32 %v5096_v20, %v3604_v22  ;;  %v3586_v26 = vld [vmem:[#allocation5 + $0xa90] sm:$0xf]  ;;  %v5060_v28 = vld [vmem:[#allocation5 + $0x414] sm:$0xf] }
  0x15   :  { %v5094_v27 = vld [vmem:[#allocation5 + $0xaf4] sm:$0xf0]  ;;  %457 = vmatpush.bf16.msra.mxu0 %v3475_v16  ;;  %v3459_v29 = vor.u32 %v5062_v24, %v3458_v23  ;;  %v3460_v30 = vld [vmem:[#allocation5 + $0x478] sm:$0xf0]  ;;  %v5092_v31 = vld [vmem:[#allocation5 + $0xa94] sm:$0xf] }
  0x16   :  { %v3588_v32 = vld [vmem:[#allocation5 + $0xaf8] sm:$0xf0]  ;;  %470 = vmatpush.bf16.msra.mxu1 %v3603_v17  ;;  %v3587_v33 = vor.u32 %v5094_v27, %v3586_v26  ;;  %v3463_v34 = vor.u32 %v5060_v28, %v3460_v30  ;;  %v3442_v35 = vld [vmem:[#allocation5 + $0x340] sm:$0xf]  ;;  %v5058_v36 = vld [vmem:[#allocation5 + $0x3a4] sm:$0xf0] }
  0x17   :  { %483 = vmatpush.bf16.msra.mxu2 %v3479_v21  ;;  %v3570_v37 = vld [vmem:[#allocation5 + $0x9c0] sm:$0xf]  ;;  %v3591_v38 = vor.u32 %v5092_v31, %v3588_v32  ;;  %v5090_v39 = vld [vmem:[#allocation5 + $0xa24] sm:$0xf0]  ;;  %v5056_v40 = vld [vmem:[#allocation5 + $0x344] sm:$0xf]  ;;  %v3443_v44 = vor.u32 %v5058_v36, %v3442_v35 }
  0x18   :  { %496 = vmatpush.bf16.msra.mxu3 %v3607_v25  ;;  %v3444_v41 = vld [vmem:[#allocation5 + $0x3a8] sm:$0xf0]  ;;  %v5088_v42 = vld [vmem:[#allocation5 + $0x9c4] sm:$0xf]  ;;  %v3571_v45 = vor.u32 %v5090_v39, %v3570_v37  ;;  %v3426_v47 = vld [vmem:[#allocation5 + $0x270] sm:$0xf] }
  0x19   :  { %v3572_v43 = vld [vmem:[#allocation5 + $0xa28] sm:$0xf0]  ;;  %458 = vmatpush.bf16.msra.mxu0 %v3459_v29  ;;  %v3447_v46 = vor.u32 %v5056_v40, %v3444_v41  ;;  %v5054_v48 = vld [vmem:[#allocation5 + $0x2d4] sm:$0xf0]  ;;  %v3554_v49 = vld [vmem:[#allocation5 + $0x8f0] sm:$0xf] }
  0x1a   :  { %471 = vmatpush.bf16.msra.mxu1 %v3587_v33  ;;  %v3575_v50 = vor.u32 %v5088_v42, %v3572_v43  ;;  %v5086_v51 = vld [vmem:[#allocation5 + $0x954] sm:$0xf0]  ;;  %v5052_v52 = vld [vmem:[#allocation5 + $0x274] sm:$0xf]  ;;  %v3428_v53 = vld [vmem:[#allocation5 + $0x2d8] sm:$0xf0]  ;;  %v3427_v56 = vor.u32 %v5054_v48, %v3426_v47 }
  0x1b   :  { %484 = vmatpush.bf16.msra.mxu2 %v3463_v34  ;;  %v5084_v54 = vld [vmem:[#allocation5 + $0x8f4] sm:$0xf]  ;;  %v3556_v55 = vld [vmem:[#allocation5 + $0x958] sm:$0xf0]  ;;  %v3555_v57 = vor.u32 %v5086_v51, %v3554_v49  ;;  %v3431_v58 = vor.u32 %v5052_v52, %v3428_v53  ;;  %v3410_v59 = vld [vmem:[#allocation5 + $0x1a0] sm:$0xf] }
  0x1c   :  { %497 = vmatpush.bf16.msra.mxu3 %v3591_v38  ;;  %v5050_v60 = vld [vmem:[#allocation5 + $0x204] sm:$0xf0]  ;;  %v3538_v61 = vld [vmem:[#allocation5 + $0x820] sm:$0xf]  ;;  %v3559_v62 = vor.u32 %v5084_v54, %v3556_v55  ;;  %v5048_v0 = vld [vmem:[#allocation5 + $0x1a4] sm:$0xf] }
  0x1d   :  { %459 = vmatpush.bf16.msra.mxu0 %v3443_v44  ;;  %v5082_v63 = vld [vmem:[#allocation5 + $0x884] sm:$0xf0]  ;;  %v3412_v1 = vld [vmem:[#allocation5 + $0x208] sm:$0xf0]  ;;  %v5080_v2 = vld [vmem:[#allocation5 + $0x824] sm:$0xf]  ;;  %v3411_v4 = vor.u32 %v5050_v60, %v3410_v59 }
  0x1e   :  { %472 = vmatpush.bf16.msra.mxu1 %v3571_v45  ;;  %v3540_v3 = vld [vmem:[#allocation5 + $0x888] sm:$0xf0]  ;;  %v3539_v5 = vor.u32 %v5082_v63, %v3538_v61  ;;  %v3415_v6 = vor.u32 %v5048_v0, %v3412_v1  ;;  %v3394_v7 = vld [vmem:[#allocation5 + $0xd0] sm:$0xf]  ;;  %v5046_v8 = vld [vmem:[#allocation5 + $0x134] sm:$0xf0] }
  0x1f   :  { %485 = vmatpush.bf16.msra.mxu2 %v3447_v46  ;;  %v3522_v9 = vld [vmem:[#allocation5 + $0x750] sm:$0xf]  ;;  %v3543_v10 = vor.u32 %v5080_v2, %v3540_v3  ;;  %v5078_v11 = vld [vmem:[#allocation5 + $0x7b4] sm:$0xf0]  ;;  %v5044_v12 = vld [vmem:[#allocation5 + $0xd4] sm:$0xf]  ;;  %v3395_v16 = vor.u32 %v5046_v8, %v3394_v7 }
  0x20   :  { %498 = vmatpush.bf16.msra.mxu3 %v3575_v50  ;;  %v3396_v13 = vld [vmem:[#allocation5 + $0x138] sm:$0xf0]  ;;  %v5076_v14 = vld [vmem:[#allocation5 + $0x754] sm:$0xf]  ;;  %v3378_v17 = vld [vmem:[#allocation5] sm:$0xf]  ;;  %v3523_v18 = vor.u32 %v5078_v11, %v3522_v9 }
  0x21   :  { %460 = vmatpush.bf16.msra.mxu0 %v3427_v56  ;;  %v3524_v15 = vld [vmem:[#allocation5 + $0x7b8] sm:$0xf0]  ;;  %v3399_v19 = vor.u32 %v5044_v12, %v3396_v13  ;;  %v5042_v20 = vld [vmem:[#allocation5 + $0x64] sm:$0xf0]  ;;  %v3506_v21 = vld [vmem:[#allocation5 + $0x680] sm:$0xf] }
  0x22   :  { %473 = vmatpush.bf16.msra.mxu1 %v3555_v57  ;;  %v5074_v22 = vld [vmem:[#allocation5 + $0x6e4] sm:$0xf0]  ;;  %v3527_v23 = vor.u32 %v5076_v14, %v3524_v15  ;;  %v5040_v24 = vld [vmem:[#allocation5 + $0x4] sm:$0xf]  ;;  %v3380_v25 = vld [vmem:[#allocation5 + $0x68] sm:$0xf0]  ;;  %v3379_v30 = vor.u32 %v5042_v20, %v3378_v17 }
  0x23   :  { %486 = vmatpush.bf16.msra.mxu2 %v3431_v58  ;;  %v5072_v26 = vld [vmem:[#allocation5 + $0x684] sm:$0xf]  ;;  %v3508_v27 = vld [vmem:[#allocation5 + $0x6e8] sm:$0xf0]  ;;  %v3498_v28 = vld [vmem:[#allocation5 + $0x5b8] sm:$0xf]  ;;  %v3507_v34 = vor.u32 %v5074_v22, %v3506_v21  ;;  %v3383_v35 = vor.u32 %v5040_v24, %v3380_v25 }
  0x24   :  { %499 = vmatpush.bf16.msra.mxu3 %v3559_v62  ;;  %v5071_v29 = vld [vmem:[#allocation5 + $0x61c] sm:$0xf0]  ;;  %v58_v31 = vld [vmem:[#allocation2] sm:$0xff]  ;;  %v5069_v32 = vld [vmem:[#allocation5 + $0x5bc] sm:$0xf]  ;;  %v3511_v37 = vor.u32 %v5072_v26, %v3508_v27  ;;  %s5569_s0 = smov [#allocation8]  }
  0x25   :  { %461 = vmatpush.bf16.msra.mxu0 %v3411_v4  ;;  %v3500_v33 = vld [vmem:[#allocation5 + $0x620] sm:$0xf0]  ;;  %v59_v36 = vld [vmem:[#allocation2 + $0x8] sm:$0xff]  ;;  %v3499_v38 = vor.u32 %v5071_v29, %v3498_v28  ;;  %v3482_v39 = vld [vmem:[#allocation5 + $0x4e8] sm:$0xf]  ;;  %v5599_v42 = vpack.c.bf16 %v58_v31, %v58_v31  ;;  %s3363_s2 = sshll.u32 %s5569_s0, 4  ;;  %s3364_s2 = int_to_ptr.vmem [resolvable:$true] %s3363_s2 }
  0x26   :  { %474 = vmatpush.bf16.msra.mxu1 %v3539_v5  ;;  %v3626_v40 = vld [vmem:[#allocation5 + $0xc38] sm:$0xf]  ;;  %v5103_v41 = vld [vmem:[#allocation5 + $0xc9c] sm:$0xf0]  ;;  %v3503_v43 = vor.u32 %v5069_v32, %v3500_v33  ;;  %v5067_v44 = vld [vmem:[#allocation5 + $0x54c] sm:$0xf0]  ;;  %v5601_v47 = vpack.c.bf16 %v59_v36, %v59_v36 }
  0x27   :  { %487 = vmatpush.bf16.msra.mxu2 %v3415_v6  ;;  %v5101_v45 = vld [vmem:[#allocation5 + $0xc3c] sm:$0xf]  ;;  %v3628_v46 = vld [vmem:[#allocation5 + $0xca0] sm:$0xf0]  ;;  %v5065_v48 = vld [vmem:[#allocation5 + $0x4ec] sm:$0xf]  ;;  %v3627_v50 = vor.u32 %v5103_v41, %v3626_v40  ;;  %v3483_v51 = vor.u32 %v5067_v44, %v3482_v39 }
  0x28   :  { %500 = vmatpush.bf16.msra.mxu3 %v3543_v10  ;;  %v3484_v49 = vld [vmem:[#allocation5 + $0x550] sm:$0xf0]  ;;  %v3631_v52 = vor.u32 %v5101_v45, %v3628_v46  ;;  %v3466_v53 = vld [vmem:[#allocation5 + $0x418] sm:$0xf]  ;;  %v3610_v54 = vld [vmem:[#allocation5 + $0xb68] sm:$0xf] }
  0x29   :  { %462 = vmatpush.bf16.msra.mxu0 %v3395_v16  ;;  %v5099_v55 = vld [vmem:[#allocation5 + $0xbcc] sm:$0xf0]  ;;  %v3487_v56 = vor.u32 %v5065_v48, %v3484_v49  ;;  %v5063_v57 = vld [vmem:[#allocation5 + $0x47c] sm:$0xf0]  ;;  %v5097_v58 = vld [vmem:[#allocation5 + $0xb6c] sm:$0xf] }
  0x2a   :  { %475 = vmatpush.bf16.msra.mxu1 %v3523_v18  ;;  %v3612_v59 = vld [vmem:[#allocation5 + $0xbd0] sm:$0xf0]  ;;  %v5061_v60 = vld [vmem:[#allocation5 + $0x41c] sm:$0xf]  ;;  %v3468_v61 = vld [vmem:[#allocation5 + $0x480] sm:$0xf0]  ;;  %v3611_v62 = vor.u32 %v5099_v55, %v3610_v54  ;;  %v3467_v63 = vor.u32 %v5063_v57, %v3466_v53 }
  0x2b   :  { %488 = vmatpush.bf16.msra.mxu2 %v3399_v19  ;;  %v3615_v0 = vor.u32 %v5097_v58, %v3612_v59  ;;  %v3450_v1 = vld [vmem:[#allocation5 + $0x348] sm:$0xf]  ;;  %v3594_v2 = vld [vmem:[#allocation5 + $0xa98] sm:$0xf]  ;;  %v5095_v3 = vld [vmem:[#allocation5 + $0xafc] sm:$0xf0]  ;;  %v3471_v4 = vor.u32 %v5061_v60, %v3468_v61 }
  0x2c   :  { %501 = vmatpush.bf16.msra.mxu3 %v3527_v23  ;;  %v5059_v5 = vld [vmem:[#allocation5 + $0x3ac] sm:$0xf0]  ;;  %v5093_v6 = vld [vmem:[#allocation5 + $0xa9c] sm:$0xf]  ;;  %v3596_v7 = vld [vmem:[#allocation5 + $0xb00] sm:$0xf0]  ;;  %v3595_v10 = vor.u32 %v5095_v3, %v3594_v2 }
  0x2d   :  { %463 = vmatpush.bf16.msra.mxu0 %v3379_v30  ;;  %v5057_v8 = vld [vmem:[#allocation5 + $0x34c] sm:$0xf]  ;;  %v3452_v9 = vld [vmem:[#allocation5 + $0x3b0] sm:$0xf0]  ;;  %v3451_v11 = vor.u32 %v5059_v5, %v3450_v1  ;;  %v3599_v12 = vor.u32 %v5093_v6, %v3596_v7  ;;  %v3434_v13 = vld [vmem:[#allocation5 + $0x278] sm:$0xf] }
  0x2e   :  { %476 = vmatpush.bf16.msra.mxu1 %v3507_v34  ;;  %v3578_v14 = vld [vmem:[#allocation5 + $0x9c8] sm:$0xf]  ;;  %v5091_v15 = vld [vmem:[#allocation5 + $0xa2c] sm:$0xf0]  ;;  %v3455_v16 = vor.u32 %v5057_v8, %v3452_v9  ;;  %v5055_v17 = vld [vmem:[#allocation5 + $0x2dc] sm:$0xf0] }
  0x2f   :  { %489 = vmatpush.bf16.msra.mxu2 %v3383_v35  ;;  %v5089_v18 = vld [vmem:[#allocation5 + $0x9cc] sm:$0xf]  ;;  %v3580_v19 = vld [vmem:[#allocation5 + $0xa30] sm:$0xf0]  ;;  %v5053_v20 = vld [vmem:[#allocation5 + $0x27c] sm:$0xf]  ;;  %v3579_v22 = vor.u32 %v5091_v15, %v3578_v14  ;;  %v3435_v23 = vor.u32 %v5055_v17, %v3434_v13 }
  0x30   :  { %502 = vmatpush.bf16.msra.mxu3 %v3511_v37  ;;  %464 = vmatmul.bf16.vlgmr.msra.gmra.mxu0 %v5599_v42  ;;  %v3436_v21 = vld [vmem:[#allocation5 + $0x2e0] sm:$0xf0]  ;;  %v3583_v24 = vor.u32 %v5089_v18, %v3580_v19  ;;  %v3418_v25 = vld [vmem:[#allocation5 + $0x1a8] sm:$0xf]  ;;  %v3562_v26 = vld [vmem:[#allocation5 + $0x8f8] sm:$0xf] }
  0x31   :  { %508 = vmatpush.bf16.msrb.mxu0 %v3499_v38  ;;  %477 = vmatmul.bf16.vlgmr.msra.gmra.mxu1 %v5601_v47  ;;  %v5087_v27 = vld [vmem:[#allocation5 + $0x95c] sm:$0xf0]  ;;  %v3439_v28 = vor.u32 %v5053_v20, %v3436_v21  ;;  %v5051_v29 = vld [vmem:[#allocation5 + $0x20c] sm:$0xf0]  ;;  %v5085_v30 = vld [vmem:[#allocation5 + $0x8fc] sm:$0xf] }
  0x32   :  { %490 = vmatmul.bf16.vlgmr.msra.gmra.mxu2 %v5599_v42  ;;  %521 = vmatpush.bf16.msrb.mxu1 %v3627_v50  ;;  %v3564_v31 = vld [vmem:[#allocation5 + $0x960] sm:$0xf0]  ;;  %v5049_v32 = vld [vmem:[#allocation5 + $0x1ac] sm:$0xf]  ;;  %v3420_v33 = vld [vmem:[#allocation5 + $0x210] sm:$0xf0]  ;;  %v3563_v34 = vor.u32 %v5087_v27, %v3562_v26  ;;  %v3419_v35 = vor.u32 %v5051_v29, %v3418_v25 }
  0x33   :  { %534 = vmatpush.bf16.msrb.mxu2 %v3503_v43  ;;  %503 = vmatmul.bf16.vlgmr.msra.gmra.mxu3 %v5601_v47  ;;  %v3567_v36 = vor.u32 %v5085_v30, %v3564_v31  ;;  %v3402_v37 = vld [vmem:[#allocation5 + $0xd8] sm:$0xf]  ;;  %v3546_v38 = vld [vmem:[#allocation5 + $0x828] sm:$0xf]  ;;  %v5083_v39 = vld [vmem:[#allocation5 + $0x88c] sm:$0xf0]  ;;  %v3423_v40 = vor.u32 %v5049_v32, %v3420_v33 }
  0x34   :  { %547 = vmatpush.bf16.msrb.mxu3 %v3631_v52  ;;  %v5047_v41 = vld [vmem:[#allocation5 + $0x13c] sm:$0xf0]  ;;  %v5081_v43 = vld [vmem:[#allocation5 + $0x82c] sm:$0xf]  ;;  %v3548_v44 = vld [vmem:[#allocation5 + $0x890] sm:$0xf0]  ;;  %v3547_v48 = vor.u32 %v5083_v39, %v3546_v38 }
  0x35   :  { %509 = vmatpush.bf16.msrb.mxu0 %v3483_v51  ;;  %v5045_v45 = vld [vmem:[#allocation5 + $0xdc] sm:$0xf]  ;;  %v3404_v46 = vld [vmem:[#allocation5 + $0x140] sm:$0xf0]  ;;  %v3386_v49 = vld [vmem:[#allocation5 + $0x8] sm:$0xf]  ;;  %v3403_v50 = vor.u32 %v5047_v41, %v3402_v37  ;;  %v3551_v51 = vor.u32 %v5081_v43, %v3548_v44 }
  0x36   :  { %522 = vmatpush.bf16.msrb.mxu1 %v3611_v62  ;;  %v5043_v52 = vld [vmem:[#allocation5 + $0x6c] sm:$0xf0]  ;;  %v3530_v53 = vld [vmem:[#allocation5 + $0x758] sm:$0xf]  ;;  %v5079_v54 = vld [vmem:[#allocation5 + $0x7bc] sm:$0xf0]  ;;  %v3407_v55 = vor.u32 %v5045_v45, %v3404_v46 }
  0x37   :  { %535 = vmatpush.bf16.msrb.mxu2 %v3487_v56  ;;  %v5041_v56 = vld [vmem:[#allocation5 + $0xc] sm:$0xf]  ;;  %v5077_v57 = vld [vmem:[#allocation5 + $0x75c] sm:$0xf]  ;;  %v3532_v58 = vld [vmem:[#allocation5 + $0x7c0] sm:$0xf0]  ;;  %v3387_v1 = vor.u32 %v5043_v52, %v3386_v49 }
  0x38   :  { %548 = vmatpush.bf16.msrb.mxu3 %v3615_v0  ;;  %v3388_v59 = vld [vmem:[#allocation5 + $0x70] sm:$0xf0]  ;;  %v3690_v60 = vld [vmem:[#allocation5 + $0x5c0] sm:$0xf]  ;;  %v5119_v61 = vld [vmem:[#allocation5 + $0x624] sm:$0xf0]  ;;  %v3531_v0 = vor.u32 %v5079_v54, %v3530_v53  ;;  %v3535_v2 = vor.u32 %v5077_v57, %v3532_v58 }
  0x39   :  { %510 = vmatpush.bf16.msrb.mxu0 %v3467_v63  ;;  %v5118_v62 = vld [vmem:[#allocation5 + $0x5c4] sm:$0xf]  ;;  %v3692_v63 = vld [vmem:[#allocation5 + $0x628] sm:$0xf0]  ;;  %v3682_v3 = vld [vmem:[#allocation5 + $0x4f0] sm:$0xf]  ;;  %v3391_v7 = vor.u32 %v5041_v56, %v3388_v59  ;;  %v3691_v8 = vor.u32 %v5119_v61, %v3690_v60 }
  0x3a   :  { %523 = vmatpush.bf16.msrb.mxu1 %v3595_v10  ;;  %v5075_v5 = vld [vmem:[#allocation5 + $0x6ec] sm:$0xf0]  ;;  %v5073_v6 = vld [vmem:[#allocation5 + $0x68c] sm:$0xf]  ;;  %v3516_v9 = vld [vmem:[#allocation5 + $0x6f0] sm:$0xf0] }
  0x3b   :  { %536 = vmatpush.bf16.msrb.mxu2 %v3471_v4  ;;  %v3514_v4 = vld [vmem:[#allocation5 + $0x688] sm:$0xf]  ;;  %v3754_v10 = vld [vmem:[#allocation5 + $0xc40] sm:$0xf]  ;;  %v5117_v13 = vld [vmem:[#allocation5 + $0x554] sm:$0xf0]  ;;  %v3519_v19 = vor.u32 %v5073_v6, %v3516_v9 }
  0x3c   :  { %549 = vmatpush.bf16.msrb.mxu3 %v3599_v12  ;;  %v3695_v12 = vor.u32 %v5118_v62, %v3692_v63  ;;  %v5134_v14 = vld [vmem:[#allocation5 + $0xc44] sm:$0xf]  ;;  %v3756_v15 = vld [vmem:[#allocation5 + $0xca8] sm:$0xf0]  ;;  %v3684_v17 = vld [vmem:[#allocation5 + $0x558] sm:$0xf0]  ;;  %v3515_v18 = vor.u32 %v5075_v5, %v3514_v4  ;;  %v3683_v21 = vor.u32 %v5117_v13, %v3682_v3 }
  0x3d   :  { %511 = vmatpush.bf16.msrb.mxu0 %v3451_v11  ;;  %v5135_v11 = vld [vmem:[#allocation5 + $0xca4] sm:$0xf0]  ;;  %v5133_v25 = vld [vmem:[#allocation5 + $0xbd4] sm:$0xf0]  ;;  %v3748_v29 = vld [vmem:[#allocation5 + $0xbd8] sm:$0xf0] }
  0x3e   :  { %524 = vmatpush.bf16.msrb.mxu1 %v3579_v22  ;;  %v3755_v20 = vor.u32 %v5135_v11, %v3754_v10  ;;  %v3759_v22 = vor.u32 %v5134_v14, %v3756_v15  ;;  %v5115_v27 = vld [vmem:[#allocation5 + $0x484] sm:$0xf0]  ;;  %v5114_v30 = vld [vmem:[#allocation5 + $0x424] sm:$0xf]  ;;  %v3676_v31 = vld [vmem:[#allocation5 + $0x488] sm:$0xf0] }
  0x3f   :  { %537 = vmatpush.bf16.msrb.mxu2 %v3455_v16  ;;  %v5116_v16 = vld [vmem:[#allocation5 + $0x4f4] sm:$0xf]  ;;  %v5131_v37 = vld [vmem:[#allocation5 + $0xb04] sm:$0xf0]  ;;  %v3679_v38 = vor.u32 %v5114_v30, %v3676_v31  ;;  %v5113_v39 = vld [vmem:[#allocation5 + $0x3b4] sm:$0xf0] }
  0x40   :  { %550 = vmatpush.bf16.msrb.mxu3 %v3583_v24  ;;  %v3746_v24 = vld [vmem:[#allocation5 + $0xb70] sm:$0xf]  ;;  %v3687_v26 = vor.u32 %v5116_v16, %v3684_v17  ;;  %v3740_v41 = vld [vmem:[#allocation5 + $0xb08] sm:$0xf0]  ;;  %v5112_v43 = vld [vmem:[#allocation5 + $0x354] sm:$0xf] }
  0x41   :  { %512 = vmatpush.bf16.msrb.mxu0 %v3435_v23  ;;  %v3674_v23 = vld [vmem:[#allocation5 + $0x420] sm:$0xf]  ;;  %v3747_v32 = vor.u32 %v5133_v25, %v3746_v24  ;;  %v3668_v44 = vld [vmem:[#allocation5 + $0x3b8] sm:$0xf0]  ;;  %v5111_v53 = vld [vmem:[#allocation5 + $0x2e4] sm:$0xf0] }
  0x42   :  { %525 = vmatpush.bf16.msrb.mxu1 %v3563_v34  ;;  %v3675_v33 = vor.u32 %v5115_v27, %v3674_v23  ;;  %v3658_v49 = vld [vmem:[#allocation5 + $0x280] sm:$0xf]  ;;  %v3671_v52 = vor.u32 %v5112_v43, %v3668_v44  ;;  %v5128_v54 = vld [vmem:[#allocation5 + $0x9d4] sm:$0xf]  ;;  %v5110_v56 = vld [vmem:[#allocation5 + $0x284] sm:$0xf] }
  0x43   :  { %538 = vmatpush.bf16.msrb.mxu2 %v3439_v28  ;;  %v5132_v28 = vld [vmem:[#allocation5 + $0xb74] sm:$0xf]  ;;  %v3650_v60 = vld [vmem:[#allocation5 + $0x1b0] sm:$0xf]  ;;  %v5109_v61 = vld [vmem:[#allocation5 + $0x214] sm:$0xf0] }
  0x44   :  { %551 = vmatpush.bf16.msrb.mxu3 %v3567_v36  ;;  %v3751_v34 = vor.u32 %v5132_v28, %v3748_v29  ;;  %v3738_v36 = vld [vmem:[#allocation5 + $0xaa0] sm:$0xf]  ;;  %v5108_v62 = vld [vmem:[#allocation5 + $0x1b4] sm:$0xf]  ;;  %v3652_v63 = vld [vmem:[#allocation5 + $0x218] sm:$0xf0] }
  0x45   :  { %513 = vmatpush.bf16.msrb.mxu0 %v3419_v35  ;;  %v3666_v35 = vld [vmem:[#allocation5 + $0x350] sm:$0xf]  ;;  %v3739_v45 = vor.u32 %v5131_v37, %v3738_v36  ;;  %v5127_v3 = vld [vmem:[#allocation5 + $0x964] sm:$0xf0]  ;;  %v5126_v4 = vld [vmem:[#allocation5 + $0x904] sm:$0xf] }
  0x46   :  { %526 = vmatpush.bf16.msrb.mxu1 %v3547_v48  ;;  %v3667_v46 = vor.u32 %v5113_v39, %v3666_v35  ;;  %v3724_v6 = vld [vmem:[#allocation5 + $0x968] sm:$0xf0]  ;;  %v5107_v9 = vld [vmem:[#allocation5 + $0x144] sm:$0xf0]  ;;  %v5106_v10 = vld [vmem:[#allocation5 + $0xe4] sm:$0xf] }
  0x47   :  { %539 = vmatpush.bf16.msrb.mxu2 %v3423_v40  ;;  %v5130_v40 = vld [vmem:[#allocation5 + $0xaa4] sm:$0xf]  ;;  %v3714_v14 = vld [vmem:[#allocation5 + $0x830] sm:$0xf]  ;;  %v5125_v15 = vld [vmem:[#allocation5 + $0x894] sm:$0xf0] }
  0x48   :  { %552 = vmatpush.bf16.msrb.mxu3 %v3551_v51  ;;  %v3743_v48 = vor.u32 %v5130_v40, %v3740_v41  ;;  %v5129_v51 = vld [vmem:[#allocation5 + $0xa34] sm:$0xf0]  ;;  %v5124_v16 = vld [vmem:[#allocation5 + $0x834] sm:$0xf]  ;;  %v3715_v17 = vor.u32 %v5125_v15, %v3714_v14  ;;  %v3636_v24 = vld [vmem:[#allocation5 + $0x78] sm:$0xf0] }
  0x49   :  { %514 = vmatpush.bf16.msrb.mxu0 %v3403_v50  ;;  %v3730_v50 = vld [vmem:[#allocation5 + $0x9d0] sm:$0xf]  ;;  %v5123_v27 = vld [vmem:[#allocation5 + $0x7c4] sm:$0xf0]  ;;  %v5122_v29 = vld [vmem:[#allocation5 + $0x764] sm:$0xf] }
  0x4a   :  { %527 = vmatpush.bf16.msrb.mxu1 %v3531_v0  ;;  %v3731_v57 = vor.u32 %v5129_v51, %v3730_v50  ;;  %v3651_v0 = vor.u32 %v5109_v61, %v3650_v60  ;;  %v3708_v30 = vld [vmem:[#allocation5 + $0x7c8] sm:$0xf0]  ;;  %v3700_v36 = vld [vmem:[#allocation5 + $0x6f8] sm:$0xf0]  ;;  %v3818_v40 = vld [vmem:[#allocation5 + $0x5c8] sm:$0xf] }
  0x4b   :  { %540 = vmatpush.bf16.msrb.mxu2 %v3407_v55  ;;  %v3732_v55 = vld [vmem:[#allocation5 + $0xa38] sm:$0xf0]  ;;  %v3711_v31 = vor.u32 %v5122_v29, %v3708_v30  ;;  %v5151_v41 = vld [vmem:[#allocation5 + $0x62c] sm:$0xf0]  ;;  %v5150_v43 = vld [vmem:[#allocation5 + $0x5cc] sm:$0xf] }
  0x4c   :  { %553 = vmatpush.bf16.msrb.mxu3 %v3535_v2  ;;  %v3735_v58 = vor.u32 %v5128_v54, %v3732_v55  ;;  %v3722_v2 = vld [vmem:[#allocation5 + $0x900] sm:$0xf]  ;;  %v5148_v61 = vld [vmem:[#allocation5 + $0x4fc] sm:$0xf]  ;;  %v3804_v14 = vld [vmem:[#allocation5 + $0x490] sm:$0xf0] }
  0x4d   :  { %515 = vmatpush.bf16.msrb.mxu0 %v3387_v1  ;;  %v3655_v1 = vor.u32 %v5108_v62, %v3652_v63  ;;  %v3723_v5 = vor.u32 %v5127_v3, %v3722_v2  ;;  %v5149_v60 = vld [vmem:[#allocation5 + $0x55c] sm:$0xf0]  ;;  %v5167_v3 = vld [vmem:[#allocation5 + $0xcac] sm:$0xf0]  ;;  %s3365_s30 = sshll.u32 %s5681_s3, 4  ;;  %s3366_s30 = int_to_ptr.hbm [resolvable:$true] %s3365_s30 }
  0x4e   :  { %528 = vmatpush.bf16.msrb.mxu1 %v3515_v18  ;;  %v3716_v18 = vld [vmem:[#allocation5 + $0x898] sm:$0xf0]  ;;  %v5163_v30 = vld [vmem:[#allocation5 + $0xb0c] sm:$0xf0] }
  0x4f   :  { %541 = vmatpush.bf16.msrb.mxu2 %v3391_v7  ;;  %v3727_v7 = vor.u32 %v5126_v4, %v3724_v6  ;;  %v5166_v4 = vld [vmem:[#allocation5 + $0xc4c] sm:$0xf] }
  0x50   :  { %516 = vmatmul.bf16.vlgmr.msrb.gmra.mxu0 %v5599_v42  ;;  %554 = vmatpush.bf16.msrb.mxu3 %v3519_v19  ;;  %v3719_v19 = vor.u32 %v5124_v16, %v3716_v18  ;;  %v5165_v18 = vld [vmem:[#allocation5 + $0xbdc] sm:$0xf0] }
  0x51   :  { %762 = vmatpush.bf16.msra.mxu0 %v3691_v8  ;;  %529 = vmatmul.bf16.vlgmr.msrb.gmra.mxu1 %v5601_v47  ;;  %v3642_v8 = vld [vmem:[#allocation5 + $0xe0] sm:$0xf] }
  0x52   :  { %775 = vmatpush.bf16.msra.mxu1 %v3755_v20  ;;  %542 = vmatmul.bf16.vlgmr.msrb.gmra.mxu2 %v5599_v42  ;;  %v3660_v42 = vld [vmem:[#allocation5 + $0x2e8] sm:$0xf0]  ;;  %v3643_v11 = vor.u32 %v5107_v9, %v3642_v8  ;;  %v3634_v20 = vld [vmem:[#allocation5 + $0x10] sm:$0xf]  ;;  %v3802_v9 = vld [vmem:[#allocation5 + $0x428] sm:$0xf] }
  0x53   :  { %788 = vmatpush.bf16.msra.mxu2 %v3695_v12  ;;  %555 = vmatmul.bf16.vlgmr.msrb.gmra.mxu3 %v5601_v47  ;;  %v3659_v47 = vor.u32 %v5111_v53, %v3658_v49  ;;  %v3663_v59 = vor.u32 %v5110_v56, %v3660_v42  ;;  %v3644_v12 = vld [vmem:[#allocation5 + $0x148] sm:$0xf0] }
  0x54   :  { %801 = vmatpush.bf16.msra.mxu3 %v3759_v22  ;;  %v3647_v13 = vor.u32 %v5106_v10, %v3644_v12  ;;  %v5104_v22 = vld [vmem:[#allocation5 + $0x14] sm:$0xf]  ;;  %v5147_v10 = vld [vmem:[#allocation5 + $0x48c] sm:$0xf0] }
  0x55   :  { %763 = vmatpush.bf16.msra.mxu0 %v3683_v21  ;;  %v5105_v21 = vld [vmem:[#allocation5 + $0x74] sm:$0xf0]  ;;  %v3639_v25 = vor.u32 %v5104_v22, %v3636_v24 }
  0x56   :  { %776 = vmatpush.bf16.msra.mxu1 %v3747_v32  ;;  %v3635_v23 = vor.u32 %v5105_v21, %v3634_v20  ;;  %v3698_v32 = vld [vmem:[#allocation5 + $0x690] sm:$0xf]  ;;  %v3876_v21 = vld [vmem:[#allocation5 + $0xbe0] sm:$0xf0]  ;;  %v3794_v22 = vld [vmem:[#allocation5 + $0x358] sm:$0xf] }
  0x57   :  { %789 = vmatpush.bf16.msra.mxu2 %v3687_v26  ;;  %v3706_v26 = vld [vmem:[#allocation5 + $0x760] sm:$0xf] }
  0x58   :  { %802 = vmatpush.bf16.msra.mxu3 %v3751_v34  ;;  %v3707_v28 = vor.u32 %v5123_v27, %v3706_v26  ;;  %v5120_v34 = vld [vmem:[#allocation5 + $0x694] sm:$0xf]  ;;  %v5144_v26 = vld [vmem:[#allocation5 + $0x35c] sm:$0xf]  ;;  %v3796_v27 = vld [vmem:[#allocation5 + $0x3c0] sm:$0xf0] }
  0x59   :  { %764 = vmatpush.bf16.msra.mxu0 %v3675_v33  ;;  %v5121_v33 = vld [vmem:[#allocation5 + $0x6f4] sm:$0xf0]  ;;  %v3703_v37 = vor.u32 %v5120_v34, %v3700_v36  ;;  %v3799_v29 = vor.u32 %v5144_v26, %v3796_v27  ;;  %v3834_v27 = vld [vmem:[#allocation5 + $0x768] sm:$0xf] }
  0x5a   :  { %777 = vmatpush.bf16.msra.mxu1 %v3739_v45  ;;  %v3699_v35 = vor.u32 %v5121_v33, %v3698_v32  ;;  %v3819_v45 = vor.u32 %v5151_v41, %v3818_v40  ;;  %v3868_v32 = vld [vmem:[#allocation5 + $0xb10] sm:$0xf0] }
  0x5b   :  { %790 = vmatpush.bf16.msra.mxu2 %v3679_v38  ;;  %v5611_v38 = vld [vmem:[#allocation7] sm:$0xf] }
  0x5c   :  { %803 = vmatpush.bf16.msra.mxu3 %v3743_v48  ;;  %v128_v39 = vperm.slane %v5611_v38, 0  ;;  %v131_v41 = vperm.slane %v5611_v38, 3 }
  0x5d   :  { %765 = vmatpush.bf16.msra.mxu0 %v3667_v46  ;;  %v3820_v46 = vld [vmem:[#allocation5 + $0x630] sm:$0xf0] }
  0x5e   :  { %778 = vmatpush.bf16.msra.mxu1 %v3731_v57  ;;  %v3823_v50 = vor.u32 %v5150_v43, %v3820_v46 }
  0x5f   :  { %791 = vmatpush.bf16.msra.mxu2 %v3671_v52  ;;  %v129_v52 = vperm.slane %v5611_v38, 1 }
  0x60   :  { %804 = vmatpush.bf16.msra.mxu3 %v3735_v58 }
  0x61   :  { %766 = vmatpush.bf16.msra.mxu0 %v3659_v47 }
  0x62   :  { %779 = vmatpush.bf16.msra.mxu1 %v3723_v5  ;;  %v3884_v5 = vld [vmem:[#allocation5 + $0xcb0] sm:$0xf0] }
  0x63   :  { %792 = vmatpush.bf16.msra.mxu2 %v3663_v59  ;;  %v3810_v59 = vld [vmem:[#allocation5 + $0x4f8] sm:$0xf]  ;;  %v3887_v8 = vor.u32 %v5166_v4, %v3884_v5  ;;  %v5159_v4 = vld [vmem:[#allocation5 + $0x96c] sm:$0xf0]  ;;  %v5158_v5 = vld [vmem:[#allocation5 + $0x90c] sm:$0xf] }
  0x64   :  { %805 = vmatpush.bf16.msra.mxu3 %v3727_v7  ;;  %v3811_v63 = vor.u32 %v5149_v60, %v3810_v59  ;;  %v3860_v59 = vld [vmem:[#allocation5 + $0xa40] sm:$0xf0]  ;;  %v3778_v60 = vld [vmem:[#allocation5 + $0x1b8] sm:$0xf] }
  0x65   :  { %767 = vmatpush.bf16.msra.mxu0 %v3651_v0  ;;  %v3812_v0 = vld [vmem:[#allocation5 + $0x560] sm:$0xf0] }
  0x66   :  { %780 = vmatpush.bf16.msra.mxu1 %v3715_v17  ;;  %v3815_v2 = vor.u32 %v5148_v61, %v3812_v0  ;;  %v3874_v17 = vld [vmem:[#allocation5 + $0xb78] sm:$0xf]  ;;  %v5141_v61 = vld [vmem:[#allocation5 + $0x21c] sm:$0xf0]  ;;  %v5140_v0 = vld [vmem:[#allocation5 + $0x1bc] sm:$0xf] }
  0x67   :  { %793 = vmatpush.bf16.msra.mxu2 %v3655_v1  ;;  %v3882_v1 = vld [vmem:[#allocation5 + $0xc48] sm:$0xf]  ;;  %v3875_v20 = vor.u32 %v5165_v18, %v3874_v17  ;;  %v5156_v17 = vld [vmem:[#allocation5 + $0x83c] sm:$0xf] }
  0x68   :  { %806 = vmatpush.bf16.msra.mxu3 %v3719_v19  ;;  %v3883_v7 = vor.u32 %v5167_v3, %v3882_v1  ;;  %v5164_v19 = vld [vmem:[#allocation5 + $0xb7c] sm:$0xf]  ;;  %v3780_v1 = vld [vmem:[#allocation5 + $0x220] sm:$0xf0]  ;;  %v3850_v3 = vld [vmem:[#allocation5 + $0x908] sm:$0xf] }
  0x69   :  { %768 = vmatpush.bf16.msra.mxu0 %v3643_v11  ;;  %v5146_v11 = vld [vmem:[#allocation5 + $0x42c] sm:$0xf]  ;;  %v3879_v24 = vor.u32 %v5164_v19, %v3876_v21  ;;  %v3844_v19 = vld [vmem:[#allocation5 + $0x8a0] sm:$0xf0]  ;;  %v3762_v21 = vld [vmem:[#allocation5 + $0x18] sm:$0xf] }
  0x6a   :  { %781 = vmatpush.bf16.msra.mxu1 %v3707_v28  ;;  %v3807_v16 = vor.u32 %v5146_v11, %v3804_v14  ;;  %v3866_v28 = vld [vmem:[#allocation5 + $0xaa8] sm:$0xf]  ;;  %v5138_v11 = vld [vmem:[#allocation5 + $0xec] sm:$0xf] }
  0x6b   :  { %794 = vmatpush.bf16.msra.mxu2 %v3647_v13  ;;  %v3803_v13 = vor.u32 %v5147_v10, %v3802_v9  ;;  %v3867_v33 = vor.u32 %v5163_v30, %v3866_v28  ;;  %v3770_v9 = vld [vmem:[#allocation5 + $0xe8] sm:$0xf]  ;;  %v5139_v10 = vld [vmem:[#allocation5 + $0x14c] sm:$0xf0] }
  0x6c   :  { %807 = vmatpush.bf16.msra.mxu3 %v3711_v31  ;;  %v5162_v31 = vld [vmem:[#allocation5 + $0xaac] sm:$0xf]  ;;  %v5155_v28 = vld [vmem:[#allocation5 + $0x7cc] sm:$0xf0] }
  0x6d   :  { %769 = vmatpush.bf16.msra.mxu0 %v3635_v23  ;;  %v5145_v23 = vld [vmem:[#allocation5 + $0x3bc] sm:$0xf0]  ;;  %v3871_v34 = vor.u32 %v5162_v31, %v3868_v32  ;;  %v3835_v30 = vor.u32 %v5155_v28, %v3834_v27  ;;  %v3836_v31 = vld [vmem:[#allocation5 + $0x7d0] sm:$0xf0] }
  0x6e   :  { %782 = vmatpush.bf16.msra.mxu1 %v3699_v35  ;;  %v130_v35 = vperm.slane %v5611_v38, 2 }
  0x6f   :  { %795 = vmatpush.bf16.msra.mxu2 %v3639_v25  ;;  %v3795_v25 = vor.u32 %v5145_v23, %v3794_v22  ;;  %v5137_v22 = vld [vmem:[#allocation5 + $0x7c] sm:$0xf0] }
  0x70   :  { %808 = vmatpush.bf16.msra.mxu3 %v3703_v37  ;;  %v3763_v23 = vor.u32 %v5137_v22, %v3762_v21  ;;  %v3914_v22 = vld [vmem:[#allocation5 + $0x290] sm:$0xf] }
  0x71   :  { %1018 = vmatpush.bf16.msrb.mxu0 %v3819_v45 }
  0x72   :  { %1031 = vmatpush.bf16.msrb.mxu1 %v3883_v7  ;;  %v3852_v7 = vld [vmem:[#allocation5 + $0x970] sm:$0xf0] }
  0x73   :  { %1044 = vmatpush.bf16.msrb.mxu2 %v3823_v50 }
  0x74   :  { %1057 = vmatpush.bf16.msrb.mxu3 %v3887_v8  ;;  %v3855_v8 = vor.u32 %v5158_v5, %v3852_v7  ;;  %v3922_v7 = vld [vmem:[#allocation5 + $0x360] sm:$0xf] }
  0x75   :  { %1019 = vmatpush.bf16.msrb.mxu0 %v3811_v63  ;;  %v3779_v63 = vor.u32 %v5141_v61, %v3778_v60  ;;  %v5179_v60 = vld [vmem:[#allocation5 + $0x494] sm:$0xf0]  ;;  %v5178_v61 = vld [vmem:[#allocation5 + $0x434] sm:$0xf] }
  0x76   :  { %1032 = vmatpush.bf16.msrb.mxu1 %v3875_v20  ;;  %v3847_v20 = vor.u32 %v5156_v17, %v3844_v19 }
  0x77   :  { %1045 = vmatpush.bf16.msrb.mxu2 %v3815_v2  ;;  %v3783_v2 = vor.u32 %v5140_v0, %v3780_v1  ;;  %v5197_v0 = vld [vmem:[#allocation5 + $0xbe4] sm:$0xf0] }
  0x78   :  { %1058 = vmatpush.bf16.msrb.mxu3 %v3879_v24  ;;  %v5136_v24 = vld [vmem:[#allocation5 + $0x1c] sm:$0xf] }
  0x79   :  { %1020 = vmatpush.bf16.msrb.mxu0 %v3803_v13  ;;  %v3772_v13 = vld [vmem:[#allocation5 + $0x150] sm:$0xf0] }
  0x7a   :  { %1033 = vmatpush.bf16.msrb.mxu1 %v3867_v33  ;;  %v3775_v14 = vor.u32 %v5138_v11, %v3772_v13  ;;  %v3826_v33 = vld [vmem:[#allocation5 + $0x698] sm:$0xf]  ;;  %v5176_v13 = vld [vmem:[#allocation5 + $0x364] sm:$0xf] }
  0x7b   :  { %1046 = vmatpush.bf16.msrb.mxu2 %v3807_v16  ;;  %v5157_v16 = vld [vmem:[#allocation5 + $0x89c] sm:$0xf0]  ;;  %v5195_v11 = vld [vmem:[#allocation5 + $0xb14] sm:$0xf0] }
  0x7c   :  { %1059 = vmatpush.bf16.msrb.mxu3 %v3871_v34  ;;  %v5153_v34 = vld [vmem:[#allocation5 + $0x6fc] sm:$0xf0] }
  0x7d   :  { %1021 = vmatpush.bf16.msrb.mxu0 %v3795_v25  ;;  %v3764_v25 = vld [vmem:[#allocation5 + $0x80] sm:$0xf0] }
  0x7e   :  { %v3767_v26 = vor.u32 %v5136_v24, %v3764_v25  ;;  %v5174_v24 = vld [vmem:[#allocation5 + $0x294] sm:$0xf]  ;;  %v3916_v25 = vld [vmem:[#allocation5 + $0x2f8] sm:$0xf0] }
  0x7f   :  { %1047 = vmatpush.bf16.msrb.mxu2 %v3799_v29  ;;  %v5154_v29 = vld [vmem:[#allocation5 + $0x76c] sm:$0xf] }
  0x80   :  { %v3839_v32 = vor.u32 %v5154_v29, %v3836_v31 }
  0xad   :  { %v465_v44 = vpop.f32.mrf.mxu0 }
  0xae   :  { %v466_v48 = vadd.f32 %v465_v44, %v128_v39  ;;  %v478_v49 = vpop.f32.mrf.mxu1 }
  0xb0   :  { %v479_v51 = vadd.f32 %v478_v49, %v466_v48 }
  0xb2   :  { %v560_v53 = vmax.f32 %v479_v51, 0.0 }
  0xb4   :  { %v562_v54 = vpack.c.bf16 %v560_v53, %v560_v53  ;;  %v5143_v53 = vld [vmem:[#allocation5 + $0x2ec] sm:$0xf0] }
  0xb5   :  { %v491_v55 = vpop.f32.mrf.mxu2  ;;  %v467_v57 = vpop.f32.mrf.mxu0 }
  0xb6   :  { %v492_v56 = vadd.f32 %v491_v55, %v129_v52  ;;  %v504_v42 = vpop.f32.mrf.mxu3  ;;  %v480_v47 = vpop.f32.mrf.mxu1  ;;  %770 = vmatmul.bf16.vlgmr.msra.gmra.mxu0 %v562_v54  ;;  %796 = vmatmul.bf16.vlgmr.msra.gmra.mxu2 %v562_v54  ;;  %v3786_v52 = vld [vmem:[#allocation5 + $0x288] sm:$0xf]  ;;  %v5142_v54 = vld [vmem:[#allocation5 + $0x28c] sm:$0xf]  ;;  %v3858_v57 = vld [vmem:[#allocation5 + $0x9d8] sm:$0xf] }
  0xb7   :  { %v3787_v55 = vor.u32 %v5143_v53, %v3786_v52  ;;  %v5161_v47 = vld [vmem:[#allocation5 + $0xa3c] sm:$0xf0]  ;;  %v5180_v52 = vld [vmem:[#allocation5 + $0x504] sm:$0xf]  ;;  %v3940_v53 = vld [vmem:[#allocation5 + $0x568] sm:$0xf0] }
  0xb8   :  { %v505_v58 = vadd.f32 %v504_v42, %v492_v56  ;;  %v3788_v56 = vld [vmem:[#allocation5 + $0x2f0] sm:$0xf0]  ;;  %v3859_v38 = vor.u32 %v5161_v47, %v3858_v57  ;;  %v4012_v57 = vld [vmem:[#allocation5 + $0xcb8] sm:$0xf0]  ;;  %v3943_v47 = vor.u32 %v5180_v52, %v3940_v53  ;;  %v5192_v52 = vld [vmem:[#allocation5 + $0x9e4] sm:$0xf] }
  0xb9   :  { %v3791_v42 = vor.u32 %v5142_v54, %v3788_v56  ;;  %1022 = vmatpush.bf16.msrb.mxu0 %v3787_v55  ;;  %v4010_v54 = vld [vmem:[#allocation5 + $0xc50] sm:$0xf]  ;;  %v5199_v56 = vld [vmem:[#allocation5 + $0xcb4] sm:$0xf0] }
  0xba   :  { %v561_v62 = vmax.f32 %v505_v58, 0.0  ;;  %v5160_v58 = vld [vmem:[#allocation5 + $0x9dc] sm:$0xf]  ;;  %1034 = vmatpush.bf16.msrb.mxu1 %v3859_v38 }
  0xbb   :  { %1048 = vmatpush.bf16.msrb.mxu2 %v3791_v42  ;;  %v5198_v42 = vld [vmem:[#allocation5 + $0xc54] sm:$0xf] }
  0xbc   :  { %v563_v6 = vpack.c.bf16 %v561_v62, %v561_v62  ;;  %v3863_v62 = vor.u32 %v5160_v58, %v3860_v59  ;;  %v4011_v58 = vor.u32 %v5199_v56, %v4010_v54  ;;  %v4015_v38 = vor.u32 %v5198_v42, %v4012_v57  ;;  %v3930_v59 = vld [vmem:[#allocation5 + $0x430] sm:$0xf]  ;;  %v3988_v54 = vld [vmem:[#allocation5 + $0xa48] sm:$0xf0]  ;;  %v3906_v56 = vld [vmem:[#allocation5 + $0x1c0] sm:$0xf] }
  0xbd   :  { %v493_v12 = vpop.f32.mrf.mxu2  ;;  %1023 = vmatpush.bf16.msrb.mxu0 %v3779_v63  ;;  %v4002_v63 = vld [vmem:[#allocation5 + $0xb80] sm:$0xf]  ;;  %v3931_v5 = vor.u32 %v5179_v60, %v3930_v59  ;;  %v5173_v42 = vld [vmem:[#allocation5 + $0x224] sm:$0xf0]  ;;  %v5172_v57 = vld [vmem:[#allocation5 + $0x1c4] sm:$0xf] }
  0xbe   :  { %v506_v15 = vpop.f32.mrf.mxu3  ;;  %783 = vmatmul.bf16.vlgmr.msra.gmra.mxu1 %v563_v6  ;;  %809 = vmatmul.bf16.vlgmr.msra.gmra.mxu3 %v563_v6  ;;  %v3851_v6 = vor.u32 %v5159_v4, %v3850_v3  ;;  %v3771_v12 = vor.u32 %v5139_v10, %v3770_v9  ;;  %v4003_v1 = vor.u32 %v5197_v0, %v4002_v63  ;;  %v4004_v3 = vld [vmem:[#allocation5 + $0xbe8] sm:$0xf0]  ;;  %v596_v4 = vld [vmem:[#allocation7 + $0x4] sm:$0x3]  ;;  %v3994_v10 = vld [vmem:[#allocation5 + $0xab0] sm:$0xf] }
  0xbf   :  { %1060 = vmatpush.bf16.msrb.mxu3 %v3863_v62  ;;  %1049 = vmatpush.bf16.msrb.mxu2 %v3783_v2  ;;  %v3842_v15 = vld [vmem:[#allocation5 + $0x838] sm:$0xf]  ;;  %v3932_v62 = vld [vmem:[#allocation5 + $0x498] sm:$0xf0]  ;;  %v5196_v2 = vld [vmem:[#allocation5 + $0xb84] sm:$0xf] }
  0xc0   :  { %1035 = vmatpush.bf16.msrb.mxu1 %v3851_v6  ;;  %v3843_v18 = vor.u32 %v5157_v16, %v3842_v15  ;;  %v4007_v6 = vor.u32 %v5196_v2, %v4004_v3  ;;  %v3935_v9 = vor.u32 %v5178_v61, %v3932_v62  ;;  %v3996_v15 = vld [vmem:[#allocation5 + $0xb18] sm:$0xf0]  ;;  %v598_v16 = vperm.slane %v596_v4, 0  ;;  %v5190_v61 = vld [vmem:[#allocation5 + $0x914] sm:$0xf] }
  0xc1   :  { %1024 = vmatpush.bf16.msrb.mxu0 %v3771_v12  ;;  %v5194_v12 = vld [vmem:[#allocation5 + $0xab4] sm:$0xf]  ;;  %v599_v28 = vperm.slane %v596_v4, 1  ;;  %v3980_v62 = vld [vmem:[#allocation5 + $0x978] sm:$0xf0] }
  0xc2   :  { %v3999_v19 = vor.u32 %v5194_v12, %v3996_v15  ;;  %v3983_v63 = vor.u32 %v5190_v61, %v3980_v62  ;;  %v3898_v0 = vld [vmem:[#allocation5 + $0xf0] sm:$0xf]  ;;  %v5170_v2 = vld [vmem:[#allocation5 + $0xf4] sm:$0xf]  ;;  %v3900_v4 = vld [vmem:[#allocation5 + $0x158] sm:$0xf0] }
  0xc3   :  { %1061 = vmatpush.bf16.msrb.mxu3 %v3855_v8  ;;  %1050 = vmatpush.bf16.msrb.mxu2 %v3775_v14  ;;  %v5177_v8 = vld [vmem:[#allocation5 + $0x3c4] sm:$0xf0]  ;;  %v3924_v14 = vld [vmem:[#allocation5 + $0x3c8] sm:$0xf0]  ;;  %v3890_v12 = vld [vmem:[#allocation5 + $0x20] sm:$0xf] }
  0xc4   :  { %1036 = vmatpush.bf16.msrb.mxu1 %v3843_v18  ;;  %v3995_v18 = vor.u32 %v5195_v11, %v3994_v10  ;;  %v3927_v21 = vor.u32 %v5176_v13, %v3924_v14  ;;  %v3972_v10 = vld [vmem:[#allocation5 + $0x8a8] sm:$0xf0]  ;;  %v5169_v13 = vld [vmem:[#allocation5 + $0x84] sm:$0xf0]  ;;  %v5168_v14 = vld [vmem:[#allocation5 + $0x24] sm:$0xf] }
  0xc5   :  { %1025 = vmatpush.bf16.msrb.mxu0 %v3763_v23  ;;  %v5175_v23 = vld [vmem:[#allocation5 + $0x2f4] sm:$0xf0]  ;;  %v3891_v15 = vor.u32 %v5169_v13, %v3890_v12  ;;  %v4050_v61 = vld [vmem:[#allocation5 + $0x368] sm:$0xf]  ;;  %v5209_v62 = vld [vmem:[#allocation5 + $0x3cc] sm:$0xf0] }
  0xc6   :  { %v3915_v27 = vor.u32 %v5175_v23, %v3914_v22  ;;  %v3964_v22 = vld [vmem:[#allocation5 + $0x7d8] sm:$0xf0] }
  0xc7   :  { %1062 = vmatpush.bf16.msrb.mxu3 %v3847_v20  ;;  %1051 = vmatpush.bf16.msrb.mxu2 %v3767_v26  ;;  %v3923_v20 = vor.u32 %v5177_v8, %v3922_v7  ;;  %v5189_v7 = vld [vmem:[#allocation5 + $0x8a4] sm:$0xf0] }
  0xc8   :  { %1037 = vmatpush.bf16.msrb.mxu1 %v3835_v30  ;;  %v3919_v30 = vor.u32 %v5174_v24, %v3916_v25  ;;  %v3954_v24 = vld [vmem:[#allocation5 + $0x6a0] sm:$0xf]  ;;  %v5185_v25 = vld [vmem:[#allocation5 + $0x704] sm:$0xf0] }
  0xcb   :  { %1063 = vmatpush.bf16.msrb.mxu3 %v3839_v32 }
  0xcd   :  { %v517_v36 = vpop.f32.mrf.mxu0 }
  0xce   :  { %v518_v37 = vadd.f32 %v517_v36, %v130_v35  ;;  %v530_v39 = vpop.f32.mrf.mxu1  ;;  %v5152_v35 = vld [vmem:[#allocation5 + $0x69c] sm:$0xf]  ;;  %v3827_v36 = vor.u32 %v5153_v34, %v3826_v33 }
  0xd0   :  { %v5616_v40 = vadd.f32 %v530_v39, %v518_v37  ;;  %v3828_v37 = vld [vmem:[#allocation5 + $0x700] sm:$0xf0]  ;;  %1038 = vmatpush.bf16.msrb.mxu1 %v3827_v36 }
  0xd1   :  { %v3831_v39 = vor.u32 %v5152_v35, %v3828_v37 }
  0xd3   :  { %1064 = vmatpush.bf16.msrb.mxu3 %v3831_v39 }
  0xd4   :  { %1285 = vmatpush.bf16.msra.mxu1 %v4011_v58  ;;  %v3908_v58 = vld [vmem:[#allocation5 + $0x228] sm:$0xf0] }
  0xd5   :  { %v519_v43 = vpop.f32.mrf.mxu0  ;;  %v543_v44 = vpop.f32.mrf.mxu2  ;;  %v3911_v59 = vor.u32 %v5172_v57, %v3908_v58  ;;  %v4130_v57 = vld [vmem:[#allocation5 + $0xb88] sm:$0xf] }
  0xd6   :  { %v556_v45 = vpop.f32.mrf.mxu3  ;;  %v544_v46 = vadd.f32 %v543_v44, %v131_v41  ;;  %v532_v48 = vpop.f32.mrf.mxu1  ;;  %v3946_v41 = vld [vmem:[#allocation5 + $0x5d0] sm:$0xf]  ;;  %v5183_v43 = vld [vmem:[#allocation5 + $0x634] sm:$0xf0]  ;;  %v5182_v44 = vld [vmem:[#allocation5 + $0x5d4] sm:$0xf] }
  0xd7   :  { %v3938_v48 = vld [vmem:[#allocation5 + $0x500] sm:$0xf]  ;;  %1311 = vmatpush.bf16.msra.mxu3 %v4015_v38  ;;  %v5191_v38 = vld [vmem:[#allocation5 + $0x974] sm:$0xf0] }
  0xd8   :  { %v5619_v49 = vadd.f32 %v556_v45, %v544_v46  ;;  %v3947_v45 = vor.u32 %v5183_v43, %v3946_v41  ;;  %v3948_v46 = vld [vmem:[#allocation5 + $0x638] sm:$0xf0]  ;;  %1286 = vmatpush.bf16.msra.mxu1 %v4003_v1  ;;  %v5171_v1 = vld [vmem:[#allocation5 + $0x154] sm:$0xf0] }
  0xd9   :  { %v3899_v3 = vor.u32 %v5171_v1, %v3898_v0  ;;  %v4122_v0 = vld [vmem:[#allocation5 + $0xab8] sm:$0xf]  ;;  %v5227_v1 = vld [vmem:[#allocation5 + $0xb1c] sm:$0xf0] }
  0xda   :  { %1272 = vmatpush.bf16.msra.mxu0 %v3947_v45 }
  0xdb   :  { %1312 = vmatpush.bf16.msra.mxu3 %v4007_v6  ;;  %v3970_v6 = vld [vmem:[#allocation5 + $0x840] sm:$0xf] }
  0xdc   :  { %1287 = vmatpush.bf16.msra.mxu1 %v3995_v18  ;;  %v3971_v8 = vor.u32 %v5189_v7, %v3970_v6  ;;  %v3962_v18 = vld [vmem:[#allocation5 + $0x770] sm:$0xf]  ;;  %v852_v6 = vld [vmem:[#allocation7 + $0x6] sm:$0x3]  ;;  %v4123_v7 = vor.u32 %v5227_v1, %v4122_v0  ;;  %v4100_v1 = vld [vmem:[#allocation5 + $0x8b0] sm:$0xf0] }
  0xdd   :  { %v545_v50 = vpop.f32.mrf.mxu2  ;;  %v854_v12 = vperm.slane %v852_v6, 0 }
  0xde   :  { %v558_v51 = vpop.f32.mrf.mxu3  ;;  %v5181_v50 = vld [vmem:[#allocation5 + $0x564] sm:$0xf0] }
  0xdf   :  { %v3951_v51 = vor.u32 %v5182_v44, %v3948_v46  ;;  %v3939_v55 = vor.u32 %v5181_v50, %v3938_v48  ;;  %1313 = vmatpush.bf16.msra.mxu3 %v3999_v19  ;;  %v5187_v19 = vld [vmem:[#allocation5 + $0x7d4] sm:$0xf0] }
  0xe1   :  { %1298 = vmatpush.bf16.msra.mxu2 %v3951_v51  ;;  %1273 = vmatpush.bf16.msra.mxu0 %v3939_v55  ;;  %v5193_v51 = vld [vmem:[#allocation5 + $0xa44] sm:$0xf0]  ;;  %v3991_v55 = vor.u32 %v5192_v52, %v3988_v54  ;;  %v4058_v54 = vld [vmem:[#allocation5 + $0x438] sm:$0xf] }
  0xe3   :  { %1314 = vmatpush.bf16.msra.mxu3 %v3991_v55  ;;  %v5211_v55 = vld [vmem:[#allocation5 + $0x49c] sm:$0xf0] }
  0xe5   :  { %1299 = vmatpush.bf16.msra.mxu2 %v3943_v47  ;;  %1274 = vmatpush.bf16.msra.mxu0 %v3931_v5  ;;  %v3907_v47 = vor.u32 %v5173_v42, %v3906_v56  ;;  %v3903_v5 = vor.u32 %v5170_v2, %v3900_v4  ;;  %v5210_v56 = vld [vmem:[#allocation5 + $0x43c] sm:$0xf]  ;;  %v4060_v42 = vld [vmem:[#allocation5 + $0x4a0] sm:$0xf0]  ;;  %v4052_v4 = vld [vmem:[#allocation5 + $0x3d0] sm:$0xf0] }
  0xe6   :  { %v5226_v2 = vld [vmem:[#allocation5 + $0xabc] sm:$0xf] }
  0xe7   :  { %1315 = vmatpush.bf16.msra.mxu3 %v3983_v63  ;;  %v4063_v63 = vor.u32 %v5210_v56, %v4060_v42  ;;  %v4108_v42 = vld [vmem:[#allocation5 + $0x980] sm:$0xf0] }
  0xe9   :  { %1300 = vmatpush.bf16.msra.mxu2 %v3935_v9  ;;  %1275 = vmatpush.bf16.msra.mxu0 %v3923_v20  ;;  %v5188_v9 = vld [vmem:[#allocation5 + $0x844] sm:$0xf]  ;;  %v5186_v20 = vld [vmem:[#allocation5 + $0x774] sm:$0xf] }
  0xea   :  { %v3975_v11 = vor.u32 %v5188_v9, %v3972_v10  ;;  %v3967_v23 = vor.u32 %v5186_v20, %v3964_v22  ;;  %v4051_v9 = vor.u32 %v5209_v62, %v4050_v61  ;;  %v4098_v61 = vld [vmem:[#allocation5 + $0x848] sm:$0xf]  ;;  %v5221_v62 = vld [vmem:[#allocation5 + $0x8ac] sm:$0xf0] }
  0xeb   :  { %v4099_v0 = vor.u32 %v5221_v62, %v4098_v61  ;;  %v4252_v61 = vld [vmem:[#allocation5 + $0xb28] sm:$0xf0] }
  0xec   :  { %1316 = vmatpush.bf16.msra.mxu3 %v3975_v11 }
  0xed   :  { %1301 = vmatpush.bf16.msra.mxu2 %v3927_v21  ;;  %1276 = vmatpush.bf16.msra.mxu0 %v3915_v27  ;;  %v3963_v21 = vor.u32 %v5187_v19, %v3962_v18  ;;  %v3955_v27 = vor.u32 %v5185_v25, %v3954_v24 }
  0xf0   :  { %1317 = vmatpush.bf16.msra.mxu3 %v3967_v23 }
  0xf1   :  { %1302 = vmatpush.bf16.msra.mxu2 %v3919_v30  ;;  %1277 = vmatpush.bf16.msra.mxu0 %v3907_v47  ;;  %v4074_v30 = vld [vmem:[#allocation5 + $0x5d8] sm:$0xf]  ;;  %v5229_v47 = vld [vmem:[#allocation5 + $0xbec] sm:$0xf0] }
  0xf2   :  { %v4131_v58 = vor.u32 %v5229_v47, %v4130_v57  ;;  %v4026_v47 = vld [vmem:[#allocation5 + $0xf8] sm:$0xf] }
  0xf5   :  { %1303 = vmatpush.bf16.msra.mxu2 %v3911_v59  ;;  %1278 = vmatpush.bf16.msra.mxu0 %v3899_v3  ;;  %v4059_v59 = vor.u32 %v5211_v55, %v4058_v54  ;;  %v5208_v3 = vld [vmem:[#allocation5 + $0x36c] sm:$0xf]  ;;  %v5223_v54 = vld [vmem:[#allocation5 + $0x97c] sm:$0xf0]  ;;  %v5222_v55 = vld [vmem:[#allocation5 + $0x91c] sm:$0xf] }
  0xf6   :  { %v4055_v11 = vor.u32 %v5208_v3, %v4052_v4  ;;  %v4111_v57 = vor.u32 %v5222_v55, %v4108_v42  ;;  %v4018_v3 = vld [vmem:[#allocation5 + $0x28] sm:$0xf]  ;;  %v5201_v4 = vld [vmem:[#allocation5 + $0x8c] sm:$0xf0] }
  0xf7   :  { %v4178_v42 = vld [vmem:[#allocation5 + $0x370] sm:$0xf] }
  0xf9   :  { %1304 = vmatpush.bf16.msra.mxu2 %v3903_v5  ;;  %1279 = vmatpush.bf16.msra.mxu0 %v3891_v15  ;;  %v4124_v5 = vld [vmem:[#allocation5 + $0xb20] sm:$0xf0] }
 0x133   :  { %v771_v17 = vpop.f32.mrf.mxu0 }
 0x134   :  { %v772_v26 = vadd.f32 %v771_v17, %v598_v16  ;;  %v3892_v16 = vld [vmem:[#allocation5 + $0x88] sm:$0xf0] }
 0x135   :  { %v3895_v17 = vor.u32 %v5168_v14, %v3892_v16 }
 0x137   :  { %1305 = vmatpush.bf16.msra.mxu2 %v3895_v17  ;;  %v855_v17 = vperm.slane %v852_v6, 1  ;;  %v4019_v6 = vor.u32 %v5201_v4, %v4018_v3  ;;  %v4170_v4 = vld [vmem:[#allocation5 + $0x2a0] sm:$0xf] }
 0x139   :  { %v797_v29 = vpop.f32.mrf.mxu2 }
 0x13a   :  { %v798_v35 = vadd.f32 %v797_v29, %v599_v28  ;;  %v3956_v28 = vld [vmem:[#allocation5 + $0x708] sm:$0xf0] }
 0x13b   :  { %v784_v31 = vpop.f32.mrf.mxu1  ;;  %v773_v33 = vpop.f32.mrf.mxu0 }
 0x13c   :  { %v785_v32 = vadd.f32 %v784_v31, %v772_v26  ;;  %v5184_v26 = vld [vmem:[#allocation5 + $0x6a4] sm:$0xf]  ;;  %v5215_v31 = vld [vmem:[#allocation5 + $0x63c] sm:$0xf0] }
 0x13d   :  { %v3959_v29 = vor.u32 %v5184_v26, %v3956_v28  ;;  %v4075_v33 = vor.u32 %v5215_v31, %v4074_v30  ;;  %v5207_v30 = vld [vmem:[#allocation5 + $0x2fc] sm:$0xf0]  ;;  %v5206_v31 = vld [vmem:[#allocation5 + $0x29c] sm:$0xf] }
 0x13e   :  { %v814_v34 = vmax.f32 %v785_v32, 0.0  ;;  %v5214_v32 = vld [vmem:[#allocation5 + $0x5dc] sm:$0xf] }
 0x13f   :  { %1318 = vmatpush.bf16.msra.mxu3 %v3959_v29  ;;  %v4042_v29 = vld [vmem:[#allocation5 + $0x298] sm:$0xf] }
 0x140   :  { %v5622_v36 = vadd.f32 %v814_v34, %v5616_v40  ;;  %v3986_v40 = vld [vmem:[#allocation5 + $0x9e0] sm:$0xf]  ;;  %v4076_v34 = vld [vmem:[#allocation5 + $0x640] sm:$0xf0] }
 0x141   :  { %v810_v37 = vpop.f32.mrf.mxu3  ;;  %v799_v43 = vpop.f32.mrf.mxu2  ;;  %v3987_v53 = vor.u32 %v5193_v51, %v3986_v40  ;;  %v4140_v40 = vld [vmem:[#allocation5 + $0xcc0] sm:$0xf0] }
 0x142   :  { %v818_v39 = vpack.c.bf16 %v5622_v36, %v5622_v36  ;;  %v811_v41 = vadd.f32 %v810_v37, %v798_v35  ;;  %v4066_v35 = vld [vmem:[#allocation5 + $0x508] sm:$0xf]  ;;  %v5213_v37 = vld [vmem:[#allocation5 + $0x56c] sm:$0xf0]  ;;  %v4068_v43 = vld [vmem:[#allocation5 + $0x570] sm:$0xf0] }
 0x143   :  { %v786_v44 = vpop.f32.mrf.mxu1  ;;  %1288 = vmatpush.bf16.msra.mxu1 %v3987_v53 }
 0x144   :  { %v815_v45 = vmax.f32 %v811_v41, 0.0  ;;  %1026 = vmatmul.bf16.vlgmr.msrb.gmra.mxu0 %v818_v39  ;;  %1052 = vmatmul.bf16.vlgmr.msrb.gmra.mxu2 %v818_v39  ;;  %v4079_v39 = vor.u32 %v5214_v32, %v4076_v34  ;;  %v5212_v41 = vld [vmem:[#allocation5 + $0x50c] sm:$0xf]  ;;  %v4138_v44 = vld [vmem:[#allocation5 + $0xc58] sm:$0xf]  ;;  %v4043_v32 = vor.u32 %v5207_v30, %v4042_v29 }
 0x145   :  { %1528 = vmatpush.bf16.msrb.mxu0 %v4075_v33  ;;  %v4071_v51 = vor.u32 %v5212_v41, %v4068_v43  ;;  %v4044_v33 = vld [vmem:[#allocation5 + $0x300] sm:$0xf0]  ;;  %v4116_v43 = vld [vmem:[#allocation5 + $0xa50] sm:$0xf0]  ;;  %v4196_v30 = vld [vmem:[#allocation5 + $0x578] sm:$0xf0] }
 0x146   :  { %v5627_v46 = vadd.f32 %v815_v45, %v5619_v49  ;;  %v3978_v49 = vld [vmem:[#allocation5 + $0x910] sm:$0xf]  ;;  %v4067_v45 = vor.u32 %v5213_v37, %v4066_v35  ;;  %1554 = vmatpush.bf16.msrb.mxu2 %v4079_v39  ;;  %v4047_v34 = vor.u32 %v5206_v31, %v4044_v33  ;;  %v4114_v35 = vld [vmem:[#allocation5 + $0x9e8] sm:$0xf]  ;;  %v5224_v39 = vld [vmem:[#allocation5 + $0x9ec] sm:$0xf] }
 0x147   :  { %v3979_v60 = vor.u32 %v5191_v38, %v3978_v49  ;;  %v5228_v49 = vld [vmem:[#allocation5 + $0xb8c] sm:$0xf]  ;;  %v4132_v38 = vld [vmem:[#allocation5 + $0xbf0] sm:$0xf0]  ;;  %v5225_v37 = vld [vmem:[#allocation5 + $0xa4c] sm:$0xf0] }
 0x148   :  { %v819_v48 = vpack.c.bf16 %v5627_v46, %v5627_v46  ;;  %v4115_v41 = vor.u32 %v5225_v37, %v4114_v35  ;;  %v5244_v29 = vld [vmem:[#allocation5 + $0x514] sm:$0xf]  ;;  %v4266_v31 = vld [vmem:[#allocation5 + $0xc60] sm:$0xf]  ;;  %v5263_v33 = vld [vmem:[#allocation5 + $0xcc4] sm:$0xf0] }
 0x149   :  { %v812_v50 = vpop.f32.mrf.mxu3  ;;  %1289 = vmatpush.bf16.msra.mxu1 %v3979_v60  ;;  %1529 = vmatpush.bf16.msrb.mxu0 %v4067_v45  ;;  %v4135_v60 = vor.u32 %v5228_v49, %v4132_v38  ;;  %v5205_v45 = vld [vmem:[#allocation5 + $0x22c] sm:$0xf0]  ;;  %v5202_v38 = vld [vmem:[#allocation5 + $0xfc] sm:$0xf]  ;;  %v4268_v35 = vld [vmem:[#allocation5 + $0xcc8] sm:$0xf0]  ;;  %v4199_v37 = vor.u32 %v5244_v29, %v4196_v30 }
 0x14a   :  { %1039 = vmatmul.bf16.vlgmr.msrb.gmra.mxu1 %v819_v48  ;;  %1065 = vmatmul.bf16.vlgmr.msrb.gmra.mxu3 %v819_v48  ;;  %v5231_v48 = vld [vmem:[#allocation5 + $0xcbc] sm:$0xf0]  ;;  %v5230_v50 = vld [vmem:[#allocation5 + $0xc5c] sm:$0xf]  ;;  %v5256_v29 = vld [vmem:[#allocation5 + $0x9f4] sm:$0xf] }
 0x14b   :  { %v4139_v52 = vor.u32 %v5231_v48, %v4138_v44  ;;  %v4143_v53 = vor.u32 %v5230_v50, %v4140_v40  ;;  %1555 = vmatpush.bf16.msrb.mxu2 %v4071_v51  ;;  %v4034_v44 = vld [vmem:[#allocation5 + $0x1c8] sm:$0xf]  ;;  %v4119_v48 = vor.u32 %v5224_v39, %v4116_v43  ;;  %v5204_v40 = vld [vmem:[#allocation5 + $0x1cc] sm:$0xf]  ;;  %v4036_v51 = vld [vmem:[#allocation5 + $0x230] sm:$0xf0]  ;;  %v4267_v39 = vor.u32 %v5263_v33, %v4266_v31 }
 0x14c   :  { %v4035_v50 = vor.u32 %v5205_v45, %v4034_v44  ;;  %v4186_v43 = vld [vmem:[#allocation5 + $0x440] sm:$0xf]  ;;  %v5243_v44 = vld [vmem:[#allocation5 + $0x4a4] sm:$0xf0]  ;;  %v5242_v45 = vld [vmem:[#allocation5 + $0x444] sm:$0xf] }
 0x14d   :  { %1290 = vmatpush.bf16.msra.mxu1 %v3971_v8  ;;  %1567 = vmatpush.bf16.msrb.mxu3 %v4143_v53  ;;  %v4127_v8 = vor.u32 %v5226_v2, %v4124_v5  ;;  %v4106_v53 = vld [vmem:[#allocation5 + $0x918] sm:$0xf]  ;;  %v5200_v5 = vld [vmem:[#allocation5 + $0x2c] sm:$0xf]  ;;  %v4187_v55 = vor.u32 %v5243_v44, %v4186_v43  ;;  %v4244_v31 = vld [vmem:[#allocation5 + $0xa58] sm:$0xf0] }
 0x14e   :  { %1530 = vmatpush.bf16.msrb.mxu0 %v4059_v59  ;;  %v4107_v56 = vor.u32 %v5223_v54, %v4106_v53  ;;  %v4028_v59 = vld [vmem:[#allocation5 + $0x160] sm:$0xf0]  ;;  %v4260_v53 = vld [vmem:[#allocation5 + $0xbf8] sm:$0xf0]  ;;  %v1106_v54 = vld [vmem:[#allocation7 + $0x8] sm:$0x3] }
 0x14f   :  { %1556 = vmatpush.bf16.msrb.mxu2 %v4063_v63  ;;  %v5220_v63 = vld [vmem:[#allocation5 + $0x84c] sm:$0xf]  ;;  %v4162_v33 = vld [vmem:[#allocation5 + $0x1d0] sm:$0xf] }
 0x150   :  { %v4103_v2 = vor.u32 %v5220_v63, %v4100_v1 }
 0x151   :  { %1291 = vmatpush.bf16.msra.mxu1 %v3963_v21  ;;  %1568 = vmatpush.bf16.msrb.mxu3 %v4135_v60  ;;  %v4031_v60 = vor.u32 %v5202_v38, %v4028_v59  ;;  %v5258_v38 = vld [vmem:[#allocation5 + $0xac4] sm:$0xf]  ;;  %v5240_v59 = vld [vmem:[#allocation5 + $0x374] sm:$0xf] }
 0x152   :  { %1531 = vmatpush.bf16.msrb.mxu0 %v4051_v9  ;;  %v4090_v9 = vld [vmem:[#allocation5 + $0x778] sm:$0xf]  ;;  %v4255_v63 = vor.u32 %v5258_v38, %v4252_v61  ;;  %v4146_v38 = vld [vmem:[#allocation5 + $0x30] sm:$0xf] }
 0x153   :  { %1557 = vmatpush.bf16.msrb.mxu2 %v4055_v11  ;;  %v5218_v11 = vld [vmem:[#allocation5 + $0x77c] sm:$0xf] }
 0x155   :  { %1292 = vmatpush.bf16.msra.mxu1 %v3955_v27  ;;  %1569 = vmatpush.bf16.msrb.mxu3 %v4127_v8 }
 0x156   :  { %1532 = vmatpush.bf16.msrb.mxu0 %v4043_v32 }
 0x157   :  { %1558 = vmatpush.bf16.msrb.mxu2 %v4047_v34  ;;  %v5262_v34 = vld [vmem:[#allocation5 + $0xc64] sm:$0xf] }
 0x159   :  { %1541 = vmatpush.bf16.msrb.mxu1 %v4139_v52  ;;  %v4039_v52 = vor.u32 %v5204_v40, %v4036_v51  ;;  %1570 = vmatpush.bf16.msrb.mxu3 %v4119_v48  ;;  %v4188_v48 = vld [vmem:[#allocation5 + $0x4a8] sm:$0xf0]  ;;  %v5261_v40 = vld [vmem:[#allocation5 + $0xbf4] sm:$0xf0] }
 0x15a   :  { %1533 = vmatpush.bf16.msrb.mxu0 %v4035_v50  ;;  %v4258_v50 = vld [vmem:[#allocation5 + $0xb90] sm:$0xf] }
 0x15b   :  { %1559 = vmatpush.bf16.msrb.mxu2 %v4039_v52  ;;  %v4259_v51 = vor.u32 %v5261_v40, %v4258_v50  ;;  %v5260_v52 = vld [vmem:[#allocation5 + $0xb94] sm:$0xf]  ;;  %v4154_v40 = vld [vmem:[#allocation5 + $0x100] sm:$0xf] }
 0x15d   :  { %1542 = vmatpush.bf16.msrb.mxu1 %v4131_v58  ;;  %v5203_v58 = vld [vmem:[#allocation5 + $0x15c] sm:$0xf0]  ;;  %1571 = vmatpush.bf16.msrb.mxu3 %v4111_v57  ;;  %v5241_v57 = vld [vmem:[#allocation5 + $0x3d4] sm:$0xf0] }
 0x15e   :  { %v4027_v49 = vor.u32 %v5203_v58, %v4026_v47  ;;  %v4191_v47 = vor.u32 %v5242_v45, %v4188_v48  ;;  %v4250_v58 = vld [vmem:[#allocation5 + $0xac0] sm:$0xf]  ;;  %v4179_v1 = vor.u32 %v5241_v57, %v4178_v42  ;;  %v5254_v45 = vld [vmem:[#allocation5 + $0x924] sm:$0xf]  ;;  %v4236_v48 = vld [vmem:[#allocation5 + $0x988] sm:$0xf0] }
 0x15f   :  { %1560 = vmatpush.bf16.msrb.mxu2 %v4031_v60  ;;  %v4180_v60 = vld [vmem:[#allocation5 + $0x3d8] sm:$0xf0]  ;;  %v4239_v50 = vor.u32 %v5254_v45, %v4236_v48  ;;  %v5253_v42 = vld [vmem:[#allocation5 + $0x8b4] sm:$0xf0]  ;;  %v5273_v48 = vld [vmem:[#allocation5 + $0x3dc] sm:$0xf0] }
 0x160   :  { %1534 = vmatpush.bf16.msrb.mxu0 %v4027_v49  ;;  %v5259_v49 = vld [vmem:[#allocation5 + $0xb24] sm:$0xf0]  ;;  %v4183_v3 = vor.u32 %v5240_v59, %v4180_v60  ;;  %v5233_v59 = vld [vmem:[#allocation5 + $0x94] sm:$0xf0]  ;;  %v5232_v60 = vld [vmem:[#allocation5 + $0x34] sm:$0xf] }
 0x161   :  { %1543 = vmatpush.bf16.msrb.mxu1 %v4123_v7  ;;  %v4020_v7 = vld [vmem:[#allocation5 + $0x90] sm:$0xf0]  ;;  %1572 = vmatpush.bf16.msrb.mxu3 %v4103_v2  ;;  %v4251_v62 = vor.u32 %v5259_v49, %v4250_v58  ;;  %v1108_v2 = vperm.slane %v1106_v54, 0  ;;  %v4228_v58 = vld [vmem:[#allocation5 + $0x8b8] sm:$0xf0]  ;;  %v4147_v61 = vor.u32 %v5233_v59, %v4146_v38 }
 0x162   :  { %v4023_v8 = vor.u32 %v5200_v5, %v4020_v7  ;;  %v5239_v5 = vld [vmem:[#allocation5 + $0x304] sm:$0xf0]  ;;  %v4172_v7 = vld [vmem:[#allocation5 + $0x308] sm:$0xf0]  ;;  %v4306_v45 = vld [vmem:[#allocation5 + $0x378] sm:$0xf] }
 0x164   :  { %1535 = vmatpush.bf16.msrb.mxu0 %v4019_v6  ;;  %1561 = vmatpush.bf16.msrb.mxu2 %v4023_v8  ;;  %v5238_v6 = vld [vmem:[#allocation5 + $0x2a4] sm:$0xf]  ;;  %v4171_v8 = vor.u32 %v5239_v5, %v4170_v4  ;;  %v4220_v4 = vld [vmem:[#allocation5 + $0x7e8] sm:$0xf0] }
 0x165   :  { %1544 = vmatpush.bf16.msrb.mxu1 %v4115_v41  ;;  %v4271_v41 = vor.u32 %v5262_v34, %v4268_v35  ;;  %v5237_v34 = vld [vmem:[#allocation5 + $0x234] sm:$0xf0]  ;;  %v5236_v35 = vld [vmem:[#allocation5 + $0x1d4] sm:$0xf] }
 0x169   :  { %1545 = vmatpush.bf16.msrb.mxu1 %v4107_v56  ;;  %v4263_v56 = vor.u32 %v5260_v52, %v4260_v53  ;;  %v5234_v52 = vld [vmem:[#allocation5 + $0x104] sm:$0xf] }
 0x16d   :  { %1546 = vmatpush.bf16.msrb.mxu1 %v4099_v0 }
 0x1c1   :  { %v1027_v10 = vpop.f32.mrf.mxu0 }
 0x1c2   :  { %v1028_v13 = vadd.f32 %v1027_v10, %v854_v12  ;;  %v5219_v10 = vld [vmem:[#allocation5 + $0x7dc] sm:$0xf0] }
 0x1c3   :  { %v4091_v12 = vor.u32 %v5219_v10, %v4090_v9  ;;  %v4175_v10 = vor.u32 %v5238_v6, %v4172_v7  ;;  %v4210_v6 = vld [vmem:[#allocation5 + $0x6b0] sm:$0xf]  ;;  %v5249_v7 = vld [vmem:[#allocation5 + $0x714] sm:$0xf0] }
 0x1c5   :  { %1547 = vmatpush.bf16.msrb.mxu1 %v4091_v12 }
 0x1c7   :  { %v1040_v14 = vpop.f32.mrf.mxu1  ;;  %v1053_v15 = vpop.f32.mrf.mxu2 }
 0x1c8   :  { %v1041_v16 = vadd.f32 %v1040_v14, %v1028_v13  ;;  %v1054_v21 = vadd.f32 %v1053_v15, %v855_v17  ;;  %v4092_v13 = vld [vmem:[#allocation5 + $0x7e0] sm:$0xf0]  ;;  %v4082_v15 = vld [vmem:[#allocation5 + $0x6a8] sm:$0xf]  ;;  %v5216_v17 = vld [vmem:[#allocation5 + $0x6ac] sm:$0xf] }
 0x1c9   :  { %v1029_v18 = vpop.f32.mrf.mxu0  ;;  %v4095_v14 = vor.u32 %v5218_v11, %v4092_v13 }
 0x1ca   :  { %v1070_v19 = vmax.f32 %v1041_v16, 0.0  ;;  %v5217_v16 = vld [vmem:[#allocation5 + $0x70c] sm:$0xf0] }
 0x1cb   :  { %1573 = vmatpush.bf16.msrb.mxu3 %v4095_v14  ;;  %v4083_v18 = vor.u32 %v5217_v16, %v4082_v15  ;;  %v1109_v14 = vperm.slane %v1106_v54, 1  ;;  %v4156_v54 = vld [vmem:[#allocation5 + $0x168] sm:$0xf0] }
 0x1cc   :  { %v1072_v20 = vpack.c.bf16 %v1070_v19, %v1070_v19  ;;  %v4084_v19 = vld [vmem:[#allocation5 + $0x710] sm:$0xf0] }
 0x1cd   :  { %v1066_v22 = vpop.f32.mrf.mxu3  ;;  %1548 = vmatpush.bf16.msrb.mxu1 %v4083_v18 }
 0x1ce   :  { %v1067_v23 = vadd.f32 %v1066_v22, %v1054_v21  ;;  %1280 = vmatmul.bf16.vlgmr.msra.gmra.mxu0 %v1072_v20  ;;  %1306 = vmatmul.bf16.vlgmr.msra.gmra.mxu2 %v1072_v20  ;;  %v4087_v20 = vor.u32 %v5216_v17, %v4084_v19  ;;  %v4202_v21 = vld [vmem:[#allocation5 + $0x5e0] sm:$0xf]  ;;  %v5247_v22 = vld [vmem:[#allocation5 + $0x644] sm:$0xf0] }
 0x1cf   :  { %v1042_v24 = vpop.f32.mrf.mxu1  ;;  %v1055_v25 = vpop.f32.mrf.mxu2 }
 0x1d0   :  { %v1071_v26 = vmax.f32 %v1067_v23, 0.0  ;;  %1574 = vmatpush.bf16.msrb.mxu3 %v4087_v20  ;;  %v5246_v23 = vld [vmem:[#allocation5 + $0x5e4] sm:$0xf]  ;;  %v4203_v24 = vor.u32 %v5247_v22, %v4202_v21  ;;  %v4204_v25 = vld [vmem:[#allocation5 + $0x648] sm:$0xf0] }
 0x1d2   :  { %v1073_v27 = vpack.c.bf16 %v1071_v26, %v1071_v26  ;;  %v4194_v26 = vld [vmem:[#allocation5 + $0x510] sm:$0xf]  ;;  %1782 = vmatpush.bf16.msra.mxu0 %v4203_v24 }
 0x1d4   :  { %1293 = vmatmul.bf16.vlgmr.msra.gmra.mxu1 %v1073_v27  ;;  %1319 = vmatmul.bf16.vlgmr.msra.gmra.mxu3 %v1073_v27  ;;  %v5245_v27 = vld [vmem:[#allocation5 + $0x574] sm:$0xf0] }
 0x1d5   :  { %v1068_v28 = vpop.f32.mrf.mxu3  ;;  %v4195_v32 = vor.u32 %v5245_v27, %v4194_v26  ;;  %1795 = vmatpush.bf16.msra.mxu1 %v4267_v39  ;;  %1821 = vmatpush.bf16.msra.mxu3 %v4271_v41  ;;  %v4164_v39 = vld [vmem:[#allocation5 + $0x238] sm:$0xf0]  ;;  %v5255_v41 = vld [vmem:[#allocation5 + $0x984] sm:$0xf0] }
 0x1d6   :  { %v4207_v28 = vor.u32 %v5246_v23, %v4204_v25  ;;  %v4167_v43 = vor.u32 %v5236_v35, %v4164_v39  ;;  %v4386_v35 = vld [vmem:[#allocation5 + $0xb98] sm:$0xf] }
 0x1d7   :  { %1783 = vmatpush.bf16.msra.mxu0 %v4195_v32  ;;  %v4247_v32 = vor.u32 %v5256_v29, %v4244_v31  ;;  %v4314_v31 = vld [vmem:[#allocation5 + $0x448] sm:$0xf] }
 0x1d8   :  { %1808 = vmatpush.bf16.msra.mxu2 %v4207_v28  ;;  %v5257_v28 = vld [vmem:[#allocation5 + $0xa54] sm:$0xf0] }
 0x1d9   :  { %1796 = vmatpush.bf16.msra.mxu1 %v4259_v51  ;;  %1822 = vmatpush.bf16.msra.mxu3 %v4263_v56  ;;  %v5235_v51 = vld [vmem:[#allocation5 + $0x164] sm:$0xf0]  ;;  %v4226_v56 = vld [vmem:[#allocation5 + $0x850] sm:$0xf] }
 0x1da   :  { %v4155_v53 = vor.u32 %v5235_v51, %v4154_v40  ;;  %v4227_v57 = vor.u32 %v5253_v42, %v4226_v56  ;;  %v4378_v40 = vld [vmem:[#allocation5 + $0xac8] sm:$0xf]  ;;  %v5291_v51 = vld [vmem:[#allocation5 + $0xb2c] sm:$0xf0] }
 0x1db   :  { %1784 = vmatpush.bf16.msra.mxu0 %v4187_v55  ;;  %v4159_v55 = vor.u32 %v5234_v52, %v4156_v54  ;;  %v5290_v52 = vld [vmem:[#allocation5 + $0xacc] sm:$0xf]  ;;  %v4308_v54 = vld [vmem:[#allocation5 + $0x3e0] sm:$0xf0]  ;;  %v1362_v56 = vld [vmem:[#allocation7 + $0xa] sm:$0x3]  ;;  %v4379_v42 = vor.u32 %v5291_v51, %v4378_v40 }
 0x1dc   :  { %1809 = vmatpush.bf16.msra.mxu2 %v4199_v37  ;;  %v4163_v37 = vor.u32 %v5237_v34, %v4162_v33  ;;  %v5274_v33 = vld [vmem:[#allocation5 + $0x44c] sm:$0xf]  ;;  %v4316_v34 = vld [vmem:[#allocation5 + $0x4b0] sm:$0xf0]  ;;  %v1364_v38 = vperm.slane %v1362_v56, 0 }
 0x1dd   :  { %1797 = vmatpush.bf16.msra.mxu1 %v4251_v62  ;;  %1823 = vmatpush.bf16.msra.mxu3 %v4255_v63  ;;  %v4148_v62 = vld [vmem:[#allocation5 + $0x98] sm:$0xf0]  ;;  %v4356_v51 = vld [vmem:[#allocation5 + $0x8c0] sm:$0xf0] }
 0x1de   :  { %v4151_v63 = vor.u32 %v5232_v60, %v4148_v62 }
 0x1df   :  { %1785 = vmatpush.bf16.msra.mxu0 %v4179_v1  ;;  %v5251_v1 = vld [vmem:[#allocation5 + $0x7e4] sm:$0xf0] }
 0x1e0   :  { %1810 = vmatpush.bf16.msra.mxu2 %v4191_v47  ;;  %v5252_v47 = vld [vmem:[#allocation5 + $0x854] sm:$0xf] }
 0x1e1   :  { %1824 = vmatpush.bf16.msra.mxu3 %v4247_v32  ;;  %v4231_v49 = vor.u32 %v5252_v47, %v4228_v58  ;;  %v5275_v32 = vld [vmem:[#allocation5 + $0x4ac] sm:$0xf0]  ;;  %v4307_v47 = vor.u32 %v5273_v48, %v4306_v45  ;;  %v4354_v45 = vld [vmem:[#allocation5 + $0x858] sm:$0xf]  ;;  %v5285_v48 = vld [vmem:[#allocation5 + $0x8bc] sm:$0xf0] }
 0x1e2   :  { %v4355_v40 = vor.u32 %v5285_v48, %v4354_v45  ;;  %v4508_v45 = vld [vmem:[#allocation5 + $0xb38] sm:$0xf0] }
 0x1e3   :  { %1786 = vmatpush.bf16.msra.mxu0 %v4171_v8  ;;  %v5248_v8 = vld [vmem:[#allocation5 + $0x6b4] sm:$0xf] }
 0x1e4   :  { %1811 = vmatpush.bf16.msra.mxu2 %v4183_v3 }
 0x1e5   :  { %1825 = vmatpush.bf16.msra.mxu3 %v4239_v50  ;;  %v4319_v50 = vor.u32 %v5274_v33, %v4316_v34  ;;  %v4364_v34 = vld [vmem:[#allocation5 + $0x990] sm:$0xf0] }
 0x1e7   :  { %1787 = vmatpush.bf16.msra.mxu0 %v4163_v37  ;;  %v5293_v37 = vld [vmem:[#allocation5 + $0xbfc] sm:$0xf0] }
 0x1e8   :  { %1812 = vmatpush.bf16.msra.mxu2 %v4175_v10  ;;  %v4212_v10 = vld [vmem:[#allocation5 + $0x718] sm:$0xf0]  ;;  %v4387_v39 = vor.u32 %v5293_v37, %v4386_v35  ;;  %v4282_v37 = vld [vmem:[#allocation5 + $0x108] sm:$0xf] }
 0x1e9   :  { %1826 = vmatpush.bf16.msra.mxu3 %v4231_v49 }
 0x1eb   :  { %1788 = vmatpush.bf16.msra.mxu0 %v4155_v53  ;;  %v5272_v53 = vld [vmem:[#allocation5 + $0x37c] sm:$0xf] }
 0x1ec   :  { %1813 = vmatpush.bf16.msra.mxu2 %v4167_v43  ;;  %v4315_v43 = vor.u32 %v5275_v32, %v4314_v31  ;;  %v4311_v49 = vor.u32 %v5272_v53, %v4308_v54  ;;  %v5287_v31 = vld [vmem:[#allocation5 + $0x98c] sm:$0xf0]  ;;  %v5286_v32 = vld [vmem:[#allocation5 + $0x92c] sm:$0xf]  ;;  %v4274_v53 = vld [vmem:[#allocation5 + $0x38] sm:$0xf] }
 0x1ed   :  { %v4367_v35 = vor.u32 %v5286_v32, %v4364_v34  ;;  %v5265_v54 = vld [vmem:[#allocation5 + $0x9c] sm:$0xf0] }
 0x1ee   :  { %v4434_v34 = vld [vmem:[#allocation5 + $0x380] sm:$0xf] }
 0x1ef   :  { %1789 = vmatpush.bf16.msra.mxu0 %v4147_v61 }
 0x1f0   :  { %1814 = vmatpush.bf16.msra.mxu2 %v4159_v55  ;;  %v4380_v55 = vld [vmem:[#allocation5 + $0xb30] sm:$0xf0] }
 0x1f4   :  { %1815 = vmatpush.bf16.msra.mxu2 %v4151_v63  ;;  %v1365_v63 = vperm.slane %v1362_v56, 1  ;;  %v4275_v56 = vor.u32 %v5265_v54, %v4274_v53  ;;  %v4426_v54 = vld [vmem:[#allocation5 + $0x2b0] sm:$0xf] }
 0x24b   :  { %v1281_v0 = vpop.f32.mrf.mxu0 }
 0x24c   :  { %v1282_v9 = vadd.f32 %v1281_v0, %v1108_v2  ;;  %v4218_v0 = vld [vmem:[#allocation5 + $0x780] sm:$0xf]  ;;  %v5250_v2 = vld [vmem:[#allocation5 + $0x784] sm:$0xf] }
 0x24d   :  { %v4219_v3 = vor.u32 %v5251_v1, %v4218_v0  ;;  %v4223_v5 = vor.u32 %v5250_v2, %v4220_v4 }
 0x24f   :  { %1827 = vmatpush.bf16.msra.mxu3 %v4223_v5 }
 0x251   :  { %v1294_v11 = vpop.f32.mrf.mxu1  ;;  %v1307_v12 = vpop.f32.mrf.mxu2 }
 0x252   :  { %v1295_v13 = vadd.f32 %v1294_v11, %v1282_v9  ;;  %v1308_v18 = vadd.f32 %v1307_v12, %v1109_v14  ;;  %v4211_v9 = vor.u32 %v5249_v7, %v4210_v6  ;;  %v4215_v11 = vor.u32 %v5248_v8, %v4212_v10  ;;  %v4330_v12 = vld [vmem:[#allocation5 + $0x5e8] sm:$0xf]  ;;  %v5278_v14 = vld [vmem:[#allocation5 + $0x5ec] sm:$0xf] }
 0x253   :  { %v1283_v15 = vpop.f32.mrf.mxu0 }
 0x254   :  { %v1324_v16 = vmax.f32 %v1295_v13, 0.0  ;;  %1828 = vmatpush.bf16.msra.mxu3 %v4215_v11  ;;  %v5279_v13 = vld [vmem:[#allocation5 + $0x64c] sm:$0xf0]  ;;  %v4298_v11 = vld [vmem:[#allocation5 + $0x2a8] sm:$0xf] }
 0x255   :  { %v4331_v15 = vor.u32 %v5279_v13, %v4330_v12  ;;  %v5271_v12 = vld [vmem:[#allocation5 + $0x30c] sm:$0xf0]  ;;  %v5270_v13 = vld [vmem:[#allocation5 + $0x2ac] sm:$0xf] }
 0x256   :  { %v5632_v17 = vadd.f32 %v1324_v16, %v5622_v36  ;;  %v4242_v36 = vld [vmem:[#allocation5 + $0x9f0] sm:$0xf]  ;;  %v4332_v16 = vld [vmem:[#allocation5 + $0x650] sm:$0xf0] }
 0x257   :  { %v1320_v19 = vpop.f32.mrf.mxu3  ;;  %v4243_v30 = vor.u32 %v5257_v28, %v4242_v36  ;;  %v4396_v36 = vld [vmem:[#allocation5 + $0xcd0] sm:$0xf0] }
 0x258   :  { %v1328_v20 = vpack.c.bf16 %v5632_v17, %v5632_v17  ;;  %v1321_v21 = vadd.f32 %v1320_v19, %v1308_v18  ;;  %v4322_v18 = vld [vmem:[#allocation5 + $0x518] sm:$0xf]  ;;  %v5277_v19 = vld [vmem:[#allocation5 + $0x57c] sm:$0xf0] }
 0x259   :  { %v1296_v22 = vpop.f32.mrf.mxu1  ;;  %v1309_v23 = vpop.f32.mrf.mxu2  ;;  %1798 = vmatpush.bf16.msra.mxu1 %v4243_v30 }
 0x25a   :  { %v1325_v24 = vmax.f32 %v1321_v21, 0.0  ;;  %1536 = vmatmul.bf16.vlgmr.msrb.gmra.mxu0 %v1328_v20  ;;  %1562 = vmatmul.bf16.vlgmr.msrb.gmra.mxu2 %v1328_v20  ;;  %v4335_v20 = vor.u32 %v5278_v14, %v4332_v16  ;;  %v5276_v21 = vld [vmem:[#allocation5 + $0x51c] sm:$0xf]  ;;  %v4324_v22 = vld [vmem:[#allocation5 + $0x580] sm:$0xf0]  ;;  %v4299_v14 = vor.u32 %v5271_v12, %v4298_v11 }
 0x25b   :  { %v4394_v23 = vld [vmem:[#allocation5 + $0xc68] sm:$0xf]  ;;  %2038 = vmatpush.bf16.msrb.mxu0 %v4331_v15  ;;  %v4327_v28 = vor.u32 %v5276_v21, %v4324_v22  ;;  %v4300_v15 = vld [vmem:[#allocation5 + $0x310] sm:$0xf0]  ;;  %v4372_v22 = vld [vmem:[#allocation5 + $0xa60] sm:$0xf0] }
 0x25c   :  { %v5637_v25 = vadd.f32 %v1325_v24, %v5627_v46  ;;  %v4234_v46 = vld [vmem:[#allocation5 + $0x920] sm:$0xf]  ;;  %v4323_v24 = vor.u32 %v5277_v19, %v4322_v18  ;;  %2064 = vmatpush.bf16.msrb.mxu2 %v4335_v20  ;;  %v4303_v16 = vor.u32 %v5270_v13, %v4300_v15  ;;  %v4370_v18 = vld [vmem:[#allocation5 + $0x9f8] sm:$0xf]  ;;  %v5288_v20 = vld [vmem:[#allocation5 + $0x9fc] sm:$0xf] }
 0x25d   :  { %v4235_v44 = vor.u32 %v5255_v41, %v4234_v46  ;;  %v5292_v46 = vld [vmem:[#allocation5 + $0xb9c] sm:$0xf]  ;;  %v4388_v41 = vld [vmem:[#allocation5 + $0xc00] sm:$0xf0]  ;;  %v5289_v19 = vld [vmem:[#allocation5 + $0xa5c] sm:$0xf0] }
 0x25e   :  { %v1329_v26 = vpack.c.bf16 %v5637_v25, %v5637_v25  ;;  %v4371_v21 = vor.u32 %v5289_v19, %v4370_v18  ;;  %v5308_v11 = vld [vmem:[#allocation5 + $0x524] sm:$0xf]  ;;  %v4452_v12 = vld [vmem:[#allocation5 + $0x588] sm:$0xf0]  ;;  %v4522_v13 = vld [vmem:[#allocation5 + $0xc70] sm:$0xf] }
 0x25f   :  { %v1322_v27 = vpop.f32.mrf.mxu3  ;;  %1799 = vmatpush.bf16.msra.mxu1 %v4235_v44  ;;  %2039 = vmatpush.bf16.msrb.mxu0 %v4323_v24  ;;  %v4391_v44 = vor.u32 %v5292_v46, %v4388_v41  ;;  %v5269_v24 = vld [vmem:[#allocation5 + $0x23c] sm:$0xf0]  ;;  %v5266_v41 = vld [vmem:[#allocation5 + $0x10c] sm:$0xf]  ;;  %v5327_v15 = vld [vmem:[#allocation5 + $0xcd4] sm:$0xf0]  ;;  %v4455_v19 = vor.u32 %v5308_v11, %v4452_v12 }
 0x260   :  { %1549 = vmatmul.bf16.vlgmr.msrb.gmra.mxu1 %v1329_v26  ;;  %1575 = vmatmul.bf16.vlgmr.msrb.gmra.mxu3 %v1329_v26  ;;  %v5295_v26 = vld [vmem:[#allocation5 + $0xccc] sm:$0xf0]  ;;  %v5294_v27 = vld [vmem:[#allocation5 + $0xc6c] sm:$0xf]  ;;  %v4524_v18 = vld [vmem:[#allocation5 + $0xcd8] sm:$0xf0] }
 0x261   :  { %v4395_v29 = vor.u32 %v5295_v26, %v4394_v23  ;;  %v4399_v30 = vor.u32 %v5294_v27, %v4396_v36  ;;  %2065 = vmatpush.bf16.msrb.mxu2 %v4327_v28  ;;  %v4290_v23 = vld [vmem:[#allocation5 + $0x1d8] sm:$0xf]  ;;  %v4375_v26 = vor.u32 %v5288_v20, %v4372_v22  ;;  %v5268_v36 = vld [vmem:[#allocation5 + $0x1dc] sm:$0xf]  ;;  %v4292_v28 = vld [vmem:[#allocation5 + $0x240] sm:$0xf0]  ;;  %v4523_v20 = vor.u32 %v5327_v15, %v4522_v13 }
 0x262   :  { %v4291_v27 = vor.u32 %v5269_v24, %v4290_v23  ;;  %v4442_v22 = vld [vmem:[#allocation5 + $0x450] sm:$0xf]  ;;  %v5307_v23 = vld [vmem:[#allocation5 + $0x4b4] sm:$0xf0]  ;;  %v5306_v24 = vld [vmem:[#allocation5 + $0x454] sm:$0xf] }
 0x263   :  { %1800 = vmatpush.bf16.msra.mxu1 %v4227_v57  ;;  %2077 = vmatpush.bf16.msrb.mxu3 %v4399_v30  ;;  %v4383_v57 = vor.u32 %v5290_v52, %v4380_v55  ;;  %v4362_v30 = vld [vmem:[#allocation5 + $0x928] sm:$0xf]  ;;  %v5264_v55 = vld [vmem:[#allocation5 + $0x3c] sm:$0xf]  ;;  %v4443_v32 = vor.u32 %v5307_v23, %v4442_v22  ;;  %v5320_v11 = vld [vmem:[#allocation5 + $0xa04] sm:$0xf] }
 0x264   :  { %2040 = vmatpush.bf16.msrb.mxu0 %v4315_v43  ;;  %v4363_v33 = vor.u32 %v5287_v31, %v4362_v30  ;;  %v4284_v43 = vld [vmem:[#allocation5 + $0x170] sm:$0xf0]  ;;  %v4516_v30 = vld [vmem:[#allocation5 + $0xc08] sm:$0xf0]  ;;  %v4418_v15 = vld [vmem:[#allocation5 + $0x1e0] sm:$0xf] }
 0x265   :  { %2066 = vmatpush.bf16.msrb.mxu2 %v4319_v50  ;;  %v5284_v50 = vld [vmem:[#allocation5 + $0x85c] sm:$0xf]  ;;  %v1616_v31 = vld [vmem:[#allocation7 + $0xc] sm:$0x3] }
 0x266   :  { %v4359_v52 = vor.u32 %v5284_v50, %v4356_v51  ;;  %v4500_v13 = vld [vmem:[#allocation5 + $0xa68] sm:$0xf0] }
 0x267   :  { %1801 = vmatpush.bf16.msra.mxu1 %v4219_v3  ;;  %2078 = vmatpush.bf16.msrb.mxu3 %v4391_v44  ;;  %v4287_v44 = vor.u32 %v5266_v41, %v4284_v43  ;;  %v5322_v41 = vld [vmem:[#allocation5 + $0xad4] sm:$0xf]  ;;  %v5304_v43 = vld [vmem:[#allocation5 + $0x384] sm:$0xf] }
 0x268   :  { %2041 = vmatpush.bf16.msrb.mxu0 %v4307_v47  ;;  %v4346_v47 = vld [vmem:[#allocation5 + $0x788] sm:$0xf]  ;;  %v4511_v50 = vor.u32 %v5322_v41, %v4508_v45  ;;  %v4402_v41 = vld [vmem:[#allocation5 + $0x40] sm:$0xf] }
 0x269   :  { %2067 = vmatpush.bf16.msrb.mxu2 %v4311_v49  ;;  %v5282_v49 = vld [vmem:[#allocation5 + $0x78c] sm:$0xf] }
 0x26b   :  { %1802 = vmatpush.bf16.msra.mxu1 %v4211_v9  ;;  %2079 = vmatpush.bf16.msrb.mxu3 %v4383_v57 }
 0x26c   :  { %2042 = vmatpush.bf16.msrb.mxu0 %v4299_v14 }
 0x26d   :  { %2068 = vmatpush.bf16.msrb.mxu2 %v4303_v16  ;;  %v5326_v16 = vld [vmem:[#allocation5 + $0xc74] sm:$0xf] }
 0x26f   :  { %2051 = vmatpush.bf16.msrb.mxu1 %v4395_v29  ;;  %v4295_v29 = vor.u32 %v5268_v36, %v4292_v28  ;;  %2080 = vmatpush.bf16.msrb.mxu3 %v4375_v26  ;;  %v4444_v26 = vld [vmem:[#allocation5 + $0x4b8] sm:$0xf0]  ;;  %v5325_v36 = vld [vmem:[#allocation5 + $0xc04] sm:$0xf0] }
 0x270   :  { %2043 = vmatpush.bf16.msrb.mxu0 %v4291_v27  ;;  %v4514_v27 = vld [vmem:[#allocation5 + $0xba0] sm:$0xf] }
 0x271   :  { %2069 = vmatpush.bf16.msrb.mxu2 %v4295_v29  ;;  %v4515_v28 = vor.u32 %v5325_v36, %v4514_v27  ;;  %v5324_v29 = vld [vmem:[#allocation5 + $0xba4] sm:$0xf]  ;;  %v4410_v36 = vld [vmem:[#allocation5 + $0x110] sm:$0xf] }
 0x273   :  { %2052 = vmatpush.bf16.msrb.mxu1 %v4387_v39  ;;  %v5267_v39 = vld [vmem:[#allocation5 + $0x16c] sm:$0xf0]  ;;  %2081 = vmatpush.bf16.msrb.mxu3 %v4367_v35  ;;  %v5305_v35 = vld [vmem:[#allocation5 + $0x3e4] sm:$0xf0] }
 0x274   :  { %v4283_v46 = vor.u32 %v5267_v39, %v4282_v37  ;;  %v4447_v37 = vor.u32 %v5306_v24, %v4444_v26  ;;  %v4506_v39 = vld [vmem:[#allocation5 + $0xad0] sm:$0xf]  ;;  %v4435_v51 = vor.u32 %v5305_v35, %v4434_v34  ;;  %v5318_v24 = vld [vmem:[#allocation5 + $0x934] sm:$0xf]  ;;  %v4492_v26 = vld [vmem:[#allocation5 + $0x998] sm:$0xf0] }
 0x275   :  { %2070 = vmatpush.bf16.msrb.mxu2 %v4287_v44  ;;  %v4436_v44 = vld [vmem:[#allocation5 + $0x3e8] sm:$0xf0]  ;;  %v4495_v27 = vor.u32 %v5318_v24, %v4492_v26  ;;  %v5317_v34 = vld [vmem:[#allocation5 + $0x8c4] sm:$0xf0]  ;;  %v5346_v26 = vld [vmem:[#allocation5 + $0x3ec] sm:$0xf0] }
 0x276   :  { %2044 = vmatpush.bf16.msrb.mxu0 %v4283_v46  ;;  %v5323_v46 = vld [vmem:[#allocation5 + $0xb34] sm:$0xf0]  ;;  %v4439_v53 = vor.u32 %v5304_v43, %v4436_v44  ;;  %v5297_v43 = vld [vmem:[#allocation5 + $0xa4] sm:$0xf0]  ;;  %v5296_v44 = vld [vmem:[#allocation5 + $0x44] sm:$0xf] }
 0x277   :  { %2053 = vmatpush.bf16.msrb.mxu1 %v4379_v42  ;;  %v4276_v42 = vld [vmem:[#allocation5 + $0xa0] sm:$0xf0]  ;;  %2082 = vmatpush.bf16.msrb.mxu3 %v4359_v52  ;;  %v4507_v48 = vor.u32 %v5323_v46, %v4506_v39  ;;  %v1618_v52 = vperm.slane %v1616_v31, 0  ;;  %v4484_v39 = vld [vmem:[#allocation5 + $0x8c8] sm:$0xf0]  ;;  %v4403_v45 = vor.u32 %v5297_v43, %v4402_v41 }
 0x278   :  { %v4279_v57 = vor.u32 %v5264_v55, %v4276_v42  ;;  %v5303_v55 = vld [vmem:[#allocation5 + $0x314] sm:$0xf0]  ;;  %v4428_v42 = vld [vmem:[#allocation5 + $0x318] sm:$0xf0]  ;;  %v4594_v24 = vld [vmem:[#allocation5 + $0x388] sm:$0xf] }
 0x279   :  { %v5376_v41 = vld [vmem:[#allocation5 + $0xa0c] sm:$0xf]  ;;  %v4724_v43 = vld [vmem:[#allocation5 + $0xa70] sm:$0xf0] }
 0x27a   :  { %2045 = vmatpush.bf16.msrb.mxu0 %v4275_v56  ;;  %2071 = vmatpush.bf16.msrb.mxu2 %v4279_v57  ;;  %v5302_v56 = vld [vmem:[#allocation5 + $0x2b4] sm:$0xf]  ;;  %v4427_v57 = vor.u32 %v5303_v55, %v4426_v54  ;;  %v4476_v54 = vld [vmem:[#allocation5 + $0x7f8] sm:$0xf0] }
 0x27b   :  { %2054 = vmatpush.bf16.msrb.mxu1 %v4371_v21  ;;  %v4527_v21 = vor.u32 %v5326_v16, %v4524_v18  ;;  %v5301_v16 = vld [vmem:[#allocation5 + $0x244] sm:$0xf0]  ;;  %v5300_v18 = vld [vmem:[#allocation5 + $0x1e4] sm:$0xf] }
 0x27f   :  { %2055 = vmatpush.bf16.msrb.mxu1 %v4363_v33  ;;  %v4519_v33 = vor.u32 %v5324_v29, %v4516_v30  ;;  %v5298_v29 = vld [vmem:[#allocation5 + $0x114] sm:$0xf] }
 0x283   :  { %2056 = vmatpush.bf16.msrb.mxu1 %v4355_v40 }
 0x2d7   :  { %v1537_v58 = vpop.f32.mrf.mxu0 }
 0x2d8   :  { %v1538_v59 = vadd.f32 %v1537_v58, %v1364_v38  ;;  %v5283_v58 = vld [vmem:[#allocation5 + $0x7ec] sm:$0xf0] }
 0x2d9   :  { %v4347_v38 = vor.u32 %v5283_v58, %v4346_v47  ;;  %v4431_v58 = vor.u32 %v5302_v56, %v4428_v42  ;;  %v4466_v56 = vld [vmem:[#allocation5 + $0x6c0] sm:$0xf]  ;;  %v5313_v42 = vld [vmem:[#allocation5 + $0x724] sm:$0xf0] }
 0x2db   :  { %2057 = vmatpush.bf16.msrb.mxu1 %v4347_v38 }
 0x2dd   :  { %v1550_v60 = vpop.f32.mrf.mxu1  ;;  %v1563_v61 = vpop.f32.mrf.mxu2 }
 0x2de   :  { %v1551_v62 = vadd.f32 %v1550_v60, %v1538_v59  ;;  %v1564_v3 = vadd.f32 %v1563_v61, %v1365_v63  ;;  %v4348_v59 = vld [vmem:[#allocation5 + $0x7f0] sm:$0xf0]  ;;  %v4338_v61 = vld [vmem:[#allocation5 + $0x6b8] sm:$0xf]  ;;  %v5280_v63 = vld [vmem:[#allocation5 + $0x6bc] sm:$0xf] }
 0x2df   :  { %v1539_v0 = vpop.f32.mrf.mxu0  ;;  %v4351_v60 = vor.u32 %v5282_v49, %v4348_v59 }
 0x2e0   :  { %v1580_v1 = vmax.f32 %v1551_v62, 0.0  ;;  %v5281_v62 = vld [vmem:[#allocation5 + $0x71c] sm:$0xf0] }
 0x2e1   :  { %2083 = vmatpush.bf16.msrb.mxu3 %v4351_v60  ;;  %v4339_v0 = vor.u32 %v5281_v62, %v4338_v61  ;;  %v1619_v60 = vperm.slane %v1616_v31, 1  ;;  %v4412_v31 = vld [vmem:[#allocation5 + $0x178] sm:$0xf0] }
 0x2e2   :  { %v1582_v2 = vpack.c.bf16 %v1580_v1, %v1580_v1  ;;  %v4340_v1 = vld [vmem:[#allocation5 + $0x720] sm:$0xf0] }
 0x2e3   :  { %v1576_v4 = vpop.f32.mrf.mxu3  ;;  %2058 = vmatpush.bf16.msrb.mxu1 %v4339_v0 }
 0x2e4   :  { %v1577_v5 = vadd.f32 %v1576_v4, %v1564_v3  ;;  %1790 = vmatmul.bf16.vlgmr.msra.gmra.mxu0 %v1582_v2  ;;  %1816 = vmatmul.bf16.vlgmr.msra.gmra.mxu2 %v1582_v2  ;;  %v4343_v2 = vor.u32 %v5280_v63, %v4340_v1  ;;  %v4458_v3 = vld [vmem:[#allocation5 + $0x5f0] sm:$0xf]  ;;  %v5311_v4 = vld [vmem:[#allocation5 + $0x654] sm:$0xf0] }
 0x2e5   :  { %v1552_v6 = vpop.f32.mrf.mxu1  ;;  %v1565_v7 = vpop.f32.mrf.mxu2 }
 0x2e6   :  { %v1581_v8 = vmax.f32 %v1577_v5, 0.0  ;;  %2084 = vmatpush.bf16.msrb.mxu3 %v4343_v2  ;;  %v5310_v5 = vld [vmem:[#allocation5 + $0x5f4] sm:$0xf]  ;;  %v4459_v6 = vor.u32 %v5311_v4, %v4458_v3  ;;  %v4460_v7 = vld [vmem:[#allocation5 + $0x658] sm:$0xf0] }
 0x2e8   :  { %v1583_v9 = vpack.c.bf16 %v1581_v8, %v1581_v8  ;;  %v4450_v8 = vld [vmem:[#allocation5 + $0x520] sm:$0xf]  ;;  %2292 = vmatpush.bf16.msra.mxu0 %v4459_v6 }
 0x2ea   :  { %1803 = vmatmul.bf16.vlgmr.msra.gmra.mxu1 %v1583_v9  ;;  %1829 = vmatmul.bf16.vlgmr.msra.gmra.mxu3 %v1583_v9  ;;  %v5309_v9 = vld [vmem:[#allocation5 + $0x584] sm:$0xf0] }
 0x2eb   :  { %v1578_v10 = vpop.f32.mrf.mxu3  ;;  %v4451_v14 = vor.u32 %v5309_v9, %v4450_v8  ;;  %2305 = vmatpush.bf16.msra.mxu1 %v4523_v20  ;;  %2331 = vmatpush.bf16.msra.mxu3 %v4527_v21  ;;  %v4420_v20 = vld [vmem:[#allocation5 + $0x248] sm:$0xf0]  ;;  %v5319_v21 = vld [vmem:[#allocation5 + $0x994] sm:$0xf0] }
 0x2ec   :  { %v4463_v10 = vor.u32 %v5310_v5, %v4460_v7  ;;  %v4423_v22 = vor.u32 %v5300_v18, %v4420_v20  ;;  %v4754_v18 = vld [vmem:[#allocation5 + $0xba8] sm:$0xf] }
 0x2ed   :  { %2293 = vmatpush.bf16.msra.mxu0 %v4451_v14  ;;  %v4503_v14 = vor.u32 %v5320_v11, %v4500_v13  ;;  %v4610_v13 = vld [vmem:[#allocation5 + $0x458] sm:$0xf] }
 0x2ee   :  { %2318 = vmatpush.bf16.msra.mxu2 %v4463_v10  ;;  %v5321_v10 = vld [vmem:[#allocation5 + $0xa64] sm:$0xf0] }
 0x2ef   :  { %2306 = vmatpush.bf16.msra.mxu1 %v4515_v28  ;;  %2332 = vmatpush.bf16.msra.mxu3 %v4519_v33  ;;  %v5299_v28 = vld [vmem:[#allocation5 + $0x174] sm:$0xf0]  ;;  %v4482_v33 = vld [vmem:[#allocation5 + $0x860] sm:$0xf] }
 0x2f0   :  { %v4411_v30 = vor.u32 %v5299_v28, %v4410_v36  ;;  %v4483_v35 = vor.u32 %v5317_v34, %v4482_v33  ;;  %v4738_v36 = vld [vmem:[#allocation5 + $0xad8] sm:$0xf]  ;;  %v5382_v28 = vld [vmem:[#allocation5 + $0xb3c] sm:$0xf0]  ;;  %v5651_v33 = vld [vmem:[#allocation7 + $0xe] sm:$0x3] }
 0x2f1   :  { %2294 = vmatpush.bf16.msra.mxu0 %v4443_v32  ;;  %v4415_v32 = vor.u32 %v5298_v29, %v4412_v31  ;;  %v5380_v29 = vld [vmem:[#allocation5 + $0xadc] sm:$0xf]  ;;  %v4596_v31 = vld [vmem:[#allocation5 + $0x3f0] sm:$0xf0]  ;;  %v4739_v34 = vor.u32 %v5382_v28, %v4738_v36  ;;  %v5328_v36 = vld [vmem:[#allocation5 + $0x4c] sm:$0xf] }
 0x2f2   :  { %2319 = vmatpush.bf16.msra.mxu2 %v4455_v19  ;;  %v4419_v19 = vor.u32 %v5301_v16, %v4418_v15  ;;  %v5348_v15 = vld [vmem:[#allocation5 + $0x45c] sm:$0xf]  ;;  %v4612_v16 = vld [vmem:[#allocation5 + $0x4c0] sm:$0xf0]  ;;  %v4532_v28 = vld [vmem:[#allocation5 + $0xb0] sm:$0xf0] }
 0x2f3   :  { %2307 = vmatpush.bf16.msra.mxu1 %v4507_v48  ;;  %2333 = vmatpush.bf16.msra.mxu3 %v4511_v50  ;;  %v4404_v48 = vld [vmem:[#allocation5 + $0xa8] sm:$0xf0] }
 0x2f4   :  { %v4407_v50 = vor.u32 %v5296_v44, %v4404_v48  ;;  %v4578_v48 = vld [vmem:[#allocation5 + $0x2b8] sm:$0xf] }
 0x2f5   :  { %2295 = vmatpush.bf16.msra.mxu0 %v4435_v51  ;;  %v5315_v51 = vld [vmem:[#allocation5 + $0x7f4] sm:$0xf0] }
 0x2f6   :  { %2320 = vmatpush.bf16.msra.mxu2 %v4447_v37  ;;  %v5316_v37 = vld [vmem:[#allocation5 + $0x864] sm:$0xf] }
 0x2f7   :  { %2334 = vmatpush.bf16.msra.mxu3 %v4503_v14  ;;  %v4487_v46 = vor.u32 %v5316_v37, %v4484_v39  ;;  %v5350_v14 = vld [vmem:[#allocation5 + $0x4bc] sm:$0xf0]  ;;  %v4722_v37 = vld [vmem:[#allocation5 + $0xa08] sm:$0xf]  ;;  %v4595_v39 = vor.u32 %v5346_v26, %v4594_v24 }
 0x2f8   :  { %v4530_v24 = vld [vmem:[#allocation5 + $0x48] sm:$0xf] }
 0x2f9   :  { %2296 = vmatpush.bf16.msra.mxu0 %v4427_v57  ;;  %v5312_v57 = vld [vmem:[#allocation5 + $0x6c4] sm:$0xf] }
 0x2fa   :  { %2321 = vmatpush.bf16.msra.mxu2 %v4439_v53 }
 0x2fb   :  { %2335 = vmatpush.bf16.msra.mxu3 %v4495_v27  ;;  %v4615_v27 = vor.u32 %v5348_v15, %v4612_v16  ;;  %v5332_v15 = vld [vmem:[#allocation5 + $0x11c] sm:$0xf]  ;;  %v4548_v16 = vld [vmem:[#allocation5 + $0x180] sm:$0xf0] }
 0x2fd   :  { %2297 = vmatpush.bf16.msra.mxu0 %v4419_v19  ;;  %v5386_v19 = vld [vmem:[#allocation5 + $0xc0c] sm:$0xf0] }
 0x2fe   :  { %2322 = vmatpush.bf16.msra.mxu2 %v4431_v58  ;;  %v4468_v58 = vld [vmem:[#allocation5 + $0x728] sm:$0xf0]  ;;  %v4755_v20 = vor.u32 %v5386_v19, %v4754_v18 }
 0x2ff   :  { %2336 = vmatpush.bf16.msra.mxu3 %v4487_v46  ;;  %v5378_v46 = vld [vmem:[#allocation5 + $0xa6c] sm:$0xf0] }
 0x301   :  { %2298 = vmatpush.bf16.msra.mxu0 %v4411_v30  ;;  %v5344_v30 = vld [vmem:[#allocation5 + $0x38c] sm:$0xf] }
 0x302   :  { %2323 = vmatpush.bf16.msra.mxu2 %v4423_v22  ;;  %v4611_v22 = vor.u32 %v5350_v14, %v4610_v13  ;;  %v5334_v13 = vld [vmem:[#allocation5 + $0x17c] sm:$0xf0] }
 0x305   :  { %2299 = vmatpush.bf16.msra.mxu0 %v4403_v45  ;;  %v4599_v45 = vor.u32 %v5344_v30, %v4596_v31 }
 0x306   :  { %2324 = vmatpush.bf16.msra.mxu2 %v4415_v32  ;;  %v4740_v32 = vld [vmem:[#allocation5 + $0xb40] sm:$0xf0] }
 0x30a   :  { %2325 = vmatpush.bf16.msra.mxu2 %v4407_v50  ;;  %v5342_v50 = vld [vmem:[#allocation5 + $0x31c] sm:$0xf0] }
 0x361   :  { %v1791_v40 = vpop.f32.mrf.mxu0 }
 0x362   :  { %v1792_v47 = vadd.f32 %v1791_v40, %v1618_v52  ;;  %v4474_v40 = vld [vmem:[#allocation5 + $0x790] sm:$0xf]  ;;  %v5314_v52 = vld [vmem:[#allocation5 + $0x794] sm:$0xf] }
 0x363   :  { %v4475_v53 = vor.u32 %v5315_v51, %v4474_v40  ;;  %v4479_v55 = vor.u32 %v5314_v52, %v4476_v54  ;;  %v1874_v40 = vperm.slane %v5651_v33, 0  ;;  %v5340_v51 = vld [vmem:[#allocation5 + $0x2bc] sm:$0xf]  ;;  %v4580_v52 = vld [vmem:[#allocation5 + $0x320] sm:$0xf0]  ;;  %v4727_v54 = vor.u32 %v5376_v41, %v4724_v43 }
 0x364   :  { %v4652_v43 = vld [vmem:[#allocation5 + $0x668] sm:$0xf0] }
 0x365   :  { %2337 = vmatpush.bf16.msra.mxu3 %v4479_v55  ;;  %v4706_v55 = vld [vmem:[#allocation5 + $0x938] sm:$0xf] }
 0x367   :  { %v1804_v49 = vpop.f32.mrf.mxu1  ;;  %v1817_v38 = vpop.f32.mrf.mxu2 }
 0x368   :  { %v1805_v59 = vadd.f32 %v1804_v49, %v1792_v47  ;;  %v1818_v0 = vadd.f32 %v1817_v38, %v1619_v60  ;;  %v4467_v47 = vor.u32 %v5313_v42, %v4466_v56  ;;  %v4471_v49 = vor.u32 %v5312_v57, %v4468_v58  ;;  %v4642_v38 = vld [vmem:[#allocation5 + $0x5f8] sm:$0xf]  ;;  %v5356_v60 = vld [vmem:[#allocation5 + $0x5fc] sm:$0xf]  ;;  %v5374_v42 = vld [vmem:[#allocation5 + $0x99c] sm:$0xf0] }
 0x369   :  { %v1793_v61 = vpop.f32.mrf.mxu0  ;;  %v4579_v56 = vor.u32 %v5342_v50, %v4578_v48  ;;  %v5372_v57 = vld [vmem:[#allocation5 + $0x93c] sm:$0xf]  ;;  %v4583_v58 = vor.u32 %v5340_v51, %v4580_v52  ;;  %v4676_v51 = vld [vmem:[#allocation5 + $0x800] sm:$0xf0] }
 0x36a   :  { %v1834_v62 = vmax.f32 %v1805_v59, 0.0  ;;  %2338 = vmatpush.bf16.msra.mxu3 %v4471_v49  ;;  %v5358_v59 = vld [vmem:[#allocation5 + $0x65c] sm:$0xf0]  ;;  %v4562_v49 = vld [vmem:[#allocation5 + $0x1e8] sm:$0xf] }
 0x36b   :  { %v4643_v61 = vor.u32 %v5358_v59, %v4642_v38  ;;  %v5338_v38 = vld [vmem:[#allocation5 + $0x24c] sm:$0xf0] }
 0x36c   :  { %v5642_v63 = vadd.f32 %v1834_v62, %v5632_v17  ;;  %v4498_v17 = vld [vmem:[#allocation5 + $0xa00] sm:$0xf]  ;;  %v4644_v62 = vld [vmem:[#allocation5 + $0x660] sm:$0xf0] }
 0x36d   :  { %v1830_v1 = vpop.f32.mrf.mxu3  ;;  %v4499_v12 = vor.u32 %v5321_v10, %v4498_v17  ;;  %v4772_v17 = vld [vmem:[#allocation5 + $0xce0] sm:$0xf0] }
 0x36e   :  { %v1838_v2 = vpack.c.bf16 %v5642_v63, %v5642_v63  ;;  %v1831_v3 = vadd.f32 %v1830_v1, %v1818_v0  ;;  %v4626_v0 = vld [vmem:[#allocation5 + $0x528] sm:$0xf]  ;;  %v5354_v1 = vld [vmem:[#allocation5 + $0x58c] sm:$0xf0] }
 0x36f   :  { %v1806_v4 = vpop.f32.mrf.mxu1  ;;  %v1819_v5 = vpop.f32.mrf.mxu2  ;;  %2308 = vmatpush.bf16.msra.mxu1 %v4499_v12 }
 0x370   :  { %v1835_v6 = vmax.f32 %v1831_v3, 0.0  ;;  %2046 = vmatmul.bf16.vlgmr.msrb.gmra.mxu0 %v1838_v2  ;;  %2072 = vmatmul.bf16.vlgmr.msrb.gmra.mxu2 %v1838_v2  ;;  %v4647_v2 = vor.u32 %v5356_v60, %v4644_v62  ;;  %v5352_v3 = vld [vmem:[#allocation5 + $0x52c] sm:$0xf]  ;;  %v4628_v4 = vld [vmem:[#allocation5 + $0x590] sm:$0xf0] }
 0x371   :  { %v4770_v5 = vld [vmem:[#allocation5 + $0xc78] sm:$0xf]  ;;  %2744 = vmatpush.bf16.msrb.mxu0 %v4643_v61  ;;  %v4631_v10 = vor.u32 %v5352_v3, %v4628_v4  ;;  %v5336_v60 = vld [vmem:[#allocation5 + $0x1ec] sm:$0xf]  ;;  %v4564_v61 = vld [vmem:[#allocation5 + $0x250] sm:$0xf0] }
 0x372   :  { %v5647_v7 = vadd.f32 %v1835_v6, %v5637_v25  ;;  %v4490_v25 = vld [vmem:[#allocation5 + $0x930] sm:$0xf]  ;;  %v4627_v6 = vor.u32 %v5354_v1, %v4626_v0  ;;  %2770 = vmatpush.bf16.msrb.mxu2 %v4647_v2  ;;  %v1875_v0 = vperm.slane %v5651_v33, 1  ;;  %v4707_v2 = vor.u32 %v5374_v42, %v4706_v55  ;;  %v4690_v4 = vld [vmem:[#allocation5 + $0x868] sm:$0xf] }
 0x373   :  { %v4491_v23 = vor.u32 %v5319_v21, %v4490_v25  ;;  %v5384_v25 = vld [vmem:[#allocation5 + $0xbac] sm:$0xf]  ;;  %v4756_v21 = vld [vmem:[#allocation5 + $0xc10] sm:$0xf0]  ;;  %v4535_v33 = vor.u32 %v5328_v36, %v4532_v28  ;;  %v4636_v42 = vld [vmem:[#allocation5 + $0x598] sm:$0xf0] }
 0x374   :  { %v1839_v8 = vpack.c.bf16 %v5647_v7, %v5647_v7  ;;  %v5353_v55 = vld [vmem:[#allocation5 + $0x534] sm:$0xf]  ;;  %v4586_v28 = vld [vmem:[#allocation5 + $0x2c0] sm:$0xf] }
 0x375   :  { %v1832_v9 = vpop.f32.mrf.mxu3  ;;  %2309 = vmatpush.bf16.msra.mxu1 %v4491_v23  ;;  %2745 = vmatpush.bf16.msrb.mxu0 %v4627_v6  ;;  %v4759_v23 = vor.u32 %v5384_v25, %v4756_v21  ;;  %v4563_v6 = vor.u32 %v5338_v38, %v4562_v49  ;;  %v5360_v38 = vld [vmem:[#allocation5 + $0x6cc] sm:$0xf] }
 0x376   :  { %2059 = vmatmul.bf16.vlgmr.msrb.gmra.mxu1 %v1839_v8  ;;  %2085 = vmatmul.bf16.vlgmr.msrb.gmra.mxu3 %v1839_v8  ;;  %v5390_v8 = vld [vmem:[#allocation5 + $0xcdc] sm:$0xf0]  ;;  %v5388_v9 = vld [vmem:[#allocation5 + $0xc7c] sm:$0xf] }
 0x377   :  { %v4771_v11 = vor.u32 %v5390_v8, %v4770_v5  ;;  %v4775_v12 = vor.u32 %v5388_v9, %v4772_v17  ;;  %2771 = vmatpush.bf16.msrb.mxu2 %v4631_v10  ;;  %v5370_v8 = vld [vmem:[#allocation5 + $0x8cc] sm:$0xf0]  ;;  %v5368_v9 = vld [vmem:[#allocation5 + $0x86c] sm:$0xf]  ;;  %v4692_v17 = vld [vmem:[#allocation5 + $0x8d0] sm:$0xf0] }
 0x378   :  { %v4691_v18 = vor.u32 %v5370_v8, %v4690_v4  ;;  %v4695_v19 = vor.u32 %v5368_v9, %v4692_v17  ;;  %v4618_v4 = vld [vmem:[#allocation5 + $0x460] sm:$0xf]  ;;  %v5349_v8 = vld [vmem:[#allocation5 + $0x464] sm:$0xf]  ;;  %v4620_v9 = vld [vmem:[#allocation5 + $0x4c8] sm:$0xf0] }
 0x379   :  { %2310 = vmatpush.bf16.msra.mxu1 %v4483_v35  ;;  %2783 = vmatpush.bf16.msrb.mxu3 %v4775_v12  ;;  %v4743_v35 = vor.u32 %v5380_v29, %v4740_v32  ;;  %v4546_v12 = vld [vmem:[#allocation5 + $0x118] sm:$0xf]  ;;  %v4623_v17 = vor.u32 %v5349_v8, %v4620_v9  ;;  %v4682_v8 = vld [vmem:[#allocation5 + $0x7a0] sm:$0xf]  ;;  %v5367_v9 = vld [vmem:[#allocation5 + $0x804] sm:$0xf0] }
 0x37a   :  { %2746 = vmatpush.bf16.msrb.mxu0 %v4611_v22  ;;  %v4547_v21 = vor.u32 %v5334_v13, %v4546_v12  ;;  %v5385_v12 = vld [vmem:[#allocation5 + $0xbb4] sm:$0xf] }
 0x37b   :  { %2772 = vmatpush.bf16.msrb.mxu2 %v4615_v27  ;;  %v5330_v27 = vld [vmem:[#allocation5 + $0xac] sm:$0xf0] }
 0x37c   :  { %v4531_v32 = vor.u32 %v5330_v27, %v4530_v24  ;;  %v5381_v24 = vld [vmem:[#allocation5 + $0xae4] sm:$0xf]  ;;  %v4748_v27 = vld [vmem:[#allocation5 + $0xb48] sm:$0xf0] }
 0x37d   :  { %2311 = vmatpush.bf16.msra.mxu1 %v4475_v53  ;;  %2784 = vmatpush.bf16.msrb.mxu3 %v4759_v23  ;;  %v4723_v53 = vor.u32 %v5378_v46, %v4722_v37  ;;  %v4551_v23 = vor.u32 %v5332_v15, %v4548_v16  ;;  %v4650_v37 = vld [vmem:[#allocation5 + $0x600] sm:$0xf]  ;;  %v5357_v46 = vld [vmem:[#allocation5 + $0x604] sm:$0xf]  ;;  %v4602_v16 = vld [vmem:[#allocation5 + $0x390] sm:$0xf]  ;;  %v4751_v36 = vor.u32 %v5381_v24, %v4748_v27 }
 0x37e   :  { %2747 = vmatpush.bf16.msrb.mxu0 %v4595_v39  ;;  %v5359_v39 = vld [vmem:[#allocation5 + $0x664] sm:$0xf0]  ;;  %v4655_v48 = vor.u32 %v5357_v46, %v4652_v43  ;;  %v4732_v46 = vld [vmem:[#allocation5 + $0xa78] sm:$0xf0]  ;;  %v4570_v43 = vld [vmem:[#allocation5 + $0x1f0] sm:$0xf] }
 0x37f   :  { %2773 = vmatpush.bf16.msrb.mxu2 %v4599_v45  ;;  %v4651_v41 = vor.u32 %v5359_v39, %v4650_v37  ;;  %v5366_v45 = vld [vmem:[#allocation5 + $0x7fc] sm:$0xf0]  ;;  %v5377_v37 = vld [vmem:[#allocation5 + $0xa14] sm:$0xf] }
 0x381   :  { %2312 = vmatpush.bf16.msra.mxu1 %v4467_v47  ;;  %2785 = vmatpush.bf16.msrb.mxu3 %v4743_v35  ;;  %v4708_v47 = vld [vmem:[#allocation5 + $0x9a0] sm:$0xf0] }
 0x382   :  { %v4711_v3 = vor.u32 %v5372_v57, %v4708_v47  ;;  %2748 = vmatpush.bf16.msrb.mxu0 %v4579_v56  ;;  %v4658_v57 = vld [vmem:[#allocation5 + $0x6c8] sm:$0xf]  ;;  %v5362_v47 = vld [vmem:[#allocation5 + $0x72c] sm:$0xf0] }
 0x383   :  { %2774 = vmatpush.bf16.msrb.mxu2 %v4583_v58  ;;  %v4639_v58 = vor.u32 %v5353_v55, %v4636_v42  ;;  %v4659_v49 = vor.u32 %v5362_v47, %v4658_v57  ;;  %v4716_v55 = vld [vmem:[#allocation5 + $0x9a8] sm:$0xf0]  ;;  %v5335_v42 = vld [vmem:[#allocation5 + $0x184] sm:$0xf0] }
 0x385   :  { %2757 = vmatpush.bf16.msrb.mxu1 %v4771_v11  ;;  %2786 = vmatpush.bf16.msrb.mxu3 %v4727_v54  ;;  %v4567_v11 = vor.u32 %v5336_v60, %v4564_v61  ;;  %v5355_v54 = vld [vmem:[#allocation5 + $0x594] sm:$0xf0]  ;;  %v4778_v61 = vld [vmem:[#allocation5 + $0xc80] sm:$0xf] }
 0x386   :  { %2749 = vmatpush.bf16.msrb.mxu0 %v4563_v6 }
 0x387   :  { %2775 = vmatpush.bf16.msrb.mxu2 %v4567_v11  ;;  %v5387_v11 = vld [vmem:[#allocation5 + $0xc14] sm:$0xf0] }
 0x389   :  { %2758 = vmatpush.bf16.msrb.mxu1 %v4755_v20  ;;  %2787 = vmatpush.bf16.msrb.mxu3 %v4711_v3 }
 0x38a   :  { %2750 = vmatpush.bf16.msrb.mxu0 %v4547_v21 }
 0x38b   :  { %2776 = vmatpush.bf16.msrb.mxu2 %v4551_v23  ;;  %v5383_v23 = vld [vmem:[#allocation5 + $0xb44] sm:$0xf0] }
 0x38d   :  { %2759 = vmatpush.bf16.msrb.mxu1 %v4739_v34  ;;  %2788 = vmatpush.bf16.msrb.mxu3 %v4695_v19  ;;  %v5345_v19 = vld [vmem:[#allocation5 + $0x394] sm:$0xf] }
 0x38e   :  { %2751 = vmatpush.bf16.msrb.mxu0 %v4531_v32  ;;  %v4588_v32 = vld [vmem:[#allocation5 + $0x328] sm:$0xf0] }
 0x38f   :  { %2777 = vmatpush.bf16.msrb.mxu2 %v4535_v33 }
 0x391   :  { %2760 = vmatpush.bf16.msrb.mxu1 %v4723_v53  ;;  %v4634_v53 = vld [vmem:[#allocation5 + $0x530] sm:$0xf] }
 0x392   :  { %v4635_v56 = vor.u32 %v5355_v54, %v4634_v53  ;;  %v5373_v53 = vld [vmem:[#allocation5 + $0x944] sm:$0xf] }
 0x393   :  { %v4719_v57 = vor.u32 %v5373_v53, %v4716_v55  ;;  %v5423_v53 = vld [vmem:[#allocation5 + $0xcec] sm:$0xf0]  ;;  %v4908_v55 = vld [vmem:[#allocation5 + $0xcf0] sm:$0xf0] }
 0x395   :  { %2761 = vmatpush.bf16.msrb.mxu1 %v4707_v2  ;;  %v4780_v2 = vld [vmem:[#allocation5 + $0xce8] sm:$0xf0] }
 0x399   :  { %2762 = vmatpush.bf16.msrb.mxu1 %v4691_v18  ;;  %v5347_v18 = vld [vmem:[#allocation5 + $0x3f4] sm:$0xf0] }
 0x3ed   :  { %v2047_v44 = vpop.f32.mrf.mxu0 }
 0x3ee   :  { %v2048_v59 = vadd.f32 %v2047_v44, %v1874_v40  ;;  %v4674_v44 = vld [vmem:[#allocation5 + $0x798] sm:$0xf]  ;;  %v5364_v40 = vld [vmem:[#allocation5 + $0x79c] sm:$0xf] }
 0x3ef   :  { %v4675_v50 = vor.u32 %v5366_v45, %v4674_v44  ;;  %v4679_v52 = vor.u32 %v5364_v40, %v4676_v51  ;;  %v5339_v44 = vld [vmem:[#allocation5 + $0x254] sm:$0xf0]  ;;  %v5337_v45 = vld [vmem:[#allocation5 + $0x1f4] sm:$0xf]  ;;  %v4714_v51 = vld [vmem:[#allocation5 + $0x940] sm:$0xf] }
 0x3f1   :  { %2763 = vmatpush.bf16.msrb.mxu1 %v4675_v50  ;;  %2789 = vmatpush.bf16.msrb.mxu3 %v4679_v52  ;;  %v4572_v50 = vld [vmem:[#allocation5 + $0x258] sm:$0xf0]  ;;  %v5375_v52 = vld [vmem:[#allocation5 + $0x9a4] sm:$0xf0] }
 0x3f2   :  { %v4575_v40 = vor.u32 %v5337_v45, %v4572_v50  ;;  %v4715_v54 = vor.u32 %v5375_v52, %v4714_v51  ;;  %v5405_v45 = vld [vmem:[#allocation5 + $0x59c] sm:$0xf0]  ;;  %v4836_v50 = vld [vmem:[#allocation5 + $0x5a0] sm:$0xf0]  ;;  %v4906_v52 = vld [vmem:[#allocation5 + $0xc88] sm:$0xf] }
 0x3f3   :  { %v2060_v62 = vpop.f32.mrf.mxu1  ;;  %v2073_v1 = vpop.f32.mrf.mxu2 }
 0x3f4   :  { %v2061_v5 = vadd.f32 %v2060_v62, %v2048_v59  ;;  %v2074_v25 = vadd.f32 %v2073_v1, %v1875_v0  ;;  %v4660_v59 = vld [vmem:[#allocation5 + $0x730] sm:$0xf0]  ;;  %v5391_v62 = vld [vmem:[#allocation5 + $0xce4] sm:$0xf0]  ;;  %v5389_v0 = vld [vmem:[#allocation5 + $0xc84] sm:$0xf] }
 0x3f5   :  { %v2049_v10 = vpop.f32.mrf.mxu0  ;;  %v4663_v60 = vor.u32 %v5360_v38, %v4660_v59  ;;  %v4779_v1 = vor.u32 %v5391_v62, %v4778_v61  ;;  %2764 = vmatpush.bf16.msrb.mxu1 %v4659_v49  ;;  %v4783_v3 = vor.u32 %v5389_v0, %v4780_v2  ;;  %v4556_v49 = vld [vmem:[#allocation5 + $0x188] sm:$0xf0]  ;;  %v4698_v38 = vld [vmem:[#allocation5 + $0x870] sm:$0xf]  ;;  %v5369_v61 = vld [vmem:[#allocation5 + $0x874] sm:$0xf] }
 0x3f6   :  { %v2090_v14 = vmax.f32 %v2061_v5, 0.0  ;;  %v5351_v5 = vld [vmem:[#allocation5 + $0x4c4] sm:$0xf0]  ;;  %v4762_v10 = vld [vmem:[#allocation5 + $0xbb0] sm:$0xf] }
 0x3f7   :  { %2790 = vmatpush.bf16.msrb.mxu3 %v4663_v60  ;;  %v4619_v6 = vor.u32 %v5351_v5, %v4618_v4  ;;  %v4763_v13 = vor.u32 %v5387_v11, %v4762_v10  ;;  %v5371_v60 = vld [vmem:[#allocation5 + $0x8d4] sm:$0xf0]  ;;  %v4700_v62 = vld [vmem:[#allocation5 + $0x8d8] sm:$0xf0]  ;;  %v4538_v2 = vld [vmem:[#allocation5 + $0x50] sm:$0xf] }
 0x3f8   :  { %v2092_v20 = vpack.c.bf16 %v2090_v14, %v2090_v14  ;;  %v4764_v14 = vld [vmem:[#allocation5 + $0xc18] sm:$0xf0]  ;;  %v4699_v0 = vor.u32 %v5371_v60, %v4698_v38  ;;  %v5329_v4 = vld [vmem:[#allocation5 + $0x54] sm:$0xf]  ;;  %v5365_v10 = vld [vmem:[#allocation5 + $0x7a4] sm:$0xf] }
 0x3f9   :  { %v2086_v22 = vpop.f32.mrf.mxu3  ;;  %v4767_v15 = vor.u32 %v5385_v12, %v4764_v14  ;;  %v4684_v11 = vld [vmem:[#allocation5 + $0x808] sm:$0xf0]  ;;  %v4683_v12 = vor.u32 %v5367_v9, %v4682_v8  ;;  %v2126_v14 = vld [vmem:[#allocation7 + $0x10] sm:$0x3]  ;;  %v4828_v38 = vld [vmem:[#allocation5 + $0x4d0] sm:$0xf0] }
 0x3fa   :  { %v2087_v26 = vadd.f32 %v2086_v22, %v2074_v25  ;;  %2300 = vmatmul.bf16.vlgmr.msra.gmra.mxu0 %v2092_v20  ;;  %2326 = vmatmul.bf16.vlgmr.msra.gmra.mxu2 %v2092_v20  ;;  %v4603_v20 = vor.u32 %v5347_v18, %v4602_v16  ;;  %v4604_v25 = vld [vmem:[#allocation5 + $0x3f8] sm:$0xf0]  ;;  %v4746_v22 = vld [vmem:[#allocation5 + $0xae0] sm:$0xf]  ;;  %v5363_v16 = vld [vmem:[#allocation5 + $0x734] sm:$0xf0] }
 0x3fb   :  { %v2062_v29 = vpop.f32.mrf.mxu1  ;;  %v2075_v30 = vpop.f32.mrf.mxu2  ;;  %2796 = vmatpush.bf16.msra.mxu0 %v4651_v41  ;;  %2822 = vmatpush.bf16.msra.mxu2 %v4655_v48  ;;  %v4607_v21 = vor.u32 %v5345_v19, %v4604_v25  ;;  %v4735_v41 = vor.u32 %v5377_v37, %v4732_v46  ;;  %v4571_v48 = vor.u32 %v5339_v44, %v4570_v43  ;;  %v5361_v18 = vld [vmem:[#allocation5 + $0x6d4] sm:$0xf]  ;;  %v4668_v25 = vld [vmem:[#allocation5 + $0x738] sm:$0xf0]  ;;  %v5401_v8 = vld [vmem:[#allocation5 + $0x3fc] sm:$0xf0] }
 0x3fc   :  { %v2091_v31 = vmax.f32 %v2087_v26, 0.0  ;;  %v4747_v26 = vor.u32 %v5383_v23, %v4746_v22  ;;  %v5343_v29 = vld [vmem:[#allocation5 + $0x324] sm:$0xf0]  ;;  %v5341_v30 = vld [vmem:[#allocation5 + $0x2c4] sm:$0xf]  ;;  %v4671_v22 = vor.u32 %v5361_v18, %v4668_v25 }
 0x3fd   :  { %v4591_v33 = vor.u32 %v5341_v30, %v4588_v32  ;;  %v5407_v30 = vld [vmem:[#allocation5 + $0x66c] sm:$0xf0]  ;;  %v5406_v32 = vld [vmem:[#allocation5 + $0x60c] sm:$0xf]  ;;  %v4820_v9 = vld [vmem:[#allocation5 + $0x400] sm:$0xf0] }
 0x3fe   :  { %v2093_v34 = vpack.c.bf16 %v2091_v31, %v2091_v31  ;;  %v4587_v31 = vor.u32 %v5343_v29, %v4586_v28  ;;  %v4842_v29 = vld [vmem:[#allocation5 + $0x608] sm:$0xf]  ;;  %v4812_v25 = vld [vmem:[#allocation5 + $0x330] sm:$0xf0] }
 0x3ff   :  { %2797 = vmatpush.bf16.msra.mxu0 %v4635_v56  ;;  %2823 = vmatpush.bf16.msra.mxu2 %v4639_v58  ;;  %v4554_v56 = vld [vmem:[#allocation5 + $0x120] sm:$0xf]  ;;  %v5333_v58 = vld [vmem:[#allocation5 + $0x124] sm:$0xf]  ;;  %v4810_v18 = vld [vmem:[#allocation5 + $0x2c8] sm:$0xf] }
 0x400   :  { %2313 = vmatmul.bf16.vlgmr.msra.gmra.mxu1 %v2093_v34  ;;  %2339 = vmatmul.bf16.vlgmr.msra.gmra.mxu3 %v2093_v34  ;;  %v4730_v34 = vld [vmem:[#allocation5 + $0xa10] sm:$0xf]  ;;  %v4555_v47 = vor.u32 %v5335_v42, %v4554_v56  ;;  %v4559_v59 = vor.u32 %v5333_v58, %v4556_v49  ;;  %v5402_v49 = vld [vmem:[#allocation5 + $0x46c] sm:$0xf] }
 0x401   :  { %v2088_v35 = vpop.f32.mrf.mxu3  ;;  %2809 = vmatpush.bf16.msra.mxu1 %v4779_v1  ;;  %2835 = vmatpush.bf16.msra.mxu3 %v4783_v3  ;;  %v4703_v1 = vor.u32 %v5369_v61, %v4700_v62  ;;  %v5331_v3 = vld [vmem:[#allocation5 + $0xb4] sm:$0xf0]  ;;  %v5403_v58 = vld [vmem:[#allocation5 + $0x4cc] sm:$0xf0] }
 0x402   :  { %v5379_v35 = vld [vmem:[#allocation5 + $0xa74] sm:$0xf0]  ;;  %v4539_v5 = vor.u32 %v5331_v3, %v4538_v2  ;;  %v4900_v2 = vld [vmem:[#allocation5 + $0xc20] sm:$0xf0] }
 0x403   :  { %2798 = vmatpush.bf16.msra.mxu0 %v4619_v6  ;;  %2824 = vmatpush.bf16.msra.mxu2 %v4623_v17  ;;  %v4731_v39 = vor.u32 %v5379_v35, %v4730_v34  ;;  %v4540_v6 = vld [vmem:[#allocation5 + $0xb8] sm:$0xf0]  ;;  %v4898_v61 = vld [vmem:[#allocation5 + $0xbb8] sm:$0xf] }
 0x404   :  { %v4543_v17 = vor.u32 %v5329_v4, %v4540_v6  ;;  %v4818_v6 = vld [vmem:[#allocation5 + $0x398] sm:$0xf] }
 0x405   :  { %2810 = vmatpush.bf16.msra.mxu1 %v4763_v13  ;;  %2836 = vmatpush.bf16.msra.mxu3 %v4767_v15  ;;  %v4687_v13 = vor.u32 %v5365_v10, %v4684_v11  ;;  %v4666_v15 = vld [vmem:[#allocation5 + $0x6d0] sm:$0xf]  ;;  %v4890_v11 = vld [vmem:[#allocation5 + $0xae8] sm:$0xf] }
 0x407   :  { %2799 = vmatpush.bf16.msra.mxu0 %v4603_v20  ;;  %2825 = vmatpush.bf16.msra.mxu2 %v4607_v21  ;;  %v4667_v20 = vor.u32 %v5363_v16, %v4666_v15  ;;  %v2128_v21 = vperm.slane %v2126_v14, 0  ;;  %v4819_v15 = vor.u32 %v5401_v8, %v4818_v6  ;;  %v5408_v6 = vld [vmem:[#allocation5 + $0x6dc] sm:$0xf] }
 0x409   :  { %2811 = vmatpush.bf16.msra.mxu1 %v4747_v26  ;;  %2837 = vmatpush.bf16.msra.mxu3 %v4751_v36  ;;  %v2129_v36 = vperm.slane %v2126_v14, 1  ;;  %v4892_v14 = vld [vmem:[#allocation5 + $0xb50] sm:$0xf0] }
 0x40b   :  { %2800 = vmatpush.bf16.msra.mxu0 %v4587_v31  ;;  %2826 = vmatpush.bf16.msra.mxu2 %v4591_v33  ;;  %v4844_v33 = vld [vmem:[#allocation5 + $0x670] sm:$0xf0] }
 0x40c   :  { %v4847_v46 = vor.u32 %v5406_v32, %v4844_v33  ;;  %v5397_v32 = vld [vmem:[#allocation5 + $0x25c] sm:$0xf0]  ;;  %v5396_v33 = vld [vmem:[#allocation5 + $0x1fc] sm:$0xf] }
 0x40d   :  { %2812 = vmatpush.bf16.msra.mxu1 %v4731_v39  ;;  %2838 = vmatpush.bf16.msra.mxu3 %v4735_v41  ;;  %v4843_v39 = vor.u32 %v5407_v30, %v4842_v29  ;;  %v4834_v41 = vld [vmem:[#allocation5 + $0x538] sm:$0xf]  ;;  %v4884_v29 = vld [vmem:[#allocation5 + $0xa80] sm:$0xf0] }
 0x40e   :  { %v4835_v56 = vor.u32 %v5405_v45, %v4834_v41 }
 0x40f   :  { %2801 = vmatpush.bf16.msra.mxu0 %v4571_v48  ;;  %2827 = vmatpush.bf16.msra.mxu2 %v4575_v40  ;;  %v5404_v48 = vld [vmem:[#allocation5 + $0x53c] sm:$0xf] }
 0x410   :  { %v4839_v42 = vor.u32 %v5404_v48, %v4836_v50  ;;  %v4794_v48 = vld [vmem:[#allocation5 + $0x128] sm:$0xf]  ;;  %v5395_v50 = vld [vmem:[#allocation5 + $0x18c] sm:$0xf0] }
 0x411   :  { %2813 = vmatpush.bf16.msra.mxu1 %v4715_v54  ;;  %2839 = vmatpush.bf16.msra.mxu3 %v4719_v57  ;;  %v4826_v57 = vld [vmem:[#allocation5 + $0x468] sm:$0xf] }
 0x412   :  { %v4827_v4 = vor.u32 %v5403_v58, %v4826_v57  ;;  %v5393_v58 = vld [vmem:[#allocation5 + $0xbc] sm:$0xf0] }
 0x413   :  { %2802 = vmatpush.bf16.msra.mxu0 %v4555_v47  ;;  %2828 = vmatpush.bf16.msra.mxu2 %v4559_v59  ;;  %v4907_v59 = vor.u32 %v5423_v53, %v4906_v52  ;;  %v4796_v52 = vld [vmem:[#allocation5 + $0x190] sm:$0xf0] }
 0x415   :  { %2814 = vmatpush.bf16.msra.mxu1 %v4699_v0  ;;  %2840 = vmatpush.bf16.msra.mxu3 %v4703_v1  ;;  %v5421_v0 = vld [vmem:[#allocation5 + $0xc1c] sm:$0xf0]  ;;  %v5420_v1 = vld [vmem:[#allocation5 + $0xbbc] sm:$0xf] }
 0x416   :  { %v4903_v10 = vor.u32 %v5420_v1, %v4900_v2  ;;  %v4860_v2 = vld [vmem:[#allocation5 + $0x810] sm:$0xf0] }
 0x417   :  { %2803 = vmatpush.bf16.msra.mxu0 %v4539_v5  ;;  %2829 = vmatpush.bf16.msra.mxu2 %v4543_v17  ;;  %v4831_v5 = vor.u32 %v5402_v49, %v4828_v38  ;;  %v4899_v17 = vor.u32 %v5421_v0, %v4898_v61  ;;  %v5392_v49 = vld [vmem:[#allocation5 + $0x5c] sm:$0xf]  ;;  %v4858_v61 = vld [vmem:[#allocation5 + $0x7a8] sm:$0xf]  ;;  %v5410_v0 = vld [vmem:[#allocation5 + $0x7ac] sm:$0xf] }
 0x419   :  { %2815 = vmatpush.bf16.msra.mxu1 %v4683_v12  ;;  %2841 = vmatpush.bf16.msra.mxu3 %v4687_v13  ;;  %v5419_v12 = vld [vmem:[#allocation5 + $0xb4c] sm:$0xf0]  ;;  %v5418_v13 = vld [vmem:[#allocation5 + $0xaec] sm:$0xf] }
 0x41d   :  { %2816 = vmatpush.bf16.msra.mxu1 %v4667_v20  ;;  %2842 = vmatpush.bf16.msra.mxu3 %v4671_v22  ;;  %v5398_v20 = vld [vmem:[#allocation5 + $0x2cc] sm:$0xf]  ;;  %v4895_v22 = vor.u32 %v5418_v13, %v4892_v14  ;;  %v4970_v13 = vld [vmem:[#allocation5 + $0x610] sm:$0xf]  ;;  %v5439_v14 = vld [vmem:[#allocation5 + $0x674] sm:$0xf0] }
 0x477   :  { %v2301_v19 = vpop.f32.mrf.mxu0 }
 0x478   :  { %v2302_v23 = vadd.f32 %v2301_v19, %v2128_v21  ;;  %v5399_v19 = vld [vmem:[#allocation5 + $0x32c] sm:$0xf0]  ;;  %v4891_v21 = vor.u32 %v5419_v12, %v4890_v11 }
 0x47d   :  { %v2314_v24 = vpop.f32.mrf.mxu1  ;;  %v2327_v26 = vpop.f32.mrf.mxu2 }
 0x47e   :  { %v2315_v27 = vadd.f32 %v2314_v24, %v2302_v23  ;;  %v2328_v35 = vadd.f32 %v2327_v26, %v2129_v36  ;;  %v4811_v23 = vor.u32 %v5399_v19, %v4810_v18  ;;  %v4815_v24 = vor.u32 %v5398_v20, %v4812_v25  ;;  %v4882_v26 = vld [vmem:[#allocation5 + $0xa18] sm:$0xf]  ;;  %v5416_v36 = vld [vmem:[#allocation5 + $0xa1c] sm:$0xf]  ;;  %v4962_v20 = vld [vmem:[#allocation5 + $0x540] sm:$0xf] }
 0x47f   :  { %v2303_v28 = vpop.f32.mrf.mxu0  ;;  %v4887_v30 = vor.u32 %v5416_v36, %v4884_v29  ;;  %v4971_v18 = vor.u32 %v5439_v14, %v4970_v13  ;;  %v4972_v19 = vld [vmem:[#allocation5 + $0x678] sm:$0xf0]  ;;  %v5437_v25 = vld [vmem:[#allocation5 + $0x5a4] sm:$0xf0]  ;;  %v5455_v29 = vld [vmem:[#allocation5 + $0xcf4] sm:$0xf0] }
 0x480   :  { %v2344_v31 = vmax.f32 %v2315_v27, 0.0  ;;  %v5417_v27 = vld [vmem:[#allocation5 + $0xa7c] sm:$0xf0] }
 0x481   :  { %v4883_v28 = vor.u32 %v5417_v27, %v4882_v26  ;;  %v4964_v26 = vld [vmem:[#allocation5 + $0x5a8] sm:$0xf0]  ;;  %v5034_v27 = vld [vmem:[#allocation5 + $0xc90] sm:$0xf] }
 0x482   :  { %v2346_v34 = vadd.f32 %v2344_v31, %v5642_v63  ;;  %v5422_v63 = vld [vmem:[#allocation5 + $0xc8c] sm:$0xf]  ;;  %v4802_v31 = vld [vmem:[#allocation5 + $0x1f8] sm:$0xf] }
 0x483   :  { %v2340_v37 = vpop.f32.mrf.mxu3  ;;  %v4911_v60 = vor.u32 %v5422_v63, %v4908_v55  ;;  %v5413_v63 = vld [vmem:[#allocation5 + $0x8dc] sm:$0xf0] }
 0x484   :  { %v5656_v43 = vpack.c.bf16 %v2346_v34, %v2346_v34  ;;  %v2341_v44 = vadd.f32 %v2340_v37, %v2328_v35  ;;  %v4803_v34 = vor.u32 %v5397_v32, %v4802_v31  ;;  %v4804_v35 = vld [vmem:[#allocation5 + $0x260] sm:$0xf0]  ;;  %v4874_v37 = vld [vmem:[#allocation5 + $0x948] sm:$0xf]  ;;  %v5036_v31 = vld [vmem:[#allocation5 + $0xcf8] sm:$0xf0] }
 0x485   :  { %v2316_v40 = vpop.f32.mrf.mxu1  ;;  %v2329_v51 = vpop.f32.mrf.mxu2 }
 0x486   :  { %v2345_v54 = vmax.f32 %v2341_v44, 0.0  ;;  %2752 = vmatmul.bf16.vlgmr.msrb.gmra.mxu0 %v5656_v43  ;;  %2778 = vmatmul.bf16.vlgmr.msrb.gmra.mxu2 %v5656_v43  ;;  %v4876_v44 = vld [vmem:[#allocation5 + $0x9b0] sm:$0xf0]  ;;  %v5394_v40 = vld [vmem:[#allocation5 + $0x12c] sm:$0xf]  ;;  %v4795_v51 = vor.u32 %v5395_v50, %v4794_v48 }
 0x487   :  { %3050 = vmatpush.bf16.msrb.mxu0 %v4843_v39  ;;  %3076 = vmatpush.bf16.msrb.mxu2 %v4847_v46  ;;  %v5415_v39 = vld [vmem:[#allocation5 + $0x9ac] sm:$0xf0]  ;;  %v4807_v46 = vor.u32 %v5396_v33, %v4804_v35  ;;  %v4799_v53 = vor.u32 %v5394_v40, %v4796_v52  ;;  %v5453_v48 = vld [vmem:[#allocation5 + $0xc24] sm:$0xf0]  ;;  %v5452_v50 = vld [vmem:[#allocation5 + $0xbc4] sm:$0xf] }
 0x488   :  { %v2347_v47 = vadd.f32 %v2345_v54, %v5647_v7  ;;  %v5400_v7 = vld [vmem:[#allocation5 + $0x39c] sm:$0xf]  ;;  %v4875_v41 = vor.u32 %v5415_v39, %v4874_v37  ;;  %v4866_v54 = vld [vmem:[#allocation5 + $0x878] sm:$0xf]  ;;  %v4954_v37 = vld [vmem:[#allocation5 + $0x470] sm:$0xf] }
 0x489   :  { %v4823_v16 = vor.u32 %v5400_v7, %v4820_v9  ;;  %v4867_v55 = vor.u32 %v5413_v63, %v4866_v54  ;;  %v4852_v7 = vld [vmem:[#allocation5 + $0x740] sm:$0xf0]  ;;  %v5435_v39 = vld [vmem:[#allocation5 + $0x4d4] sm:$0xf0]  ;;  %v5028_v40 = vld [vmem:[#allocation5 + $0xc28] sm:$0xf0] }
 0x48a   :  { %v2349_v62 = vpack.c.bf16 %v2347_v47, %v2347_v47  ;;  %v4786_v47 = vld [vmem:[#allocation5 + $0x58] sm:$0xf]  ;;  %v4855_v9 = vor.u32 %v5408_v6, %v4852_v7  ;;  %v4955_v52 = vor.u32 %v5435_v39, %v4954_v37  ;;  %v5031_v54 = vor.u32 %v5452_v50, %v5028_v40  ;;  %v4946_v63 = vld [vmem:[#allocation5 + $0x3a0] sm:$0xf]  ;;  %v4932_v37 = vld [vmem:[#allocation5 + $0x268] sm:$0xf0] }
 0x48b   :  { %v2342_v3 = vpop.f32.mrf.mxu3  ;;  %3051 = vmatpush.bf16.msrb.mxu0 %v4835_v56  ;;  %3077 = vmatpush.bf16.msrb.mxu2 %v4839_v42  ;;  %v5412_v56 = vld [vmem:[#allocation5 + $0x87c] sm:$0xf]  ;;  %v4868_v42 = vld [vmem:[#allocation5 + $0x8e0] sm:$0xf0]  ;;  %v4787_v38 = vor.u32 %v5393_v58, %v4786_v47  ;;  %v5018_v47 = vld [vmem:[#allocation5 + $0xaf0] sm:$0xf] }
 0x48c   :  { %2765 = vmatmul.bf16.vlgmr.msrb.gmra.mxu1 %v2349_v62  ;;  %2791 = vmatmul.bf16.vlgmr.msrb.gmra.mxu3 %v2349_v62  ;;  %v4871_v57 = vor.u32 %v5412_v56, %v4868_v42  ;;  %v4863_v3 = vor.u32 %v5410_v0, %v4860_v2  ;;  %v5451_v58 = vld [vmem:[#allocation5 + $0xb54] sm:$0xf0]  ;;  %v5002_v39 = vld [vmem:[#allocation5 + $0x950] sm:$0xf] }
 0x48d   :  { %3063 = vmatpush.bf16.msrb.mxu1 %v4907_v59  ;;  %3089 = vmatpush.bf16.msrb.mxu3 %v4911_v60  ;;  %v4788_v59 = vld [vmem:[#allocation5 + $0xc0] sm:$0xf0]  ;;  %v5019_v0 = vor.u32 %v5451_v58, %v5018_v47  ;;  %v4922_v50 = vld [vmem:[#allocation5 + $0x130] sm:$0xf]  ;;  %v5427_v40 = vld [vmem:[#allocation5 + $0x194] sm:$0xf0] }
 0x48e   :  { %v4791_v60 = vor.u32 %v5392_v49, %v4788_v59  ;;  %v5450_v59 = vld [vmem:[#allocation5 + $0xaf4] sm:$0xf]  ;;  %v4914_v58 = vld [vmem:[#allocation5 + $0x60] sm:$0xf] }
 0x48f   :  { %3052 = vmatpush.bf16.msrb.mxu0 %v4827_v4  ;;  %3078 = vmatpush.bf16.msrb.mxu2 %v4831_v5  ;;  %v4850_v4 = vld [vmem:[#allocation5 + $0x6d8] sm:$0xf]  ;;  %v5409_v5 = vld [vmem:[#allocation5 + $0x73c] sm:$0xf0] }
 0x490   :  { %v4851_v8 = vor.u32 %v5409_v5, %v4850_v4 }
 0x491   :  { %3064 = vmatpush.bf16.msrb.mxu1 %v4899_v17  ;;  %3090 = vmatpush.bf16.msrb.mxu3 %v4903_v10  ;;  %v5663_v17 = vld [vmem:[#allocation7 + $0x12] sm:$0xf] }
 0x492   :  { %v2416_v11 = vperm.slane %v5663_v17, 0  ;;  %v2417_v12 = vperm.slane %v5663_v17, 1 }
 0x493   :  { %3053 = vmatpush.bf16.msrb.mxu0 %v4819_v15  ;;  %3079 = vmatpush.bf16.msrb.mxu2 %v4823_v16  ;;  %v5438_v15 = vld [vmem:[#allocation5 + $0x614] sm:$0xf] }
 0x495   :  { %3065 = vmatpush.bf16.msrb.mxu1 %v4891_v21  ;;  %3091 = vmatpush.bf16.msrb.mxu3 %v4895_v22 }
 0x496   :  { %2804 = vmatmul.bf16.vlgmr.msra.gmra.mxu0 %v5656_v43  ;;  %2830 = vmatmul.bf16.vlgmr.msra.gmra.mxu2 %v5656_v43  ;;  %v5414_v43 = vld [vmem:[#allocation5 + $0x94c] sm:$0xf] }
 0x497   :  { %3054 = vmatpush.bf16.msrb.mxu0 %v4811_v23  ;;  %3080 = vmatpush.bf16.msrb.mxu2 %v4815_v24  ;;  %v4879_v45 = vor.u32 %v5414_v43, %v4876_v44  ;;  %v4975_v23 = vor.u32 %v5438_v15, %v4972_v19  ;;  %v5436_v24 = vld [vmem:[#allocation5 + $0x544] sm:$0xf]  ;;  %v4956_v43 = vld [vmem:[#allocation5 + $0x4d8] sm:$0xf0]  ;;  %v5026_v44 = vld [vmem:[#allocation5 + $0xbc0] sm:$0xf] }
 0x498   :  { %v4967_v33 = vor.u32 %v5436_v24, %v4964_v26 }
 0x499   :  { %3066 = vmatpush.bf16.msrb.mxu1 %v4883_v28  ;;  %3092 = vmatpush.bf16.msrb.mxu3 %v4887_v30  ;;  %v4963_v28 = vor.u32 %v5437_v25, %v4962_v20  ;;  %v5454_v30 = vld [vmem:[#allocation5 + $0xc94] sm:$0xf]  ;;  %v2419_v20 = vperm.slane %v5663_v17, 3 }
 0x49a   :  { %v5039_v35 = vor.u32 %v5454_v30, %v5036_v31  ;;  %v5012_v31 = vld [vmem:[#allocation5 + $0xa88] sm:$0xf0] }
 0x49b   :  { %3055 = vmatpush.bf16.msrb.mxu0 %v4803_v34  ;;  %3081 = vmatpush.bf16.msrb.mxu2 %v4807_v46  ;;  %v5035_v34 = vor.u32 %v5455_v29, %v5034_v27  ;;  %v5434_v46 = vld [vmem:[#allocation5 + $0x474] sm:$0xf]  ;;  %v5448_v29 = vld [vmem:[#allocation5 + $0xa24] sm:$0xf] }
 0x49c   :  { %2817 = vmatmul.bf16.vlgmr.msra.gmra.mxu1 %v2349_v62  ;;  %2843 = vmatmul.bf16.vlgmr.msra.gmra.mxu3 %v2349_v62  ;;  %v5411_v62 = vld [vmem:[#allocation5 + $0x80c] sm:$0xf0]  ;;  %v4959_v42 = vor.u32 %v5434_v46, %v4956_v43  ;;  %v5447_v46 = vld [vmem:[#allocation5 + $0x9b4] sm:$0xf0] }
 0x49d   :  { %3067 = vmatpush.bf16.msrb.mxu1 %v4875_v41  ;;  %3093 = vmatpush.bf16.msrb.mxu3 %v4879_v45  ;;  %v4859_v1 = vor.u32 %v5411_v62, %v4858_v61  ;;  %v5003_v43 = vor.u32 %v5447_v46, %v5002_v39 }
 0x49f   :  { %3056 = vmatpush.bf16.msrb.mxu0 %v4795_v51  ;;  %3082 = vmatpush.bf16.msrb.mxu2 %v4799_v53  ;;  %v5027_v53 = vor.u32 %v5453_v48, %v5026_v44  ;;  %v5446_v44 = vld [vmem:[#allocation5 + $0x954] sm:$0xf] }
 0x4a1   :  { %3068 = vmatpush.bf16.msrb.mxu1 %v4867_v55  ;;  %3094 = vmatpush.bf16.msrb.mxu3 %v4871_v57  ;;  %v5433_v55 = vld [vmem:[#allocation5 + $0x404] sm:$0xf0]  ;;  %v5432_v57 = vld [vmem:[#allocation5 + $0x3a4] sm:$0xf] }
 0x4a2   :  { %v4947_v5 = vor.u32 %v5433_v55, %v4946_v63  ;;  %v4994_v63 = vld [vmem:[#allocation5 + $0x880] sm:$0xf]  ;;  %v5445_v55 = vld [vmem:[#allocation5 + $0x8e4] sm:$0xf0] }
 0x4a3   :  { %3057 = vmatpush.bf16.msrb.mxu0 %v4787_v38  ;;  %3083 = vmatpush.bf16.msrb.mxu2 %v4791_v60  ;;  %v4948_v38 = vld [vmem:[#allocation5 + $0x408] sm:$0xf0]  ;;  %v5020_v60 = vld [vmem:[#allocation5 + $0xb58] sm:$0xf0] }
 0x4a4   :  { %v4951_v6 = vor.u32 %v5432_v57, %v4948_v38  ;;  %v4996_v57 = vld [vmem:[#allocation5 + $0x8e8] sm:$0xf0]  ;;  %v5424_v38 = vld [vmem:[#allocation5 + $0x64] sm:$0xf] }
 0x4a5   :  { %3069 = vmatpush.bf16.msrb.mxu1 %v4859_v1  ;;  %3095 = vmatpush.bf16.msrb.mxu3 %v4863_v3  ;;  %v5023_v1 = vor.u32 %v5450_v59, %v5020_v60  ;;  %v2418_v3 = vperm.slane %v5663_v17, 2  ;;  %v4916_v60 = vld [vmem:[#allocation5 + $0xc8] sm:$0xf0] }
 0x4a7   :  { %3304 = vmatpush.bf16.msra.mxu0 %v4971_v18  ;;  %3330 = vmatpush.bf16.msra.mxu2 %v4975_v23 }
 0x4a9   :  { %3070 = vmatpush.bf16.msrb.mxu1 %v4851_v8  ;;  %3096 = vmatpush.bf16.msrb.mxu3 %v4855_v9  ;;  %v4938_v8 = vld [vmem:[#allocation5 + $0x2d0] sm:$0xf]  ;;  %v5431_v9 = vld [vmem:[#allocation5 + $0x334] sm:$0xf0] }
 0x4aa   :  { %v4939_v13 = vor.u32 %v5431_v9, %v4938_v8  ;;  %v5440_v8 = vld [vmem:[#allocation5 + $0x6e4] sm:$0xf]  ;;  %v4980_v9 = vld [vmem:[#allocation5 + $0x748] sm:$0xf0] }
 0x4ab   :  { %3305 = vmatpush.bf16.msra.mxu0 %v4963_v28  ;;  %3331 = vmatpush.bf16.msra.mxu2 %v4967_v33  ;;  %v5449_v28 = vld [vmem:[#allocation5 + $0xa84] sm:$0xf0]  ;;  %v4930_v33 = vld [vmem:[#allocation5 + $0x200] sm:$0xf] }
 0x4ad   :  { %3317 = vmatpush.bf16.msra.mxu1 %v5035_v34  ;;  %3343 = vmatpush.bf16.msra.mxu3 %v5039_v35  ;;  %v5429_v34 = vld [vmem:[#allocation5 + $0x264] sm:$0xf0]  ;;  %v5428_v35 = vld [vmem:[#allocation5 + $0x204] sm:$0xf] }
 0x4ae   :  { %v4931_v17 = vor.u32 %v5429_v34, %v4930_v33 }
 0x4af   :  { %3306 = vmatpush.bf16.msra.mxu0 %v4955_v52  ;;  %3332 = vmatpush.bf16.msra.mxu2 %v4959_v42  ;;  %v4923_v52 = vor.u32 %v5427_v40, %v4922_v50  ;;  %v5444_v42 = vld [vmem:[#allocation5 + $0x884] sm:$0xf] }
 0x4b0   :  { %v4999_v47 = vor.u32 %v5444_v42, %v4996_v57 }
 0x4b1   :  { %3318 = vmatpush.bf16.msra.mxu1 %v5027_v53  ;;  %3344 = vmatpush.bf16.msra.mxu3 %v5031_v54  ;;  %v4924_v53 = vld [vmem:[#allocation5 + $0x198] sm:$0xf0] }
 0x4b3   :  { %3307 = vmatpush.bf16.msra.mxu0 %v4947_v5  ;;  %3333 = vmatpush.bf16.msra.mxu2 %v4951_v6  ;;  %v4978_v5 = vld [vmem:[#allocation5 + $0x6e0] sm:$0xf]  ;;  %v5441_v6 = vld [vmem:[#allocation5 + $0x744] sm:$0xf0] }
 0x4b5   :  { %3319 = vmatpush.bf16.msra.mxu1 %v5019_v0  ;;  %3345 = vmatpush.bf16.msra.mxu3 %v5023_v1  ;;  %v5443_v0 = vld [vmem:[#allocation5 + $0x814] sm:$0xf0]  ;;  %v5442_v1 = vld [vmem:[#allocation5 + $0x7b4] sm:$0xf] }
 0x4b7   :  { %3308 = vmatpush.bf16.msra.mxu0 %v4939_v13 }
 0x4bb   :  { %3309 = vmatpush.bf16.msra.mxu0 %v4931_v17 }
 0x4bf   :  { %3310 = vmatpush.bf16.msra.mxu0 %v4923_v52 }
 0x503   :  { %v2753_v10 = vpop.f32.mrf.mxu0 }
 0x504   :  { %v2754_v16 = vadd.f32 %v2753_v10, %v2416_v11  ;;  %v5430_v10 = vld [vmem:[#allocation5 + $0x2d4] sm:$0xf]  ;;  %v4940_v11 = vld [vmem:[#allocation5 + $0x338] sm:$0xf0] }
 0x505   :  { %v4943_v14 = vor.u32 %v5430_v10, %v4940_v11  ;;  %v4983_v10 = vor.u32 %v5440_v8, %v4980_v9  ;;  %v2884_v11 = vld [vmem:[#allocation7 + $0x16] sm:$0x3] }
 0x506   :  { %v2886_v13 = vperm.slane %v2884_v11, 0 }
 0x507   :  { %3334 = vmatpush.bf16.msra.mxu2 %v4943_v14 }
 0x509   :  { %v2766_v21 = vpop.f32.mrf.mxu1  ;;  %v2779_v22 = vpop.f32.mrf.mxu2 }
 0x50a   :  { %v2767_v36 = vadd.f32 %v2766_v21, %v2754_v16  ;;  %v2780_v45 = vadd.f32 %v2779_v22, %v2417_v12 }
 0x50b   :  { %v2755_v32 = vpop.f32.mrf.mxu0 }
 0x50c   :  { %v2848_v41 = vmax.f32 %v2767_v36, 0.0  ;;  %v5010_v36 = vld [vmem:[#allocation5 + $0xa20] sm:$0xf]  ;;  %v5015_v32 = vor.u32 %v5448_v29, %v5012_v31 }
 0x50d   :  { %v5011_v30 = vor.u32 %v5449_v28, %v5010_v36 }
 0x50e   :  { %v2850_v51 = vpack.c.bf16 %v2848_v41, %v2848_v41  ;;  %3346 = vmatpush.bf16.msra.mxu3 %v5015_v32  ;;  %v4935_v41 = vor.u32 %v5428_v35, %v4932_v37  ;;  %v3138_v32 = vld [vmem:[#allocation7 + $0x18] sm:$0x3] }
 0x50f   :  { %v2792_v56 = vpop.f32.mrf.mxu3  ;;  %3320 = vmatpush.bf16.msra.mxu1 %v5011_v30  ;;  %v3140_v34 = vperm.slane %v3138_v32, 0  ;;  %v3141_v39 = vperm.slane %v3138_v32, 1 }
 0x510   :  { %v2793_v49 = vadd.f32 %v2792_v56, %v2780_v45  ;;  %3058 = vmatmul.bf16.vlgmr.msrb.gmra.mxu0 %v2850_v51  ;;  %3084 = vmatmul.bf16.vlgmr.msrb.gmra.mxu2 %v2850_v51  ;;  %v5004_v45 = vld [vmem:[#allocation5 + $0x9b8] sm:$0xf0]  ;;  %v5426_v51 = vld [vmem:[#allocation5 + $0x134] sm:$0xf]  ;;  %v4995_v56 = vor.u32 %v5445_v55, %v4994_v63 }
 0x511   :  { %v2768_v61 = vpop.f32.mrf.mxu1  ;;  %v2781_v62 = vpop.f32.mrf.mxu2  ;;  %v5007_v48 = vor.u32 %v5446_v44, %v5004_v45  ;;  %3335 = vmatpush.bf16.msra.mxu2 %v4935_v41  ;;  %v4927_v54 = vor.u32 %v5426_v51, %v4924_v53 }
 0x512   :  { %v2849_v2 = vmax.f32 %v2793_v49, 0.0  ;;  %v5425_v49 = vld [vmem:[#allocation5 + $0xc4] sm:$0xf0]  ;;  %v4919_v61 = vor.u32 %v5424_v38, %v4916_v60  ;;  %v4986_v62 = vld [vmem:[#allocation5 + $0x7b0] sm:$0xf] }
 0x513   :  { %v2805_v4 = vpop.f32.mrf.mxu0  ;;  %3321 = vmatpush.bf16.msra.mxu1 %v5003_v43  ;;  %3347 = vmatpush.bf16.msra.mxu3 %v5007_v48  ;;  %v4915_v59 = vor.u32 %v5425_v49, %v4914_v58 }
 0x514   :  { %v2851_v7 = vpack.c.bf16 %v2849_v2, %v2849_v2  ;;  %v2806_v15 = vadd.f32 %v2805_v4, %v2418_v3  ;;  %v4987_v2 = vor.u32 %v5443_v0, %v4986_v62  ;;  %v4988_v3 = vld [vmem:[#allocation5 + $0x818] sm:$0xf0] }
 0x515   :  { %3336 = vmatpush.bf16.msra.mxu2 %v4927_v54  ;;  %3311 = vmatpush.bf16.msra.mxu0 %v4915_v59  ;;  %v4991_v4 = vor.u32 %v5442_v1, %v4988_v3 }
 0x516   :  { %3071 = vmatmul.bf16.vlgmr.msrb.gmra.mxu1 %v2851_v7  ;;  %3097 = vmatmul.bf16.vlgmr.msrb.gmra.mxu3 %v2851_v7  ;;  %v4979_v7 = vor.u32 %v5441_v6, %v4978_v5 }
 0x517   :  { %v2794_v12 = vpop.f32.mrf.mxu3  ;;  %3322 = vmatpush.bf16.msra.mxu1 %v4995_v56  ;;  %3348 = vmatpush.bf16.msra.mxu3 %v4999_v47 }
 0x519   :  { %v2818_v16 = vpop.f32.mrf.mxu1  ;;  %v2831_v18 = vpop.f32.mrf.mxu2  ;;  %3337 = vmatpush.bf16.msra.mxu2 %v4919_v61 }
 0x51a   :  { %v5668_v19 = vadd.f32 %v2818_v16, %v2806_v15  ;;  %v2832_v21 = vadd.f32 %v2831_v18, %v2419_v20  ;;  %v2887_v20 = vperm.slane %v2884_v11, 1 }
 0x51b   :  { %v2807_v25 = vpop.f32.mrf.mxu0  ;;  %3323 = vmatpush.bf16.msra.mxu1 %v4987_v2  ;;  %3349 = vmatpush.bf16.msra.mxu3 %v4991_v4 }
 0x51f   :  { %v2844_v22 = vpop.f32.mrf.mxu3  ;;  %3324 = vmatpush.bf16.msra.mxu1 %v4979_v7  ;;  %3350 = vmatpush.bf16.msra.mxu3 %v4983_v10 }
 0x520   :  { %v5671_v23 = vadd.f32 %v2844_v22, %v2832_v21 }
 0x521   :  { %v2820_v24 = vpop.f32.mrf.mxu1  ;;  %v2833_v26 = vpop.f32.mrf.mxu2 }
 0x527   :  { %v2846_v27 = vpop.f32.mrf.mxu3 }
 0x58d   :  { %v3059_v12 = vpop.f32.mrf.mxu0 }
 0x58e   :  { %v3060_v14 = vadd.f32 %v3059_v12, %v2886_v13 }
 0x593   :  { %v3072_v15 = vpop.f32.mrf.mxu1  ;;  %v3085_v16 = vpop.f32.mrf.mxu2 }
 0x594   :  { %v3073_v18 = vadd.f32 %v3072_v15, %v3060_v14  ;;  %v3086_v24 = vadd.f32 %v3085_v16, %v2887_v20 }
 0x595   :  { %v3061_v25 = vpop.f32.mrf.mxu0 }
 0x596   :  { %v3102_v21 = vadd.f32 %v3073_v18, %v5668_v19 }
 0x598   :  { %v3104_v22 = vpack.c.bf16 %v3102_v21, %v3102_v21 }
 0x599   :  { %v3098_v26 = vpop.f32.mrf.mxu3 }
 0x59a   :  { %v3099_v27 = vadd.f32 %v3098_v26, %v3086_v24  ;;  %3312 = vmatmul.bf16.vlgmr.msra.gmra.mxu0 %v3104_v22  ;;  %3338 = vmatmul.bf16.vlgmr.msra.gmra.mxu2 %v3104_v22 }
 0x59b   :  { %v3074_v36 = vpop.f32.mrf.mxu1  ;;  %v3087_v28 = vpop.f32.mrf.mxu2 }
 0x59c   :  { %v3103_v29 = vadd.f32 %v3099_v27, %v5671_v23 }
 0x59e   :  { %v3105_v30 = vpack.c.bf16 %v3103_v29, %v3103_v29 }
 0x5a0   :  { %3325 = vmatmul.bf16.vlgmr.msra.gmra.mxu1 %v3105_v30  ;;  %3351 = vmatmul.bf16.vlgmr.msra.gmra.mxu3 %v3105_v30 }
 0x5a1   :  { %v3100_v31 = vpop.f32.mrf.mxu3 }
 0x617   :  { %v3313_v33 = vpop.f32.mrf.mxu0 }
 0x618   :  { %v3314_v35 = vadd.f32 %v3313_v33, %v3140_v34 }
 0x61d   :  { %v3326_v17 = vpop.f32.mrf.mxu1  ;;  %v3339_v19 = vpop.f32.mrf.mxu2 }
 0x61e   :  { %v3327_v37 = vadd.f32 %v3326_v17, %v3314_v35  ;;  %v3340_v23 = vadd.f32 %v3339_v19, %v3141_v39 }
 0x61f   :  { %v3315_v46 = vpop.f32.mrf.mxu0 }
 0x620   :  { %3356 = vst [vmem:[#allocation8] sm:$0xff] %v3327_v37 }
 0x623   :  { %v3352_v41 = vpop.f32.mrf.mxu3 }
 0x624   :  { %v3353_v43 = vadd.f32 %v3352_v41, %v3340_v23 }
 0x625   :  { %v3328_v44 = vpop.f32.mrf.mxu1  ;;  %v3341_v45 = vpop.f32.mrf.mxu2 }
 0x626   :  { %3357 = vst [vmem:[#allocation8 + $0x8] sm:$0xff] %v3353_v43 }
 0x627   :  { %3368 = dma.vmem_to_hbm [thread:$0]  %s3364_s2, 256, %s3366_s30, [#allocation4]  }
 0x62b   :  { %v3354_v48 = vpop.f32.mrf.mxu3 }
 0x62c   :  { %5562 = dma.done.wait [#allocation4], 256  }
 0x62d   :  { %5563 = vsyncadd [#allocation4], 4294967040 }
 0x62e   :  { %3373 = vsyncpa [#allocation3], 1 }
 0x62f   :  { %3374 = vsyncpa [#allocation6], 1 }
 0x630   :  { %3375 = vsyncpa [#allocation4], 1 }

</bundles_post_ra>
